<compile_context>
chip_gen: v5e
topology: v5e:2x2
jax: 0.10.0
libtpu: 0.0.40
codegen_flags: <defaults>
</compile_context>

<pallas_src>
import math
import jax
import jax.numpy as jnp
from jax import lax
from jax.experimental import pallas as pl
from jax.experimental.pallas import tpu as pltpu

F32 = jnp.float32
NEG = -1e30


def _next_pow2(n):
    return 1 << (max(int(n), 1) - 1).bit_length()


# ----------------------------------------------------------------------------
# Fused kernel: both graphs (block-diagonal) + SAGPooling top-k + head
# ----------------------------------------------------------------------------
def fused_polymer_kernel(
        x_ref, wgx_ref, asrc_ref, bgat_ref,
        tile_ref, bmask_ref, ones_ref,
        pensl_ref, penadj_ref, adj_ref, hasin_ref,
        gsel_ref, gexp_ref, invn_ref,
        bn1w_ref, bn1b_ref, a1_ref,
        wsl_ref, wsr_ref, bs_ref,
        bn2w_ref, bn2b_ref, a2_ref,
        wrel_ref, wroot_ref, brel_ref,
        eye_ref, tiel_ref, samev_ref, vcol_ref, knode_ref,
        w1a_ref, w1g_ref, w1x_ref, b1_ref, a3_ref, addf_ref,
        w2_ref, b2_ref,
        out_ref):
    N2 = pensl_ref.shape[0]          # 2 * padded nodes (power of two)
    NP = N2 // 2
    H = bgat_ref.shape[1]

    ones_col = ones_ref[:, 0:1]                                          # (N2,1)

    # ---- masked max-aggregation over source nodes, built on the MXU ---------
    #   out[i,h] = max_j ( w[i,j] * feats[j,h] + pen[i,j] )
    # Messages are broadcast into [N2, SC*H] lane blocks per source chunk via
    # block-diagonal matmuls (no per-source cross-lane extracts) and reduced
    # back to H lanes with lane halvings (aligned halvings are free; the two
    # sub-lane-tile halvings are done once at the end).
    def masked_max_agg(w_mat, pen_mat, feats):
        SC = min(16, N2)                         # sources per chunk (pow2)
        CW = SC * H                              # chunk lane width
        w0 = CW
        while w0 > H and (w0 // 2) % 128 == 0:
            w0 //= 2                             # free (lane-tile aligned) part
        acc = jnp.full((N2, w0), NEG, F32)
        for c0 in range(0, N2, SC):
            lo = c0 * H
            bm = bmask_ref[:, lo:lo + CW]                                # (N2,CW)
            bd = jnp.dot(feats, tile_ref[:, lo:lo + CW],
                         preferred_element_type=F32) * bm                # (N2,CW)
            t = (jnp.dot(w_mat, bd, preferred_element_type=F32)
                 + jnp.dot(pen_mat, bm, preferred_element_type=F32))     # (N2,CW)
            w = CW
            while w > w0:
                h_ = w // 2
                t = jnp.maximum(t[:, :h_], t[:, h_:])
                w = h_
            acc = jnp.maximum(acc, t)
        w = w0
        while w > H:
            h_ = w // 2
            acc = jnp.maximum(acc[:, :h_], acc[:, h_:])
            w = h_
        return acc                                                       # (N2,H)

    # ---- per-graph BatchNorm (batch statistics) via MXU reductions ----------
    def batch_norm(h, w, b):
        mu_g = jnp.dot(gsel_ref[...], h, preferred_element_type=F32) * invn_ref[...]
        mu = jnp.dot(gexp_ref[...], mu_g, preferred_element_type=F32)
        d = h - mu
        var_g = (jnp.dot(gsel_ref[...], d * d, preferred_element_type=F32)
                 * invn_ref[...])
        var = jnp.dot(gexp_ref[...], var_g, preferred_element_type=F32)
        return d * lax.rsqrt(var + 1e-5) * w + b

    def prelu(h, a):
        return jnp.where(h > 0, h, a * h)

    # ---- GATConv(input_feat -> H, heads=1, aggr='max') ----------------------
    xw_ext = jnp.dot(x_ref[...], wgx_ref[...], preferred_element_type=F32)  # (N2,H+1)
    xw = xw_ext[:, 0:H]
    a_dst = xw_ext[:, H:H + 1]                                               # (N2,1)
    a_src = lax.dot_general(asrc_ref[...], xw, (((1,), (1,)), ((), ())),
                            preferred_element_type=F32)                      # (1,N2)
    e = a_dst + a_src
    e = jnp.where(e > 0, e, 0.2 * e)                                          # LeakyReLU
    e = e + pensl_ref[...]                                                    # mask non-edges
    p = jnp.exp(e - jnp.max(e, axis=1, keepdims=True))                        # unnormalised
    inv_s = pl.reciprocal(jnp.dot(p, ones_col, preferred_element_type=F32))   # exact

    h1 = masked_max_agg(p, pensl_ref[...], xw) * inv_s + bgat_ref[...]
    h1 = prelu(batch_norm(h1, bn1w_ref[...], bn1b_ref[...]), a1_ref[...])

    # ---- SAGEConv(H -> H, aggr='max') ----------------------------------------
    agg = masked_max_agg(ones_ref[...], penadj_ref[...], h1) * hasin_ref[...]
    h2 = (jnp.dot(agg, wsl_ref[...], preferred_element_type=F32)
          + jnp.dot(h1, wsr_ref[...], preferred_element_type=F32)
          + bs_ref[...])
    h2 = prelu(batch_norm(h2, bn2w_ref[...], bn2b_ref[...]), a2_ref[...])

    # ---- SAGPooling score = tanh(GraphConv(H -> 1, aggr='add')) --------------
    aggsum = jnp.dot(adj_ref[...], h2, preferred_element_type=F32)            # (N2,H)
    s_raw = (lax.dot_general(wrel_ref[...], aggsum, (((1,), (1,)), ((), ())),
                             preferred_element_type=F32)
             + lax.dot_general(wroot_ref[...], h2, (((1,), (1,)), ((), ())),
                               preferred_element_type=F32)
             + brel_ref[...])                                                 # (1,N2)
    s_row = jnp.tanh(s_raw)                                                   # (1,N2)
    s_col = lax.dot_general(eye_ref[...], s_row, (((1,), (1,)), ((), ())),
                            preferred_element_type=F32)                       # (N2,1) exact copy

    # ---- in-kernel per-graph top-k (rank, ties toward lower node index) ------
    gt = (s_row > s_col).astype(F32)
    eq = (s_row == s_col).astype(F32)
    better = (gt + eq * tiel_ref[...]) * samev_ref[...]
    rank = jnp.dot(better, ones_col, preferred_element_type=F32)              # (N2,1)
    selected = (vcol_ref[...] > 0) & (rank < knode_ref[...])

    # ---- gated (x * tanh(score)) global max pool over selected nodes ---------
    gated = jnp.where(selected, h2 * s_col, NEG)
    pooled_a = jnp.max(gated[0:NP, :], axis=0, keepdims=True)                 # (1,H)
    pooled_g = jnp.max(gated[NP:, :], axis=0, keepdims=True)                  # (1,H)

    # ---- head: fc1 + PReLU + fc2 + evidential softplus ------------------------
    z = (jnp.dot(pooled_a, w1a_ref[...], preferred_element_type=F32)
         + jnp.dot(pooled_g, w1g_ref[...], preferred_element_type=F32)
         + jnp.dot(addf_ref[...], w1x_ref[...], preferred_element_type=F32)
         + b1_ref[...])
    z = prelu(z, a3_ref[...])
    o = jnp.dot(z, w2_ref[...], preferred_element_type=F32) + b2_ref[...]     # (1,4)

    sp = jnp.maximum(o, 0.0) + jnp.log(1.0 + jnp.exp(-jnp.abs(o)))
    c4 = lax.broadcasted_iota(jnp.int32, o.shape, 1)
    out_ref[...] = jnp.where(c4 == 0, o, sp + jnp.where(c4 == 2, 1.0, 0.0))


# ----------------------------------------------------------------------------
# Wrapper: padding, block-diagonal stacking, trace-time constants & weights
# ----------------------------------------------------------------------------
_VMEM = pl.BlockSpec(memory_space=pltpu.MemorySpace.VMEM)


def polymer_gnn_iv_evidential(xA, adjA, xG, adjG, add_features, params, ratio=0.5):
    nA, F = xA.shape
    nG = xG.shape[0]
    H = params["wg"].shape[1]
    A = add_features.shape[-1]

    NP = _next_pow2(max(nA, nG, 8))              # per-graph padded node count
    N2 = 2 * NP                                  # joint (block-diagonal) size
    NH = N2 * H
    kA = int(math.ceil(ratio * nA))
    kG = int(math.ceil(ratio * nG))

    # stacked, zero padded node features & block-diagonal adjacency (row = dst)
    x_all = jnp.zeros((N2, F), F32).at[:nA].set(xA).at[NP:NP + nG].set(xG)
    adj = (jnp.zeros((N2, N2), F32)
           .at[:nA, :nA].set(adjA)
           .at[NP:NP + nG, NP:NP + nG].set(adjG))
    adj_sl = adj + jnp.eye(N2, dtype=F32)                          # GAT self loops

    pen_sl = jnp.where(adj_sl > 0, 0.0, NEG).astype(F32)
    pen_adj = jnp.where(adj > 0, 0.0, NEG).astype(F32)
    has_in = (jnp.sum(adj, axis=1, keepdims=True) > 0).astype(F32)

    # per-graph masks / constants (trace-time; nA, nG, NP are Python ints)
    idx = jnp.arange(N2)
    validA = (idx < nA).astype(F32)
    validG = ((idx >= NP) & (idx < NP + nG)).astype(F32)
    valid = validA + validG
    gsel = jnp.stack([validA, validG], axis=0)                     # (2, N2)
    gexp = gsel.T                                                  # (N2, 2)
    inv_n = jnp.array([[1.0 / nA], [1.0 / nG]], dtype=F32)
    valid_col = valid.reshape(N2, 1)
    k_node = jnp.where(idx < NP, float(kA), float(kG)).astype(F32).reshape(N2, 1)
    in_a = idx < NP
    same_valid = (in_a[:, None] == in_a[None, :]).astype(F32) * valid[None, :]
    tie_lower = (idx[None, :] < idx[:, None]).astype(F32)
    eye = jnp.eye(N2, dtype=F32)
    ones_nn = jnp.ones((N2, N2), dtype=F32)

    # block-broadcast constants for the MXU-based max aggregation
    cc = jnp.arange(NH)
    blockmask = (cc[None, :] // H == idx[:, None]).astype(F32)     # (N2, NH)
    tile_mat = (cc[None, :] % H == jnp.arange(H)[:, None]).astype(F32)  # (H, NH)

    # trace-time weight merging
    wg_ext = jnp.concatenate(
        [params["wg"], params["wg"] @ params["att_dst"].T], axis=1)          # (F, H+1)
    w1x_pad = jnp.zeros((8, H), F32).at[:A, :].set(params["fc1_wx"])
    add_pad = jnp.zeros((1, 8), F32).at[:, :A].set(add_features.reshape(1, A))

    ins = [x_all, wg_ext, params["att_src"], params["b_gat"],
           tile_mat, blockmask, ones_nn,
           pen_sl, pen_adj, adj, has_in,
           gsel, gexp, inv_n,
           params["bn1_w"], params["bn1_b"], params["a1"],
           params["w_sage_l"], params["w_sage_r"], params["b_sage_l"],
           params["bn2_w"], params["bn2_b"], params["a2"],
           params["w_rel"].T, params["w_root"].T, params["b_rel"],
           eye, tie_lower, same_valid, valid_col, k_node,
           params["fc1_wa"], params["fc1_wg"], w1x_pad, params["fc1_b"],
           params["a3"], add_pad,
           params["fc2_w"], params["fc2_b"]]

    out = pl.pallas_call(
        fused_polymer_kernel,
        out_shape=jax.ShapeDtypeStruct((1, 4), F32),
        in_specs=[_VMEM] * len(ins),
        out_specs=_VMEM,
    )(*ins)
    return {"gamma": out[0, 0], "v": out[0, 1], "alpha": out[0, 2], "beta": out[0, 3]}


# ----------------------------------------------------------------------------
# Deterministic parameter / input construction
# ----------------------------------------------------------------------------
def make_params(key, input_feat, hidden, num_additional):
    def nrm(k, shape, scale=0.2):
        return scale * jax.random.normal(k, shape, dtype=F32)

    ks = jax.random.split(key, 24)
    H, F, A = hidden, input_feat, num_additional
    return dict(
        # GATConv
        wg=nrm(ks[0], (F, H)), att_src=nrm(ks[1], (1, H)), att_dst=nrm(ks[2], (1, H)),
        b_gat=nrm(ks[3], (1, H), 0.05),
        bn1_w=1.0 + nrm(ks[4], (1, H), 0.05), bn1_b=nrm(ks[5], (1, H), 0.05),
        a1=jnp.full((1, 1), 0.25, F32),
        # SAGEConv
        w_sage_l=nrm(ks[6], (H, H)), b_sage_l=nrm(ks[7], (1, H), 0.05),
        w_sage_r=nrm(ks[8], (H, H)),
        bn2_w=1.0 + nrm(ks[9], (1, H), 0.05), bn2_b=nrm(ks[10], (1, H), 0.05),
        a2=jnp.full((1, 1), 0.25, F32),
        # SAGPooling GraphConv(H -> 1)
        w_rel=nrm(ks[11], (H, 1)), b_rel=nrm(ks[12], (1, 1), 0.05),
        w_root=nrm(ks[13], (H, 1)),
        # fc1 (split: [H | H | A] rows) + PReLU + fc2
        fc1_wa=nrm(ks[14], (H, H)), fc1_wg=nrm(ks[15], (H, H)), fc1_wx=nrm(ks[16], (A, H)),
        fc1_b=nrm(ks[17], (1, H), 0.05),
        a3=jnp.full((1, 1), 0.25, F32),
        fc2_w=nrm(ks[18], (H, 4)), fc2_b=nrm(ks[19], (1, 4), 0.05),
    )


def make_graph(key, n_nodes, n_feat, n_chords=3):
    kx, kc = jax.random.split(key)
    x = jax.random.normal(kx, (n_nodes, n_feat), dtype=F32)
    adj = jnp.zeros((n_nodes, n_nodes), F32)
    src = jnp.arange(n_nodes)
    dst = (src + 1) % n_nodes
    adj = adj.at[dst, src].set(1.0).at[src, dst].set(1.0)          # undirected ring
    csrc = jax.random.randint(kc, (n_chords,), 0, n_nodes)
    cdst = (csrc + n_nodes // 2) % n_nodes
    adj = adj.at[cdst, csrc].set(1.0).at[csrc, cdst].set(1.0)      # a few chords
    adj = adj * (1.0 - jnp.eye(n_nodes, dtype=F32))                # no self loops
    return x, adj


if __name__ == "__main__":
    INPUT_FEAT = 6
    HIDDEN = 32
    NUM_ADD = 3
    N_A, N_G = 14, 11

    root = jax.random.PRNGKey(0)
    k_par, k_ga, k_gg, k_add = jax.random.split(root, 4)

    params = make_params(k_par, INPUT_FEAT, HIDDEN, NUM_ADD)
    xA, adjA = make_graph(k_ga, N_A, INPUT_FEAT)
    xG, adjG = make_graph(k_gg, N_G, INPUT_FEAT)
    add_features = jax.random.normal(k_add, (1, NUM_ADD), dtype=F32)

    fwd = jax.jit(polymer_gnn_iv_evidential)
    result = fwd(xA, adjA, xG, adjG, add_features, params)
    result = jax.block_until_ready(result)

    vals = jnp.stack([result["gamma"], result["v"], result["alpha"], result["beta"]])
    assert bool(jnp.all(jnp.isfinite(vals)))
    assert float(result["v"]) >= 0.0
    assert float(result["alpha"]) >= 1.0
    assert float(result["beta"]) >= 0.0
    print("KERNEL_OK")
</pallas_src>

<mosaic_0001>
module attributes {stable_mosaic.version = 11 : i64} {
  func.func @fused_polymer_kernel(%arg0: memref<32x6xf32, #tpu.memory_space<vmem>>, %arg1: memref<6x33xf32, #tpu.memory_space<vmem>>, %arg2: memref<1x32xf32, #tpu.memory_space<vmem>>, %arg3: memref<1x32xf32, #tpu.memory_space<vmem>>, %arg4: memref<32x1024xf32, #tpu.memory_space<vmem>>, %arg5: memref<32x1024xf32, #tpu.memory_space<vmem>>, %arg6: memref<32x32xf32, #tpu.memory_space<vmem>>, %arg7: memref<32x32xf32, #tpu.memory_space<vmem>>, %arg8: memref<32x32xf32, #tpu.memory_space<vmem>>, %arg9: memref<32x32xf32, #tpu.memory_space<vmem>>, %arg10: memref<32x1xf32, #tpu.memory_space<vmem>>, %arg11: memref<2x32xf32, #tpu.memory_space<vmem>>, %arg12: memref<32x2xf32, #tpu.memory_space<vmem>>, %arg13: memref<2x1xf32, #tpu.memory_space<vmem>>, %arg14: memref<1x32xf32, #tpu.memory_space<vmem>>, %arg15: memref<1x32xf32, #tpu.memory_space<vmem>>, %arg16: memref<1x1xf32, #tpu.memory_space<vmem>>, %arg17: memref<32x32xf32, #tpu.memory_space<vmem>>, %arg18: memref<32x32xf32, #tpu.memory_space<vmem>>, %arg19: memref<1x32xf32, #tpu.memory_space<vmem>>, %arg20: memref<1x32xf32, #tpu.memory_space<vmem>>, %arg21: memref<1x32xf32, #tpu.memory_space<vmem>>, %arg22: memref<1x1xf32, #tpu.memory_space<vmem>>, %arg23: memref<1x32xf32, #tpu.memory_space<vmem>>, %arg24: memref<1x32xf32, #tpu.memory_space<vmem>>, %arg25: memref<1x1xf32, #tpu.memory_space<vmem>>, %arg26: memref<32x32xf32, #tpu.memory_space<vmem>>, %arg27: memref<32x32xf32, #tpu.memory_space<vmem>>, %arg28: memref<32x32xf32, #tpu.memory_space<vmem>>, %arg29: memref<32x1xf32, #tpu.memory_space<vmem>>, %arg30: memref<32x1xf32, #tpu.memory_space<vmem>>, %arg31: memref<32x32xf32, #tpu.memory_space<vmem>>, %arg32: memref<32x32xf32, #tpu.memory_space<vmem>>, %arg33: memref<8x32xf32, #tpu.memory_space<vmem>>, %arg34: memref<1x32xf32, #tpu.memory_space<vmem>>, %arg35: memref<1x1xf32, #tpu.memory_space<vmem>>, %arg36: memref<1x8xf32, #tpu.memory_space<vmem>>, %arg37: memref<32x4xf32, #tpu.memory_space<vmem>>, %arg38: memref<1x4xf32, #tpu.memory_space<vmem>>, %arg39: memref<1x4xf32, #tpu.memory_space<vmem>>) attributes {dimension_semantics = [], scalar_prefetch = 0 : i64, scratch_operands = 0 : i64, tpu.core_type = #tpu.core_type<tc>} {
    %c0 = arith.constant 0 : index
    %c0_0 = arith.constant 0 : index
    %0 = vector.load %arg6[%c0, %c0_0] : memref<32x32xf32, #tpu.memory_space<vmem>>, vector<32x1xf32>
    %c0_1 = arith.constant 0 : index
    %c0_2 = arith.constant 0 : index
    %1 = vector.load %arg0[%c0_1, %c0_2] : memref<32x6xf32, #tpu.memory_space<vmem>>, vector<32x6xf32>
    %c0_3 = arith.constant 0 : index
    %c0_4 = arith.constant 0 : index
    %2 = vector.load %arg1[%c0_3, %c0_4] : memref<6x33xf32, #tpu.memory_space<vmem>>, vector<6x33xf32>
    %cst = arith.constant dense<0.000000e+00> : vector<32x33xf32>
    %3 = tpu.matmul %1, %2, %cst {dimension_numbers = #tpu.dot_dimension_numbers<[1], [0], [0], [1], [0, 0, 1, 1], [], []>} : vector<32x6xf32>, vector<6x33xf32>, vector<32x33xf32> -> vector<32x33xf32>
    %4 = vector.extract_strided_slice %3 {offsets = [0, 0], sizes = [32, 32], strides = [1, 1]} : vector<32x33xf32> to vector<32x32xf32>
    %5 = vector.extract_strided_slice %3 {offsets = [0, 32], sizes = [32, 1], strides = [1, 1]} : vector<32x33xf32> to vector<32x1xf32>
    %c0_5 = arith.constant 0 : index
    %c0_6 = arith.constant 0 : index
    %6 = vector.load %arg2[%c0_5, %c0_6] : memref<1x32xf32, #tpu.memory_space<vmem>>, vector<1x32xf32>
    %cst_7 = arith.constant dense<0.000000e+00> : vector<1x32xf32>
    %7 = tpu.matmul %6, %4, %cst_7 {dimension_numbers = #tpu.dot_dimension_numbers<[1], [1], [0], [0], [0, 0, 1, 0], [], []>} : vector<1x32xf32>, vector<32x32xf32>, vector<1x32xf32> -> vector<1x32xf32>
    %8 = vector.broadcast %5 : vector<32x1xf32> to vector<32x32xf32>
    %9 = vector.broadcast %7 : vector<1x32xf32> to vector<32x32xf32>
    %10 = arith.addf %8, %9 : vector<32x32xf32>
    %cst_8 = arith.constant 0.000000e+00 : f32
    %11 = vector.broadcast %cst_8 : f32 to vector<32x32xf32>
    %12 = arith.cmpf ogt, %10, %11 : vector<32x32xf32>
    %cst_9 = arith.constant 2.000000e-01 : f32
    %13 = vector.broadcast %cst_9 : f32 to vector<32x32xf32>
    %14 = arith.mulf %13, %10 : vector<32x32xf32>
    %15 = arith.select %12, %10, %14 : vector<32x32xi1>, vector<32x32xf32>
    %c0_10 = arith.constant 0 : index
    %c0_11 = arith.constant 0 : index
    %16 = vector.load %arg7[%c0_10, %c0_11] : memref<32x32xf32, #tpu.memory_space<vmem>>, vector<32x32xf32>
    %17 = arith.addf %15, %16 : vector<32x32xf32>
    %cst_12 = arith.constant dense<0xFF800000> : vector<32xf32>
    %18 = vector.multi_reduction <maximumf>, %17, %cst_12 [1] : vector<32x32xf32> to vector<32xf32>
    %19 = vector.shape_cast %18 : vector<32xf32> to vector<32x1xf32>
    %20 = vector.broadcast %19 : vector<32x1xf32> to vector<32x32xf32>
    %21 = arith.subf %17, %20 : vector<32x32xf32>
    %22 = math.exp %21 : vector<32x32xf32>
    %cst_13 = arith.constant dense<0.000000e+00> : vector<32x1xf32>
    %23 = tpu.matmul %22, %0, %cst_13 {dimension_numbers = #tpu.dot_dimension_numbers<[1], [0], [0], [1], [0, 0, 1, 1], [], []>} : vector<32x32xf32>, vector<32x1xf32>, vector<32x1xf32> -> vector<32x1xf32>
    %24 = tpu.reciprocal %23 : vector<32x1xf32> -> vector<32x1xf32>
    %c0_14 = arith.constant 0 : index
    %c0_15 = arith.constant 0 : index
    %25 = vector.load %arg7[%c0_14, %c0_15] : memref<32x32xf32, #tpu.memory_space<vmem>>, vector<32x32xf32>
    %cst_16 = arith.constant -1.000000e+30 : f32
    %26 = vector.broadcast %cst_16 : f32 to vector<32x128xf32>
    %c0_17 = arith.constant 0 : index
    %c0_18 = arith.constant 0 : index
    %27 = vector.load %arg5[%c0_17, %c0_18] : memref<32x1024xf32, #tpu.memory_space<vmem>>, vector<32x512xf32>
    %c0_19 = arith.constant 0 : index
    %c0_20 = arith.constant 0 : index
    %28 = vector.load %arg4[%c0_19, %c0_20] : memref<32x1024xf32, #tpu.memory_space<vmem>>, vector<32x512xf32>
    %cst_21 = arith.constant dense<0.000000e+00> : vector<32x512xf32>
    %29 = tpu.matmul %4, %28, %cst_21 {dimension_numbers = #tpu.dot_dimension_numbers<[1], [0], [0], [1], [0, 0, 1, 1], [], []>} : vector<32x32xf32>, vector<32x512xf32>, vector<32x512xf32> -> vector<32x512xf32>
    %30 = arith.mulf %29, %27 : vector<32x512xf32>
    %cst_22 = arith.constant dense<0.000000e+00> : vector<32x512xf32>
    %31 = tpu.matmul %22, %30, %cst_22 {dimension_numbers = #tpu.dot_dimension_numbers<[1], [0], [0], [1], [0, 0, 1, 1], [], []>} : vector<32x32xf32>, vector<32x512xf32>, vector<32x512xf32> -> vector<32x512xf32>
    %cst_23 = arith.constant dense<0.000000e+00> : vector<32x512xf32>
    %32 = tpu.matmul %25, %27, %cst_23 {dimension_numbers = #tpu.dot_dimension_numbers<[1], [0], [0], [1], [0, 0, 1, 1], [], []>} : vector<32x32xf32>, vector<32x512xf32>, vector<32x512xf32> -> vector<32x512xf32>
    %33 = arith.addf %31, %32 : vector<32x512xf32>
    %34 = vector.extract_strided_slice %33 {offsets = [0, 0], sizes = [32, 256], strides = [1, 1]} : vector<32x512xf32> to vector<32x256xf32>
    %35 = vector.extract_strided_slice %33 {offsets = [0, 256], sizes = [32, 256], strides = [1, 1]} : vector<32x512xf32> to vector<32x256xf32>
    %36 = arith.maximumf %34, %35 : vector<32x256xf32>
    %37 = vector.extract_strided_slice %36 {offsets = [0, 0], sizes = [32, 128], strides = [1, 1]} : vector<32x256xf32> to vector<32x128xf32>
    %38 = vector.extract_strided_slice %36 {offsets = [0, 128], sizes = [32, 128], strides = [1, 1]} : vector<32x256xf32> to vector<32x128xf32>
    %39 = arith.maximumf %37, %38 : vector<32x128xf32>
    %40 = arith.maximumf %26, %39 : vector<32x128xf32>
    %c0_24 = arith.constant 0 : index
    %c512 = arith.constant 512 : index
    %41 = vector.load %arg5[%c0_24, %c512] : memref<32x1024xf32, #tpu.memory_space<vmem>>, vector<32x512xf32>
    %c0_25 = arith.constant 0 : index
    %c512_26 = arith.constant 512 : index
    %42 = vector.load %arg4[%c0_25, %c512_26] : memref<32x1024xf32, #tpu.memory_space<vmem>>, vector<32x512xf32>
    %cst_27 = arith.constant dense<0.000000e+00> : vector<32x512xf32>
    %43 = tpu.matmul %4, %42, %cst_27 {dimension_numbers = #tpu.dot_dimension_numbers<[1], [0], [0], [1], [0, 0, 1, 1], [], []>} : vector<32x32xf32>, vector<32x512xf32>, vector<32x512xf32> -> vector<32x512xf32>
    %44 = arith.mulf %43, %41 : vector<32x512xf32>
    %cst_28 = arith.constant dense<0.000000e+00> : vector<32x512xf32>
    %45 = tpu.matmul %22, %44, %cst_28 {dimension_numbers = #tpu.dot_dimension_numbers<[1], [0], [0], [1], [0, 0, 1, 1], [], []>} : vector<32x32xf32>, vector<32x512xf32>, vector<32x512xf32> -> vector<32x512xf32>
    %cst_29 = arith.constant dense<0.000000e+00> : vector<32x512xf32>
    %46 = tpu.matmul %25, %41, %cst_29 {dimension_numbers = #tpu.dot_dimension_numbers<[1], [0], [0], [1], [0, 0, 1, 1], [], []>} : vector<32x32xf32>, vector<32x512xf32>, vector<32x512xf32> -> vector<32x512xf32>
    %47 = arith.addf %45, %46 : vector<32x512xf32>
    %48 = vector.extract_strided_slice %47 {offsets = [0, 0], sizes = [32, 256], strides = [1, 1]} : vector<32x512xf32> to vector<32x256xf32>
    %49 = vector.extract_strided_slice %47 {offsets = [0, 256], sizes = [32, 256], strides = [1, 1]} : vector<32x512xf32> to vector<32x256xf32>
    %50 = arith.maximumf %48, %49 : vector<32x256xf32>
    %51 = vector.extract_strided_slice %50 {offsets = [0, 0], sizes = [32, 128], strides = [1, 1]} : vector<32x256xf32> to vector<32x128xf32>
    %52 = vector.extract_strided_slice %50 {offsets = [0, 128], sizes = [32, 128], strides = [1, 1]} : vector<32x256xf32> to vector<32x128xf32>
    %53 = arith.maximumf %51, %52 : vector<32x128xf32>
    %54 = arith.maximumf %40, %53 : vector<32x128xf32>
    %55 = vector.extract_strided_slice %54 {offsets = [0, 0], sizes = [32, 64], strides = [1, 1]} : vector<32x128xf32> to vector<32x64xf32>
    %56 = vector.extract_strided_slice %54 {offsets = [0, 64], sizes = [32, 64], strides = [1, 1]} : vector<32x128xf32> to vector<32x64xf32>
    %57 = arith.maximumf %55, %56 : vector<32x64xf32>
    %58 = vector.extract_strided_slice %57 {offsets = [0, 0], sizes = [32, 32], strides = [1, 1]} : vector<32x64xf32> to vector<32x32xf32>
    %59 = vector.extract_strided_slice %57 {offsets = [0, 32], sizes = [32, 32], strides = [1, 1]} : vector<32x64xf32> to vector<32x32xf32>
    %60 = arith.maximumf %58, %59 : vector<32x32xf32>
    %61 = vector.broadcast %24 : vector<32x1xf32> to vector<32x32xf32>
    %62 = arith.mulf %60, %61 : vector<32x32xf32>
    %c0_30 = arith.constant 0 : index
    %c0_31 = arith.constant 0 : index
    %63 = vector.load %arg3[%c0_30, %c0_31] : memref<1x32xf32, #tpu.memory_space<vmem>>, vector<1x32xf32>
    %64 = vector.broadcast %63 : vector<1x32xf32> to vector<32x32xf32>
    %65 = arith.addf %62, %64 : vector<32x32xf32>
    %c0_32 = arith.constant 0 : index
    %c0_33 = arith.constant 0 : index
    %66 = vector.load %arg14[%c0_32, %c0_33] : memref<1x32xf32, #tpu.memory_space<vmem>>, vector<1x32xf32>
    %c0_34 = arith.constant 0 : index
    %c0_35 = arith.constant 0 : index
    %67 = vector.load %arg15[%c0_34, %c0_35] : memref<1x32xf32, #tpu.memory_space<vmem>>, vector<1x32xf32>
    %c0_36 = arith.constant 0 : index
    %c0_37 = arith.constant 0 : index
    %68 = vector.load %arg11[%c0_36, %c0_37] : memref<2x32xf32, #tpu.memory_space<vmem>>, vector<2x32xf32>
    %cst_38 = arith.constant dense<0.000000e+00> : vector<2x32xf32>
    %69 = tpu.matmul %68, %65, %cst_38 {dimension_numbers = #tpu.dot_dimension_numbers<[1], [0], [0], [1], [0, 0, 1, 1], [], []>} : vector<2x32xf32>, vector<32x32xf32>, vector<2x32xf32> -> vector<2x32xf32>
    %c0_39 = arith.constant 0 : index
    %c0_40 = arith.constant 0 : index
    %70 = vector.load %arg13[%c0_39, %c0_40] : memref<2x1xf32, #tpu.memory_space<vmem>>, vector<2x1xf32>
    %71 = vector.broadcast %70 : vector<2x1xf32> to vector<2x32xf32>
    %72 = arith.mulf %69, %71 : vector<2x32xf32>
    %c0_41 = arith.constant 0 : index
    %c0_42 = arith.constant 0 : index
    %73 = vector.load %arg12[%c0_41, %c0_42] : memref<32x2xf32, #tpu.memory_space<vmem>>, vector<32x2xf32>
    %cst_43 = arith.constant dense<0.000000e+00> : vector<32x32xf32>
    %74 = tpu.matmul %73, %72, %cst_43 {dimension_numbers = #tpu.dot_dimension_numbers<[1], [0], [0], [1], [0, 0, 1, 1], [], []>} : vector<32x2xf32>, vector<2x32xf32>, vector<32x32xf32> -> vector<32x32xf32>
    %75 = arith.subf %65, %74 : vector<32x32xf32>
    %c0_44 = arith.constant 0 : index
    %c0_45 = arith.constant 0 : index
    %76 = vector.load %arg11[%c0_44, %c0_45] : memref<2x32xf32, #tpu.memory_space<vmem>>, vector<2x32xf32>
    %77 = arith.mulf %75, %75 : vector<32x32xf32>
    %cst_46 = arith.constant dense<0.000000e+00> : vector<2x32xf32>
    %78 = tpu.matmul %76, %77, %cst_46 {dimension_numbers = #tpu.dot_dimension_numbers<[1], [0], [0], [1], [0, 0, 1, 1], [], []>} : vector<2x32xf32>, vector<32x32xf32>, vector<2x32xf32> -> vector<2x32xf32>
    %c0_47 = arith.constant 0 : index
    %c0_48 = arith.constant 0 : index
    %79 = vector.load %arg13[%c0_47, %c0_48] : memref<2x1xf32, #tpu.memory_space<vmem>>, vector<2x1xf32>
    %80 = vector.broadcast %79 : vector<2x1xf32> to vector<2x32xf32>
    %81 = arith.mulf %78, %80 : vector<2x32xf32>
    %c0_49 = arith.constant 0 : index
    %c0_50 = arith.constant 0 : index
    %82 = vector.load %arg12[%c0_49, %c0_50] : memref<32x2xf32, #tpu.memory_space<vmem>>, vector<32x2xf32>
    %cst_51 = arith.constant dense<0.000000e+00> : vector<32x32xf32>
    %83 = tpu.matmul %82, %81, %cst_51 {dimension_numbers = #tpu.dot_dimension_numbers<[1], [0], [0], [1], [0, 0, 1, 1], [], []>} : vector<32x2xf32>, vector<2x32xf32>, vector<32x32xf32> -> vector<32x32xf32>
    %cst_52 = arith.constant 9.99999974E-6 : f32
    %84 = vector.broadcast %cst_52 : f32 to vector<32x32xf32>
    %85 = arith.addf %83, %84 : vector<32x32xf32>
    %86 = math.rsqrt %85 : vector<32x32xf32>
    %87 = arith.mulf %75, %86 : vector<32x32xf32>
    %88 = vector.broadcast %66 : vector<1x32xf32> to vector<32x32xf32>
    %89 = arith.mulf %87, %88 : vector<32x32xf32>
    %90 = vector.broadcast %67 : vector<1x32xf32> to vector<32x32xf32>
    %91 = arith.addf %89, %90 : vector<32x32xf32>
    %c0_53 = arith.constant 0 : index
    %c0_54 = arith.constant 0 : index
    %92 = vector.load %arg16[%c0_53, %c0_54] : memref<1x1xf32, #tpu.memory_space<vmem>>, vector<1x1xf32>
    %cst_55 = arith.constant 0.000000e+00 : f32
    %93 = vector.broadcast %cst_55 : f32 to vector<32x32xf32>
    %94 = arith.cmpf ogt, %91, %93 : vector<32x32xf32>
    %95 = vector.broadcast %92 : vector<1x1xf32> to vector<32x32xf32>
    %96 = arith.mulf %95, %91 : vector<32x32xf32>
    %97 = arith.select %94, %91, %96 : vector<32x32xi1>, vector<32x32xf32>
    %c0_56 = arith.constant 0 : index
    %c0_57 = arith.constant 0 : index
    %98 = vector.load %arg6[%c0_56, %c0_57] : memref<32x32xf32, #tpu.memory_space<vmem>>, vector<32x32xf32>
    %c0_58 = arith.constant 0 : index
    %c0_59 = arith.constant 0 : index
    %99 = vector.load %arg8[%c0_58, %c0_59] : memref<32x32xf32, #tpu.memory_space<vmem>>, vector<32x32xf32>
    %cst_60 = arith.constant -1.000000e+30 : f32
    %100 = vector.broadcast %cst_60 : f32 to vector<32x128xf32>
    %c0_61 = arith.constant 0 : index
    %c0_62 = arith.constant 0 : index
    %101 = vector.load %arg5[%c0_61, %c0_62] : memref<32x1024xf32, #tpu.memory_space<vmem>>, vector<32x512xf32>
    %c0_63 = arith.constant 0 : index
    %c0_64 = arith.constant 0 : index
    %102 = vector.load %arg4[%c0_63, %c0_64] : memref<32x1024xf32, #tpu.memory_space<vmem>>, vector<32x512xf32>
    %cst_65 = arith.constant dense<0.000000e+00> : vector<32x512xf32>
    %103 = tpu.matmul %97, %102, %cst_65 {dimension_numbers = #tpu.dot_dimension_numbers<[1], [0], [0], [1], [0, 0, 1, 1], [], []>} : vector<32x32xf32>, vector<32x512xf32>, vector<32x512xf32> -> vector<32x512xf32>
    %104 = arith.mulf %103, %101 : vector<32x512xf32>
    %cst_66 = arith.constant dense<0.000000e+00> : vector<32x512xf32>
    %105 = tpu.matmul %98, %104, %cst_66 {dimension_numbers = #tpu.dot_dimension_numbers<[1], [0], [0], [1], [0, 0, 1, 1], [], []>} : vector<32x32xf32>, vector<32x512xf32>, vector<32x512xf32> -> vector<32x512xf32>
    %cst_67 = arith.constant dense<0.000000e+00> : vector<32x512xf32>
    %106 = tpu.matmul %99, %101, %cst_67 {dimension_numbers = #tpu.dot_dimension_numbers<[1], [0], [0], [1], [0, 0, 1, 1], [], []>} : vector<32x32xf32>, vector<32x512xf32>, vector<32x512xf32> -> vector<32x512xf32>
    %107 = arith.addf %105, %106 : vector<32x512xf32>
    %108 = vector.extract_strided_slice %107 {offsets = [0, 0], sizes = [32, 256], strides = [1, 1]} : vector<32x512xf32> to vector<32x256xf32>
    %109 = vector.extract_strided_slice %107 {offsets = [0, 256], sizes = [32, 256], strides = [1, 1]} : vector<32x512xf32> to vector<32x256xf32>
    %110 = arith.maximumf %108, %109 : vector<32x256xf32>
    %111 = vector.extract_strided_slice %110 {offsets = [0, 0], sizes = [32, 128], strides = [1, 1]} : vector<32x256xf32> to vector<32x128xf32>
    %112 = vector.extract_strided_slice %110 {offsets = [0, 128], sizes = [32, 128], strides = [1, 1]} : vector<32x256xf32> to vector<32x128xf32>
    %113 = arith.maximumf %111, %112 : vector<32x128xf32>
    %114 = arith.maximumf %100, %113 : vector<32x128xf32>
    %c0_68 = arith.constant 0 : index
    %c512_69 = arith.constant 512 : index
    %115 = vector.load %arg5[%c0_68, %c512_69] : memref<32x1024xf32, #tpu.memory_space<vmem>>, vector<32x512xf32>
    %c0_70 = arith.constant 0 : index
    %c512_71 = arith.constant 512 : index
    %116 = vector.load %arg4[%c0_70, %c512_71] : memref<32x1024xf32, #tpu.memory_space<vmem>>, vector<32x512xf32>
    %cst_72 = arith.constant dense<0.000000e+00> : vector<32x512xf32>
    %117 = tpu.matmul %97, %116, %cst_72 {dimension_numbers = #tpu.dot_dimension_numbers<[1], [0], [0], [1], [0, 0, 1, 1], [], []>} : vector<32x32xf32>, vector<32x512xf32>, vector<32x512xf32> -> vector<32x512xf32>
    %118 = arith.mulf %117, %115 : vector<32x512xf32>
    %cst_73 = arith.constant dense<0.000000e+00> : vector<32x512xf32>
    %119 = tpu.matmul %98, %118, %cst_73 {dimension_numbers = #tpu.dot_dimension_numbers<[1], [0], [0], [1], [0, 0, 1, 1], [], []>} : vector<32x32xf32>, vector<32x512xf32>, vector<32x512xf32> -> vector<32x512xf32>
    %cst_74 = arith.constant dense<0.000000e+00> : vector<32x512xf32>
    %120 = tpu.matmul %99, %115, %cst_74 {dimension_numbers = #tpu.dot_dimension_numbers<[1], [0], [0], [1], [0, 0, 1, 1], [], []>} : vector<32x32xf32>, vector<32x512xf32>, vector<32x512xf32> -> vector<32x512xf32>
    %121 = arith.addf %119, %120 : vector<32x512xf32>
    %122 = vector.extract_strided_slice %121 {offsets = [0, 0], sizes = [32, 256], strides = [1, 1]} : vector<32x512xf32> to vector<32x256xf32>
    %123 = vector.extract_strided_slice %121 {offsets = [0, 256], sizes = [32, 256], strides = [1, 1]} : vector<32x512xf32> to vector<32x256xf32>
    %124 = arith.maximumf %122, %123 : vector<32x256xf32>
    %125 = vector.extract_strided_slice %124 {offsets = [0, 0], sizes = [32, 128], strides = [1, 1]} : vector<32x256xf32> to vector<32x128xf32>
    %126 = vector.extract_strided_slice %124 {offsets = [0, 128], sizes = [32, 128], strides = [1, 1]} : vector<32x256xf32> to vector<32x128xf32>
    %127 = arith.maximumf %125, %126 : vector<32x128xf32>
    %128 = arith.maximumf %114, %127 : vector<32x128xf32>
    %129 = vector.extract_strided_slice %128 {offsets = [0, 0], sizes = [32, 64], strides = [1, 1]} : vector<32x128xf32> to vector<32x64xf32>
    %130 = vector.extract_strided_slice %128 {offsets = [0, 64], sizes = [32, 64], strides = [1, 1]} : vector<32x128xf32> to vector<32x64xf32>
    %131 = arith.maximumf %129, %130 : vector<32x64xf32>
    %132 = vector.extract_strided_slice %131 {offsets = [0, 0], sizes = [32, 32], strides = [1, 1]} : vector<32x64xf32> to vector<32x32xf32>
    %133 = vector.extract_strided_slice %131 {offsets = [0, 32], sizes = [32, 32], strides = [1, 1]} : vector<32x64xf32> to vector<32x32xf32>
    %134 = arith.maximumf %132, %133 : vector<32x32xf32>
    %c0_75 = arith.constant 0 : index
    %c0_76 = arith.constant 0 : index
    %135 = vector.load %arg10[%c0_75, %c0_76] : memref<32x1xf32, #tpu.memory_space<vmem>>, vector<32x1xf32>
    %136 = vector.broadcast %135 : vector<32x1xf32> to vector<32x32xf32>
    %137 = arith.mulf %134, %136 : vector<32x32xf32>
    %c0_77 = arith.constant 0 : index
    %c0_78 = arith.constant 0 : index
    %138 = vector.load %arg17[%c0_77, %c0_78] : memref<32x32xf32, #tpu.memory_space<vmem>>, vector<32x32xf32>
    %cst_79 = arith.constant dense<0.000000e+00> : vector<32x32xf32>
    %139 = tpu.matmul %137, %138, %cst_79 {dimension_numbers = #tpu.dot_dimension_numbers<[1], [0], [0], [1], [0, 0, 1, 1], [], []>} : vector<32x32xf32>, vector<32x32xf32>, vector<32x32xf32> -> vector<32x32xf32>
    %c0_80 = arith.constant 0 : index
    %c0_81 = arith.constant 0 : index
    %140 = vector.load %arg18[%c0_80, %c0_81] : memref<32x32xf32, #tpu.memory_space<vmem>>, vector<32x32xf32>
    %cst_82 = arith.constant dense<0.000000e+00> : vector<32x32xf32>
    %141 = tpu.matmul %97, %140, %cst_82 {dimension_numbers = #tpu.dot_dimension_numbers<[1], [0], [0], [1], [0, 0, 1, 1], [], []>} : vector<32x32xf32>, vector<32x32xf32>, vector<32x32xf32> -> vector<32x32xf32>
    %142 = arith.addf %139, %141 : vector<32x32xf32>
    %c0_83 = arith.constant 0 : index
    %c0_84 = arith.constant 0 : index
    %143 = vector.load %arg19[%c0_83, %c0_84] : memref<1x32xf32, #tpu.memory_space<vmem>>, vector<1x32xf32>
    %144 = vector.broadcast %143 : vector<1x32xf32> to vector<32x32xf32>
    %145 = arith.addf %142, %144 : vector<32x32xf32>
    %c0_85 = arith.constant 0 : index
    %c0_86 = arith.constant 0 : index
    %146 = vector.load %arg20[%c0_85, %c0_86] : memref<1x32xf32, #tpu.memory_space<vmem>>, vector<1x32xf32>
    %c0_87 = arith.constant 0 : index
    %c0_88 = arith.constant 0 : index
    %147 = vector.load %arg21[%c0_87, %c0_88] : memref<1x32xf32, #tpu.memory_space<vmem>>, vector<1x32xf32>
    %c0_89 = arith.constant 0 : index
    %c0_90 = arith.constant 0 : index
    %148 = vector.load %arg11[%c0_89, %c0_90] : memref<2x32xf32, #tpu.memory_space<vmem>>, vector<2x32xf32>
    %cst_91 = arith.constant dense<0.000000e+00> : vector<2x32xf32>
    %149 = tpu.matmul %148, %145, %cst_91 {dimension_numbers = #tpu.dot_dimension_numbers<[1], [0], [0], [1], [0, 0, 1, 1], [], []>} : vector<2x32xf32>, vector<32x32xf32>, vector<2x32xf32> -> vector<2x32xf32>
    %c0_92 = arith.constant 0 : index
    %c0_93 = arith.constant 0 : index
    %150 = vector.load %arg13[%c0_92, %c0_93] : memref<2x1xf32, #tpu.memory_space<vmem>>, vector<2x1xf32>
    %151 = vector.broadcast %150 : vector<2x1xf32> to vector<2x32xf32>
    %152 = arith.mulf %149, %151 : vector<2x32xf32>
    %c0_94 = arith.constant 0 : index
    %c0_95 = arith.constant 0 : index
    %153 = vector.load %arg12[%c0_94, %c0_95] : memref<32x2xf32, #tpu.memory_space<vmem>>, vector<32x2xf32>
    %cst_96 = arith.constant dense<0.000000e+00> : vector<32x32xf32>
    %154 = tpu.matmul %153, %152, %cst_96 {dimension_numbers = #tpu.dot_dimension_numbers<[1], [0], [0], [1], [0, 0, 1, 1], [], []>} : vector<32x2xf32>, vector<2x32xf32>, vector<32x32xf32> -> vector<32x32xf32>
    %155 = arith.subf %145, %154 : vector<32x32xf32>
    %c0_97 = arith.constant 0 : index
    %c0_98 = arith.constant 0 : index
    %156 = vector.load %arg11[%c0_97, %c0_98] : memref<2x32xf32, #tpu.memory_space<vmem>>, vector<2x32xf32>
    %157 = arith.mulf %155, %155 : vector<32x32xf32>
    %cst_99 = arith.constant dense<0.000000e+00> : vector<2x32xf32>
    %158 = tpu.matmul %156, %157, %cst_99 {dimension_numbers = #tpu.dot_dimension_numbers<[1], [0], [0], [1], [0, 0, 1, 1], [], []>} : vector<2x32xf32>, vector<32x32xf32>, vector<2x32xf32> -> vector<2x32xf32>
    %c0_100 = arith.constant 0 : index
    %c0_101 = arith.constant 0 : index
    %159 = vector.load %arg13[%c0_100, %c0_101] : memref<2x1xf32, #tpu.memory_space<vmem>>, vector<2x1xf32>
    %160 = vector.broadcast %159 : vector<2x1xf32> to vector<2x32xf32>
    %161 = arith.mulf %158, %160 : vector<2x32xf32>
    %c0_102 = arith.constant 0 : index
    %c0_103 = arith.constant 0 : index
    %162 = vector.load %arg12[%c0_102, %c0_103] : memref<32x2xf32, #tpu.memory_space<vmem>>, vector<32x2xf32>
    %cst_104 = arith.constant dense<0.000000e+00> : vector<32x32xf32>
    %163 = tpu.matmul %162, %161, %cst_104 {dimension_numbers = #tpu.dot_dimension_numbers<[1], [0], [0], [1], [0, 0, 1, 1], [], []>} : vector<32x2xf32>, vector<2x32xf32>, vector<32x32xf32> -> vector<32x32xf32>
    %cst_105 = arith.constant 9.99999974E-6 : f32
    %164 = vector.broadcast %cst_105 : f32 to vector<32x32xf32>
    %165 = arith.addf %163, %164 : vector<32x32xf32>
    %166 = math.rsqrt %165 : vector<32x32xf32>
    %167 = arith.mulf %155, %166 : vector<32x32xf32>
    %168 = vector.broadcast %146 : vector<1x32xf32> to vector<32x32xf32>
    %169 = arith.mulf %167, %168 : vector<32x32xf32>
    %170 = vector.broadcast %147 : vector<1x32xf32> to vector<32x32xf32>
    %171 = arith.addf %169, %170 : vector<32x32xf32>
    %c0_106 = arith.constant 0 : index
    %c0_107 = arith.constant 0 : index
    %172 = vector.load %arg22[%c0_106, %c0_107] : memref<1x1xf32, #tpu.memory_space<vmem>>, vector<1x1xf32>
    %cst_108 = arith.constant 0.000000e+00 : f32
    %173 = vector.broadcast %cst_108 : f32 to vector<32x32xf32>
    %174 = arith.cmpf ogt, %171, %173 : vector<32x32xf32>
    %175 = vector.broadcast %172 : vector<1x1xf32> to vector<32x32xf32>
    %176 = arith.mulf %175, %171 : vector<32x32xf32>
    %177 = arith.select %174, %171, %176 : vector<32x32xi1>, vector<32x32xf32>
    %c0_109 = arith.constant 0 : index
    %c0_110 = arith.constant 0 : index
    %178 = vector.load %arg9[%c0_109, %c0_110] : memref<32x32xf32, #tpu.memory_space<vmem>>, vector<32x32xf32>
    %cst_111 = arith.constant dense<0.000000e+00> : vector<32x32xf32>
    %179 = tpu.matmul %178, %177, %cst_111 {dimension_numbers = #tpu.dot_dimension_numbers<[1], [0], [0], [1], [0, 0, 1, 1], [], []>} : vector<32x32xf32>, vector<32x32xf32>, vector<32x32xf32> -> vector<32x32xf32>
    %c0_112 = arith.constant 0 : index
    %c0_113 = arith.constant 0 : index
    %180 = vector.load %arg23[%c0_112, %c0_113] : memref<1x32xf32, #tpu.memory_space<vmem>>, vector<1x32xf32>
    %cst_114 = arith.constant dense<0.000000e+00> : vector<1x32xf32>
    %181 = tpu.matmul %180, %179, %cst_114 {dimension_numbers = #tpu.dot_dimension_numbers<[1], [1], [0], [0], [0, 0, 1, 0], [], []>} : vector<1x32xf32>, vector<32x32xf32>, vector<1x32xf32> -> vector<1x32xf32>
    %c0_115 = arith.constant 0 : index
    %c0_116 = arith.constant 0 : index
    %182 = vector.load %arg24[%c0_115, %c0_116] : memref<1x32xf32, #tpu.memory_space<vmem>>, vector<1x32xf32>
    %cst_117 = arith.constant dense<0.000000e+00> : vector<1x32xf32>
    %183 = tpu.matmul %182, %177, %cst_117 {dimension_numbers = #tpu.dot_dimension_numbers<[1], [1], [0], [0], [0, 0, 1, 0], [], []>} : vector<1x32xf32>, vector<32x32xf32>, vector<1x32xf32> -> vector<1x32xf32>
    %184 = arith.addf %181, %183 : vector<1x32xf32>
    %c0_118 = arith.constant 0 : index
    %c0_119 = arith.constant 0 : index
    %185 = vector.load %arg25[%c0_118, %c0_119] : memref<1x1xf32, #tpu.memory_space<vmem>>, vector<1x1xf32>
    %186 = vector.broadcast %185 : vector<1x1xf32> to vector<1x32xf32>
    %187 = arith.addf %184, %186 : vector<1x32xf32>
    %188 = math.tanh %187 : vector<1x32xf32>
    %c0_120 = arith.constant 0 : index
    %c0_121 = arith.constant 0 : index
    %189 = vector.load %arg26[%c0_120, %c0_121] : memref<32x32xf32, #tpu.memory_space<vmem>>, vector<32x32xf32>
    %cst_122 = arith.constant dense<0.000000e+00> : vector<32x1xf32>
    %190 = tpu.matmul %189, %188, %cst_122 {dimension_numbers = #tpu.dot_dimension_numbers<[1], [1], [0], [0], [0, 0, 1, 0], [], []>} : vector<32x32xf32>, vector<1x32xf32>, vector<32x1xf32> -> vector<32x1xf32>
    %191 = vector.broadcast %188 : vector<1x32xf32> to vector<32x32xf32>
    %192 = vector.broadcast %190 : vector<32x1xf32> to vector<32x32xf32>
    %193 = arith.cmpf ogt, %191, %192 : vector<32x32xf32>
    %194 = arith.extui %193 : vector<32x32xi1> to vector<32x32xi32>
    %195 = arith.sitofp %194 : vector<32x32xi32> to vector<32x32xf32>
    %196 = vector.broadcast %188 : vector<1x32xf32> to vector<32x32xf32>
    %197 = vector.broadcast %190 : vector<32x1xf32> to vector<32x32xf32>
    %198 = arith.cmpf oeq, %196, %197 : vector<32x32xf32>
    %199 = arith.extui %198 : vector<32x32xi1> to vector<32x32xi32>
    %200 = arith.sitofp %199 : vector<32x32xi32> to vector<32x32xf32>
    %c0_123 = arith.constant 0 : index
    %c0_124 = arith.constant 0 : index
    %201 = vector.load %arg27[%c0_123, %c0_124] : memref<32x32xf32, #tpu.memory_space<vmem>>, vector<32x32xf32>
    %202 = arith.mulf %200, %201 : vector<32x32xf32>
    %203 = arith.addf %195, %202 : vector<32x32xf32>
    %c0_125 = arith.constant 0 : index
    %c0_126 = arith.constant 0 : index
    %204 = vector.load %arg28[%c0_125, %c0_126] : memref<32x32xf32, #tpu.memory_space<vmem>>, vector<32x32xf32>
    %205 = arith.mulf %203, %204 : vector<32x32xf32>
    %cst_127 = arith.constant dense<0.000000e+00> : vector<32x1xf32>
    %206 = tpu.matmul %205, %0, %cst_127 {dimension_numbers = #tpu.dot_dimension_numbers<[1], [0], [0], [1], [0, 0, 1, 1], [], []>} : vector<32x32xf32>, vector<32x1xf32>, vector<32x1xf32> -> vector<32x1xf32>
    %c0_128 = arith.constant 0 : index
    %c0_129 = arith.constant 0 : index
    %207 = vector.load %arg29[%c0_128, %c0_129] : memref<32x1xf32, #tpu.memory_space<vmem>>, vector<32x1xf32>
    %cst_130 = arith.constant 0.000000e+00 : f32
    %208 = vector.broadcast %cst_130 : f32 to vector<32x1xf32>
    %209 = arith.cmpf ogt, %207, %208 : vector<32x1xf32>
    %c0_131 = arith.constant 0 : index
    %c0_132 = arith.constant 0 : index
    %210 = vector.load %arg30[%c0_131, %c0_132] : memref<32x1xf32, #tpu.memory_space<vmem>>, vector<32x1xf32>
    %211 = arith.cmpf olt, %206, %210 : vector<32x1xf32>
    %212 = arith.andi %209, %211 : vector<32x1xi1>
    %213 = vector.broadcast %190 : vector<32x1xf32> to vector<32x32xf32>
    %214 = arith.mulf %177, %213 : vector<32x32xf32>
    %cst_133 = arith.constant -1.000000e+30 : f32
    %215 = vector.shape_cast %212 : vector<32x1xi1> to vector<32x1xi1>
    %216 = vector.broadcast %215 : vector<32x1xi1> to vector<32x32xi1>
    %217 = vector.broadcast %cst_133 : f32 to vector<32x32xf32>
    %218 = arith.select %216, %214, %217 : vector<32x32xi1>, vector<32x32xf32>
    %219 = vector.extract_strided_slice %218 {offsets = [0, 0], sizes = [16, 32], strides = [1, 1]} : vector<32x32xf32> to vector<16x32xf32>
    %cst_134 = arith.constant dense<0xFF800000> : vector<32xf32>
    %220 = vector.multi_reduction <maximumf>, %219, %cst_134 [0] : vector<16x32xf32> to vector<32xf32>
    %221 = vector.shape_cast %220 : vector<32xf32> to vector<1x32xf32>
    %222 = vector.extract_strided_slice %218 {offsets = [16, 0], sizes = [16, 32], strides = [1, 1]} : vector<32x32xf32> to vector<16x32xf32>
    %cst_135 = arith.constant dense<0xFF800000> : vector<32xf32>
    %223 = vector.multi_reduction <maximumf>, %222, %cst_135 [0] : vector<16x32xf32> to vector<32xf32>
    %224 = vector.shape_cast %223 : vector<32xf32> to vector<1x32xf32>
    %c0_136 = arith.constant 0 : index
    %c0_137 = arith.constant 0 : index
    %225 = vector.load %arg31[%c0_136, %c0_137] : memref<32x32xf32, #tpu.memory_space<vmem>>, vector<32x32xf32>
    %cst_138 = arith.constant dense<0.000000e+00> : vector<1x32xf32>
    %226 = tpu.matmul %221, %225, %cst_138 {dimension_numbers = #tpu.dot_dimension_numbers<[1], [0], [0], [1], [0, 0, 1, 1], [], []>} : vector<1x32xf32>, vector<32x32xf32>, vector<1x32xf32> -> vector<1x32xf32>
    %c0_139 = arith.constant 0 : index
    %c0_140 = arith.constant 0 : index
    %227 = vector.load %arg32[%c0_139, %c0_140] : memref<32x32xf32, #tpu.memory_space<vmem>>, vector<32x32xf32>
    %cst_141 = arith.constant dense<0.000000e+00> : vector<1x32xf32>
    %228 = tpu.matmul %224, %227, %cst_141 {dimension_numbers = #tpu.dot_dimension_numbers<[1], [0], [0], [1], [0, 0, 1, 1], [], []>} : vector<1x32xf32>, vector<32x32xf32>, vector<1x32xf32> -> vector<1x32xf32>
    %229 = arith.addf %226, %228 : vector<1x32xf32>
    %c0_142 = arith.constant 0 : index
    %c0_143 = arith.constant 0 : index
    %230 = vector.load %arg36[%c0_142, %c0_143] : memref<1x8xf32, #tpu.memory_space<vmem>>, vector<1x8xf32>
    %c0_144 = arith.constant 0 : index
    %c0_145 = arith.constant 0 : index
    %231 = vector.load %arg33[%c0_144, %c0_145] : memref<8x32xf32, #tpu.memory_space<vmem>>, vector<8x32xf32>
    %cst_146 = arith.constant dense<0.000000e+00> : vector<1x32xf32>
    %232 = tpu.matmul %230, %231, %cst_146 {dimension_numbers = #tpu.dot_dimension_numbers<[1], [0], [0], [1], [0, 0, 1, 1], [], []>} : vector<1x8xf32>, vector<8x32xf32>, vector<1x32xf32> -> vector<1x32xf32>
    %233 = arith.addf %229, %232 : vector<1x32xf32>
    %c0_147 = arith.constant 0 : index
    %c0_148 = arith.constant 0 : index
    %234 = vector.load %arg34[%c0_147, %c0_148] : memref<1x32xf32, #tpu.memory_space<vmem>>, vector<1x32xf32>
    %235 = arith.addf %233, %234 : vector<1x32xf32>
    %c0_149 = arith.constant 0 : index
    %c0_150 = arith.constant 0 : index
    %236 = vector.load %arg35[%c0_149, %c0_150] : memref<1x1xf32, #tpu.memory_space<vmem>>, vector<1x1xf32>
    %cst_151 = arith.constant 0.000000e+00 : f32
    %237 = vector.broadcast %cst_151 : f32 to vector<1x32xf32>
    %238 = arith.cmpf ogt, %235, %237 : vector<1x32xf32>
    %239 = vector.broadcast %236 : vector<1x1xf32> to vector<1x32xf32>
    %240 = arith.mulf %239, %235 : vector<1x32xf32>
    %241 = arith.select %238, %235, %240 : vector<1x32xi1>, vector<1x32xf32>
    %c0_152 = arith.constant 0 : index
    %c0_153 = arith.constant 0 : index
    %242 = vector.load %arg37[%c0_152, %c0_153] : memref<32x4xf32, #tpu.memory_space<vmem>>, vector<32x4xf32>
    %cst_154 = arith.constant dense<0.000000e+00> : vector<1x4xf32>
    %243 = tpu.matmul %241, %242, %cst_154 {dimension_numbers = #tpu.dot_dimension_numbers<[1], [0], [0], [1], [0, 0, 1, 1], [], []>} : vector<1x32xf32>, vector<32x4xf32>, vector<1x4xf32> -> vector<1x4xf32>
    %c0_155 = arith.constant 0 : index
    %c0_156 = arith.constant 0 : index
    %244 = vector.load %arg38[%c0_155, %c0_156] : memref<1x4xf32, #tpu.memory_space<vmem>>, vector<1x4xf32>
    %245 = arith.addf %243, %244 : vector<1x4xf32>
    %cst_157 = arith.constant 0.000000e+00 : f32
    %246 = vector.broadcast %cst_157 : f32 to vector<1x4xf32>
    %247 = arith.maximumf %245, %246 : vector<1x4xf32>
    %248 = math.absf %245 : vector<1x4xf32>
    %cst_158 = arith.constant 0.000000e+00 : f32
    %249 = vector.broadcast %cst_158 : f32 to vector<1x4xf32>
    %250 = arith.subf %249, %248 : vector<1x4xf32>
    %251 = math.exp %250 : vector<1x4xf32>
    %cst_159 = arith.constant 1.000000e+00 : f32
    %252 = vector.broadcast %cst_159 : f32 to vector<1x4xf32>
    %253 = arith.addf %252, %251 : vector<1x4xf32>
    %254 = math.log %253 : vector<1x4xf32>
    %255 = arith.addf %247, %254 : vector<1x4xf32>
    %256 = tpu.iota {dimensions = array<i32: 1>} : vector<1x4xi32>
    %c0_i32 = arith.constant 0 : i32
    %257 = vector.broadcast %c0_i32 : i32 to vector<1x4xi32>
    %258 = arith.cmpi eq, %256, %257 : vector<1x4xi32>
    %c2_i32 = arith.constant 2 : i32
    %259 = vector.broadcast %c2_i32 : i32 to vector<1x4xi32>
    %260 = arith.cmpi eq, %256, %259 : vector<1x4xi32>
    %cst_160 = arith.constant 1.000000e+00 : f32
    %cst_161 = arith.constant 0.000000e+00 : f32
    %261 = vector.broadcast %cst_160 : f32 to vector<1x4xf32>
    %262 = vector.broadcast %cst_161 : f32 to vector<1x4xf32>
    %263 = arith.select %260, %261, %262 : vector<1x4xi1>, vector<1x4xf32>
    %264 = arith.addf %255, %263 : vector<1x4xf32>
    %265 = arith.select %258, %245, %264 : vector<1x4xi1>, vector<1x4xf32>
    %c0_162 = arith.constant 0 : index
    %c0_163 = arith.constant 0 : index
    %266 = vector.load %arg39[%c0_162, %c0_163] : memref<1x4xf32, #tpu.memory_space<vmem>>, vector<1x4xf32>
    tpu.vector_store %arg39[%c0_162, %c0_163], %265 {strides = array<i32>} : memref<1x4xf32, #tpu.memory_space<vmem>>, vector<1x4xf32>,
    return
  }
}

</mosaic_0001>

<bundles_post_ra>
// kernel: polymer_gnn_iv_evidential.1
= control target key start
LH: loop header
LB: loop body
LE: loop exit
PB: predicated region body
PF: predicated region fallthrough
CT: control target
= control target key end

     0   :  { %s3612_s3 = smov 1   ;;  %v3613_v0 = vmov 32   ;;  %s3614_s10 = smov 4   ;;  %vm192_vm0 = vcmask 1045504   ;;  %vm179_vm1 = vcmask 48128   ;;  %vm226_vm2 = vcmask 261120   ;;  %s5073_s0 = inlined_call_operand.smem [shape: u32[40], index: -1, kind: input, shape index: {}] }
   0x1   :  { %s3141_s6 = sld [smem:[%s5073_s0 + %s3612_s3]]   ;;  %3496 = vset.pattern.permute.xlu0 %v3613_v0  ;;  %3497 = vset.pattern.permute.xlu1 %v3613_v0  ;;  %s3615_s14 = smov 2  }
   0x2   :  { %s1_s9 = sld [smem:[%s5073_s0]]   ;;  %s3616_s18 = smov 5  }
   0x3   :  { %s3670_s13 = sld [smem:[%s5073_s0 + %s3614_s10]]   ;;  %s3617_s22 = smov 7  }
   0x4   :  { %s3142_s17 = sld [smem:[%s5073_s0 + %s3615_s14]]   ;;  %s3618_s26 = smov 6  }
   0x5   :  { %s3767_s21 = sld [smem:[%s5073_s0 + %s3616_s18]]   ;;  %s3620_s30 = smov 64  }
   0x6   :  { %s3792_s25 = sld [smem:[%s5073_s0 + %s3617_s22]]   ;;  %s3621_s1 = smov 16  }
   0x7   :  { %v178_v1 = vld [vmem:[%s3141_s6] sm:$0x3f]  ;;  %s3871_s29 = sld [smem:[%s5073_s0 + %s3618_s26]]   ;;  %s3622_s5 = smov 3  }
   0x8   :  { %3180 = vmatpush.msk.msra.mxu0 %vm192_vm0, %v178_v1  ;;  %v174_v2 = vld [vmem:[%s1_s9] sm:$0xff]  ;;  %v175_v6 = vld [vmem:[%s1_s9 + $0x8] sm:$0xff]  ;;  %v176_v7 = vld [vmem:[%s1_s9 + $0x10] sm:$0xff]  ;;  %s3156_s4 = sld [smem:[%s5073_s0 + %s3621_s1]]   ;;  %s3624_s10 = smov 13  }
   0x9   :  { %3181 = vmatmul.msk.f32.vlgmr.msra.gmra.mxu0 %vm179_vm1, %v174_v2  ;;  %v3674_v3 = vld [vmem:[%s3670_s13 + $0xc0] sm:$0xff]  ;;  %v177_v8 = vld [vmem:[%s1_s9 + $0x18] sm:$0xff]  ;;  %v454_v10 = vld [vmem:[%s3670_s13 + $0xd0] sm:$0xff]  ;;  %s4325_s8 = sld [smem:[%s5073_s0 + %s3622_s5]]   ;;  %s3623_s9 = smov 96  }
   0xa   :  { %v3677_v4 = vld [vmem:[%s3670_s13 + $0x80] sm:$0xff]  ;;  %468 = vmatpush.msrb.mxu0 %v3674_v3  ;;  %3448 = vmatpush.msra.mxu3 %v3674_v3  ;;  %v450_v11 = vld [vmem:[%s3670_s13 + $0x90] sm:$0xff]  ;;  %v3738_v18 = vld [vmem:[%s3670_s13 + $0xc8] sm:$0xff]  ;;  %s3153_s14 = sld [smem:[%s5073_s0 + %s3624_s10]]   ;;  %s3625_s15 = smov 11  }
   0xb   :  { %v3682_v5 = vld [vmem:[%s3670_s13 + $0x40] sm:$0xff]  ;;  %v446_v12 = vld [vmem:[%s3670_s13 + $0x50] sm:$0xff]  ;;  %v3744_v20 = vld [vmem:[%s3670_s13 + $0x88] sm:$0xff]  ;;  %s4363_s18 = sld [smem:[%s5073_s0 + %s3625_s15]]   ;;  %s3626_s19 = smov 12  }
   0xc   :  { %469 = vmatpush.msrb.mxu0 %v3677_v4  ;;  %3449 = vmatpush.msra.mxu3 %v3677_v4  ;;  %v3692_v9 = vld [vmem:[%s3670_s13] sm:$0xff]  ;;  %v442_v13 = vld [vmem:[%s3670_s13 + $0x10] sm:$0xff]  ;;  %v3748_v21 = vld [vmem:[%s3670_s13 + $0x48] sm:$0xff]  ;;  %s4370_s23 = sld [smem:[%s5073_s0 + %s3626_s19]]   ;;  %s3627_s24 = smov 14  }
   0xd   :  { %v225_v19 = vld [vmem:[%s3142_s17] sm:$0x1]  ;;  %v3752_v22 = vld [vmem:[%s3670_s13 + $0x8] sm:$0xff]  ;;  %v438_v24 = vld [vmem:[%s3767_s21 + $0xd0] sm:$0xff]  ;;  %s4420_s27 = sld [smem:[%s5073_s0 + %s3627_s24]]   ;;  %s3628_s28 = smov 15  }
   0xe   :  { %470 = vmatpush.msrb.mxu0 %v3682_v5  ;;  %3450 = vmatpush.msra.mxu3 %v3682_v5  ;;  %v3770_v23 = vld [vmem:[%s3767_s21 + $0xc0] sm:$0xff]  ;;  %v434_v26 = vld [vmem:[%s3767_s21 + $0x90] sm:$0xff]  ;;  %v3802_v38 = vld [vmem:[%s3792_s25 + $0x8] sm:$0xff]  ;;  %s4425_s3 = sld [smem:[%s5073_s0 + %s3628_s28]]   ;;  %s3632_s15 = smov 25  }
   0xf   :  { %v3775_v25 = vld [vmem:[%s3767_s21 + $0x80] sm:$0xff]  ;;  %v430_v28 = vld [vmem:[%s3767_s21 + $0x50] sm:$0xff]  ;;  %v3813_v46 = vld [vmem:[%s3767_s21 + $0xc8] sm:$0xff]  ;;  %s3165_s19 = sld [smem:[%s5073_s0 + %s3632_s15]]   ;;  %s3633_s20 = smov 22  }
  0x10   :  { %471 = vmatpush.msrb.mxu0 %v3692_v9  ;;  %3451 = vmatpush.msra.mxu3 %v3692_v9  ;;  %v3780_v27 = vld [vmem:[%s3767_s21 + $0x40] sm:$0xff]  ;;  %v426_v30 = vld [vmem:[%s3767_s21 + $0x10] sm:$0xff]  ;;  %v3822_v49 = vld [vmem:[%s3767_s21 + $0x88] sm:$0xff]  ;;  %s3635_s1 = smov 19   ;;  %s3637_s6 = smov 21  }
  0x11   :  { %3182 = vmatmul.msk.f32.gmra.mxu0 %vm179_vm1, %v175_v6  ;;  %v3785_v29 = vld [vmem:[%s3767_s21] sm:$0xff]  ;;  %v3810_v43 = vld [vmem:[%s3792_s25 + $0x10] sm:$0xff]  ;;  %5086 = vst [vmem:[#allocation6_spill] sm:$0xff] %v3822_v49  ;;  %v3827_v52 = vld [vmem:[%s3767_s21 + $0x48] sm:$0xff]  ;;  %s3639_s12 = smov 24   ;;  %s3640_s17 = smov 23  }
  0x12   :  { %526 = vmatpush.msra.mxu0 %v454_v10  ;;  %612 = vmatpush.msrb.mxu3 %v3770_v23  ;;  %v3795_v35 = vld [vmem:[%s3792_s25] sm:$0xff]  ;;  %5087 = vst [vmem:[#allocation7_spill] sm:$0xff] %v3827_v52  ;;  %v3832_v55 = vld [vmem:[%s3767_s21 + $0x8] sm:$0xff]  ;;  %v3836_v58 = vld [vmem:[%s3792_s25 + $0x18] sm:$0xff]  ;;  %s3162_s25 = sld [smem:[%s5073_s0 + %s3633_s20]]   ;;  %s3641_s24 = smov 26  }
  0x13   :  { %5088 = vst [vmem:[#allocation8_spill] sm:$0xff] %v3832_v55  ;;  %s3164_s16 = sld [smem:[%s5073_s0 + %s3639_s12]]   ;;  %s3648_s15 = smov 31  }
  0x14   :  { %527 = vmatpush.msra.mxu0 %v450_v11  ;;  %613 = vmatpush.msrb.mxu3 %v3775_v25  ;;  %s3163_s22 = sld [smem:[%s5073_s0 + %s3640_s17]]   ;;  %s3649_s20 = smov 32  }
  0x15   :  { %s3166_s26 = sld [smem:[%s5073_s0 + %s3641_s24]]   ;;  %s3655_s12 = smov 39  }
  0x16   :  { %528 = vmatpush.msra.mxu0 %v446_v12  ;;  %614 = vmatpush.msrb.mxu3 %v3780_v27 }
  0x18   :  { %529 = vmatpush.msra.mxu0 %v442_v13  ;;  %615 = vmatpush.msrb.mxu3 %v3785_v29 }
  0x19   :  { %3183 = vmatmul.msk.f32.gmra.mxu0 %vm179_vm1, %v176_v7 }
  0x21   :  { %3184 = vmatmul.msk.f32.gmra.mxu0 %vm179_vm1, %v177_v8 }
  0x86   :  { %v3700_v14 = vpop.f32.mrf.mxu0 }
  0x87   :  { %263 = vperm.xlu0 %3496, %v3700_v14   ;;  %3194 = vmatmul.msk.f32.vlgmr.msrb.gmra.mxu0 %vm226_vm2, %v3700_v14 }
  0x88   :  { %670 = vmatpush.msrb.mxu0 %v438_v24 }
  0x8a   :  { %671 = vmatpush.msrb.mxu0 %v434_v26 }
  0x8c   :  { %672 = vmatpush.msrb.mxu0 %v430_v28 }
  0x8e   :  { %v3705_v15 = vpop.f32.mrf.mxu0  ;;  %673 = vmatpush.msrb.mxu0 %v426_v30 }
  0x8f   :  { %3202 = vmatmul.msk.f32.vlgmr.msra.gmra.mxu0 %vm226_vm2, %v3700_v14  ;;  %267 = vperm.xlu0 %3496, %v3705_v15  }
  0x90   :  { %3195 = vmatmul.msk.f32.vlgmr.msra.gmra.mxu3 %vm226_vm2, %v3705_v15 }
  0x96   :  { %v3712_v16 = vpop.f32.mrf.mxu0 }
  0x97   :  { %3203 = vmatmul.msk.f32.gmra.mxu0 %vm226_vm2, %v3705_v15  ;;  %271 = vperm.xlu1 %3497, %v3712_v16  }
  0x98   :  { %3196 = vmatmul.msk.f32.gmra.mxu3 %vm226_vm2, %v3712_v16 }
  0x9e   :  { %v3719_v17 = vpop.f32.mrf.mxu0 }
  0x9f   :  { %3204 = vmatmul.msk.f32.gmra.mxu0 %vm226_vm2, %v3712_v16  ;;  %275 = vperm.xlu1 %3497, %v3719_v17  }
  0xa0   :  { %3185 = vmatpush.xpose.msk.msra.mxu1 %vm226_vm2, %v3719_v17  ;;  %3197 = vmatmul.msk.f32.gmra.mxu3 %vm226_vm2, %v3719_v17 }
  0xa4   :  { %3186 = vmatpush.xpose.msk.msra.mxu1 %vm226_vm2, %v3712_v16 }
  0xa7   :  { %3205 = vmatmul.msk.f32.gmra.mxu0 %vm226_vm2, %v3719_v17 }
  0xa8   :  { %3187 = vmatpush.xpose.msk.msra.mxu1 %vm226_vm2, %v3705_v15  ;;  %3210 = vmatmul.msk.f32.vlgmr.msrb.gmra.mxu3 %vm226_vm2, %v3795_v35 }
  0xac   :  { %3188 = vmatpush.xpose.msk.msra.mxu1 %vm226_vm2, %v3700_v14 }
  0xaf   :  { %3189 = vmatmul.msk.f32.vlgmr.msra.gmra.mxu1 %vm226_vm2, %v225_v19  ;;  %3218 = vmatmul.msk.f32.vlgmr.msrb.gmra.mxu0 %vm226_vm2, %v3795_v35 }
  0xb0   :  { %497 = vmatpush.msrb.mxu1 %v3738_v18  ;;  %3211 = vmatmul.msk.f32.gmra.mxu3 %vm226_vm2, %v3802_v38 }
  0xb2   :  { %498 = vmatpush.msrb.mxu1 %v3744_v20 }
  0xb4   :  { %499 = vmatpush.msrb.mxu1 %v3748_v21 }
  0xb6   :  { %500 = vmatpush.msrb.mxu1 %v3752_v22 }
  0xb7   :  { %3198 = vmatmul.msk.f32.vlgmr.msrb.gmra.mxu1 %vm226_vm2, %v3700_v14  ;;  %3219 = vmatmul.msk.f32.gmra.mxu0 %vm226_vm2, %v3802_v38 }
  0xb8   :  { %3212 = vmatmul.msk.f32.gmra.mxu3 %vm226_vm2, %v3810_v43  ;;  %641 = vmatpush.msra.mxu1 %v3813_v46 }
  0xba   :  { %642 = vmatpush.msra.mxu1 %v3822_v49 }
  0xbc   :  { %643 = vmatpush.msra.mxu1 %v3827_v52 }
  0xbe   :  { %644 = vmatpush.msra.mxu1 %v3832_v55 }
  0xbf   :  { %3199 = vmatmul.msk.f32.gmra.mxu1 %vm226_vm2, %v3705_v15  ;;  %3220 = vmatmul.msk.f32.gmra.mxu0 %vm226_vm2, %v3810_v43 }
  0xc0   :  { %3213 = vmatmul.msk.f32.gmra.mxu3 %vm226_vm2, %v3836_v58 }
  0xc7   :  { %3200 = vmatmul.msk.f32.gmra.mxu1 %vm226_vm2, %v3712_v16  ;;  %3221 = vmatmul.msk.f32.gmra.mxu0 %vm226_vm2, %v3836_v58 }
  0xcf   :  { %3201 = vmatmul.msk.f32.gmra.mxu1 %vm226_vm2, %v3719_v17 }
  0xd7   :  { %3214 = vmatmul.msk.f32.vlgmr.msra.gmra.mxu1 %vm226_vm2, %v3795_v35 }
  0xdf   :  { %3215 = vmatmul.msk.f32.gmra.mxu1 %vm226_vm2, %v3802_v38 }
  0xe7   :  { %3216 = vmatmul.msk.f32.gmra.mxu1 %vm226_vm2, %v3810_v43 }
  0xef   :  { %3217 = vmatmul.msk.f32.gmra.mxu1 %vm226_vm2, %v3836_v58 }
  0xf9   :  { %v264_v44 = vpop.permute.xlu0 %263 }
 0x101   :  { %v268_v60 = vpop.permute.xlu0 %267 }
 0x104   :  { %v473_v31 = vpop.f32.mrf.mxu0 }
 0x105   :  { %v572_v53 = vmul.f32 %v473_v31, %v3785_v29 }
 0x109   :  { %v272_v40 = vpop.permute.xlu1 %271 }
 0x10c   :  { %v531_v32 = vpop.f32.mrf.mxu0 }
 0x10d   :  { %v574_v54 = vmul.f32 %v531_v32, %v426_v30 }
 0x111   :  { %v276_v59 = vpop.permute.xlu1 %275 }
 0x113   :  { %v476_v33 = vpop.f32.mrf.mxu3 }
 0x114   :  { %v534_v34 = vpop.f32.mrf.mxu0  ;;  %v576_v50 = vmul.f32 %v476_v33, %v3780_v27 }
 0x115   :  { %v578_v51 = vmul.f32 %v534_v34, %v430_v28 }
 0x11b   :  { %v479_v36 = vpop.f32.mrf.mxu3 }
 0x11c   :  { %v537_v37 = vpop.f32.mrf.mxu0  ;;  %v580_v47 = vmul.f32 %v479_v36, %v3775_v25 }
 0x11d   :  { %v582_v48 = vmul.f32 %v537_v37, %v434_v26 }
 0x123   :  { %v482_v39 = vpop.f32.mrf.mxu3 }
 0x124   :  { %v584_v41 = vmul.f32 %v482_v39, %v3770_v23  ;;  %v540_v42 = vpop.f32.mrf.mxu0 }
 0x125   :  { %v586_v45 = vmul.f32 %v540_v42, %v438_v24 }
 0x126   :  { %728 = vmatpush.msra.mxu3 %v584_v41 }
 0x127   :  { %786 = vmatpush.msra.mxu0 %v586_v45  ;;  %v172_v45 = vld [vmem:[%s3871_s29 + $0x10] sm:$0xff] }
 0x128   :  { %729 = vmatpush.msra.mxu3 %v580_v47  ;;  %v171_v47 = vld [vmem:[%s3871_s29 + $0x8] sm:$0xff] }
 0x129   :  { %787 = vmatpush.msra.mxu0 %v582_v48  ;;  %v170_v48 = vld [vmem:[%s3871_s29] sm:$0xff] }
 0x12a   :  { %730 = vmatpush.msra.mxu3 %v576_v50 }
 0x12b   :  { %788 = vmatpush.msra.mxu0 %v578_v51 }
 0x12c   :  { %v259_v56 = vpop.f32.mrf.mxu1  ;;  %731 = vmatpush.msra.mxu3 %v572_v53 }
 0x12d   :  { %v278_v57 = vperm.slane %v259_v56, 0  ;;  %789 = vmatpush.msra.mxu0 %v574_v54  ;;  %v455_v54 = vld [vmem:[%s3670_s13 + $0xd8] sm:$0xff]  ;;  %v876_v56 = vld [vmem:[%s3670_s13 + $0xe0] sm:$0xff] }
 0x12e   :  { %892 = vmatpush.msrb.mxu3 %v876_v56  ;;  %v3993_v56 = vld [vmem:[%s3767_s21 + $0xf0] sm:$0xff] }
 0x12f   :  { %v282_v61 = vadd.f32 %v278_v57, %v276_v59  ;;  %v281_v62 = vadd.f32 %v278_v57, %v272_v40  ;;  %v279_v63 = vadd.f32 %v278_v57, %v264_v44  ;;  %v280_v0 = vadd.f32 %v278_v57, %v268_v60  ;;  %v173_v44 = vld [vmem:[%s3871_s29 + $0x18] sm:$0xff]  ;;  %v877_v57 = vld [vmem:[%s3670_s13 + $0xe8] sm:$0xff]  ;;  %v878_v59 = vld [vmem:[%s3670_s13 + $0xf0] sm:$0xff] }
 0x130   :  { %351 = vmatpush.msra.mxu2 %v173_v44  ;;  %v451_v60 = vld [vmem:[%s3670_s13 + $0x98] sm:$0xff]  ;;  %950 = vmatpush.msrb.mxu0 %v878_v59  ;;  %v4000_v59 = vld [vmem:[%s3767_s21 + $0xa8] sm:$0xff] }
 0x131   :  { %vm286_vm3 = vcmp.gt.f32.partialorder %v282_v61, 0.0  ;;  %v290_v1 = vmul.f32 0.2, %v282_v61  ;;  %vm285_vm4 = vcmp.gt.f32.partialorder %v281_v62, 0.0  ;;  %v289_v2 = vmul.f32 0.2, %v281_v62 }
 0x132   :  { %vm283_vm5 = vcmp.gt.f32.partialorder %v279_v63, 0.0  ;;  %v287_v6 = vmul.f32 0.2, %v279_v63  ;;  %v288_v19 = vmul.f32 0.2, %v280_v0  ;;  %vm284_vm6 = vcmp.gt.f32.partialorder %v280_v0, 0.0  ;;  %352 = vmatpush.msra.mxu2 %v172_v45 }
 0x133   :  { %v294_v7 = vsel %vm286_vm3, %v282_v61, %v290_v1  ;;  %v293_v8 = vsel %vm285_vm4, %v281_v62, %v289_v2  ;;  %v872_v61 = vld [vmem:[%s3670_s13 + $0xa0] sm:$0xff]  ;;  %v447_v1 = vld [vmem:[%s3670_s13 + $0x58] sm:$0xff] }
 0x134   :  { %v502_v10 = vpop.f32.mrf.mxu1  ;;  %v3845_v11 = vadd.f32 %v3836_v58, %v294_v7  ;;  %v3848_v12 = vadd.f32 %v3810_v43, %v293_v8  ;;  %v291_v13 = vsel %vm283_vm5, %v279_v63, %v287_v6  ;;  %v292_v31 = vsel %vm284_vm6, %v280_v0, %v288_v19  ;;  %353 = vmatpush.msra.mxu2 %v171_v47  ;;  %v873_v63 = vld [vmem:[%s3670_s13 + $0xa8] sm:$0xff]  ;;  %v874_v0 = vld [vmem:[%s3670_s13 + $0xb0] sm:$0xff]  ;;  %v868_v6 = vld [vmem:[%s3670_s13 + $0x60] sm:$0xff] }
 0x135   :  { %v299_v24 = vadd.f32 %v3795_v35, %v291_v13  ;;  %v300_v32 = vadd.f32 %v3802_v38, %v292_v31  ;;  %v573_v42 = vmul.f32 %v502_v10, %v3832_v55  ;;  %893 = vmatpush.msrb.mxu3 %v872_v61  ;;  %v869_v7 = vld [vmem:[%s3670_s13 + $0x68] sm:$0xff]  ;;  %v870_v8 = vld [vmem:[%s3670_s13 + $0x70] sm:$0xff]  ;;  %951 = vmatpush.msrb.mxu0 %v874_v0 }
 0x136   :  { %v312_v26 = vsel %vm226_vm2, %v3845_v11, -inf  ;;  %v309_v28 = vsel %vm226_vm2, %v3848_v12, -inf  ;;  %354 = vmatpush.msra.mxu2 %v170_v48  ;;  %v4008_v61 = vld [vmem:[%s3767_s21 + $0x68] sm:$0xff] }
 0x137   :  { %313 = vmax.xlane.f32.xlu1 %v312_v26  ;;  %310 = vmax.xlane.f32.xlu0 %v309_v28  ;;  %v303_v30 = vsel %vm226_vm2, %v299_v24, -inf  ;;  %v306_v34 = vsel %vm226_vm2, %v300_v32, -inf  ;;  %v864_v26 = vld [vmem:[%s3670_s13 + $0x20] sm:$0xff]  ;;  %v865_v28 = vld [vmem:[%s3670_s13 + $0x28] sm:$0xff] }
 0x138   :  { %304 = vmax.xlane.f32.xlu2 %v303_v30  ;;  %555 = vmatpush.msrb.mxu2 %v455_v54  ;;  %v866_v30 = vld [vmem:[%s3670_s13 + $0x30] sm:$0xff]  ;;  %v3990_v54 = vld [vmem:[%s3767_s21 + $0xe8] sm:$0xff] }
 0x139   :  { %894 = vmatpush.msrb.mxu3 %v868_v6  ;;  %952 = vmatpush.msrb.mxu0 %v870_v8  ;;  %v4026_v6 = vld [vmem:[%s3767_s21 + $0xd8] sm:$0xff] }
 0x13a   :  { %556 = vmatpush.msrb.mxu2 %v451_v60  ;;  %v4003_v60 = vld [vmem:[%s3767_s21 + $0xb0] sm:$0xff]  ;;  %v4036_v8 = vld [vmem:[%s3767_s21 + $0x98] sm:$0xff] }
 0x13b   :  { %895 = vmatpush.msrb.mxu3 %v864_v26  ;;  %953 = vmatpush.msrb.mxu0 %v866_v30  ;;  %v4060_v30 = vld [vmem:[%s3767_s21 + $0x18] sm:$0xff] }
 0x13c   :  { %v505_v33 = vpop.f32.mrf.mxu1  ;;  %557 = vmatpush.msrb.mxu2 %v447_v1  ;;  %v4020_v1 = vld [vmem:[%s3767_s21 + $0x28] sm:$0xff] }
 0x13d   :  { %v577_v41 = vmul.f32 %v505_v33, %v3827_v52 }
 0x140   :  { %307 = vmax.xlane.f32.xlu2 %v306_v34 }
 0x144   :  { %v508_v36 = vpop.f32.mrf.mxu1 }
 0x145   :  { %v581_v40 = vmul.f32 %v508_v36, %v3822_v49 }
 0x14c   :  { %v511_v37 = vpop.f32.mrf.mxu1 }
 0x14d   :  { %v585_v39 = vmul.f32 %v511_v37, %v3813_v46 }
 0x14f   :  { %757 = vmatpush.msrb.mxu1 %v585_v39 }
 0x151   :  { %758 = vmatpush.msrb.mxu1 %v581_v40  ;;  %v3969_v40 = vpop.f32.mrf.mxu0 }
 0x152   :  { %5090 = vst [vmem:[#allocation10_spill] sm:$0xff] %v3969_v40 }
 0x153   :  { %759 = vmatpush.msrb.mxu1 %v577_v41  ;;  %v3971_v41 = vpop.f32.mrf.mxu3 }
 0x154   :  { %v3967_v39 = vpop.f32.mrf.mxu1  ;;  %5091 = vst [vmem:[#allocation11_spill] sm:$0xff] %v3971_v41 }
 0x155   :  { %760 = vmatpush.msrb.mxu1 %v573_v42  ;;  %5089 = vst [vmem:[#allocation9_spill] sm:$0xff] %v3967_v39 }
 0x157   :  { %921 = vmatpush.msra.mxu1 %v877_v57 }
 0x159   :  { %922 = vmatpush.msra.mxu1 %v873_v63  ;;  %v3975_v44 = vpop.f32.mrf.mxu0 }
 0x15a   :  { %5093 = vst [vmem:[#allocation13_spill] sm:$0xff] %v3975_v44 }
 0x15b   :  { %923 = vmatpush.msra.mxu1 %v869_v7  ;;  %v3977_v45 = vpop.f32.mrf.mxu3  ;;  %v4030_v7 = vld [vmem:[%s3767_s21 + $0xe0] sm:$0xff] }
 0x15c   :  { %v3973_v42 = vpop.f32.mrf.mxu1  ;;  %5094 = vst [vmem:[#allocation14_spill] sm:$0xff] %v3977_v45 }
 0x15d   :  { %924 = vmatpush.msra.mxu1 %v865_v28  ;;  %5092 = vst [vmem:[#allocation12_spill] sm:$0xff] %v3973_v42 }
 0x161   :  { %v3981_v48 = vpop.f32.mrf.mxu0 }
 0x162   :  { %5096 = vst [vmem:[#allocation16_spill] sm:$0xff] %v3981_v48 }
 0x164   :  { %v3979_v47 = vpop.f32.mrf.mxu1 }
 0x165   :  { %5095 = vst [vmem:[#allocation15_spill] sm:$0xff] %v3979_v47 }
 0x1aa   :  { %v311_v10 = vpop.xlane.xlu0 %310  ;;  %v314_v34 = vpop.xlane.xlu1 %313 }
 0x1ab   :  { %v305_v50 = vpop.xlane.xlu2 %304  ;;  %v317_v31 = vsub.f32 %v3848_v12, %v311_v10  ;;  %v318_v12 = vsub.f32 %v3845_v11, %v314_v34  ;;  %v4039_v10 = vld [vmem:[%s3767_s21 + $0xa0] sm:$0xff] }
 0x1ac   :  { %v315_v51 = vsub.f32 %v299_v24, %v305_v50  ;;  %v443_v24 = vld [vmem:[%s3670_s13 + $0x18] sm:$0xff]  ;;  %v3983_v50 = vpop.f32.mrf.mxu3 }
 0x1ad   :  { %558 = vmatpush.msrb.mxu2 %v443_v24  ;;  %v325_v36 = vmul.f32 1.442695, %v318_v12  ;;  %5097 = vst [vmem:[#allocation17_spill] sm:$0xff] %v3983_v50  ;;  %v4051_v24 = vld [vmem:[%s3767_s21 + $0x60] sm:$0xff] }
 0x1ae   :  { %v319_v53 = vmul.f32 1.442695, %v315_v51  ;;  %v3985_v51 = vpop.f32.mrf.mxu1 }
 0x1af   :  { %5098 = vst [vmem:[#allocation18_spill] sm:$0xff] %v3985_v51 }
 0x1b0   :  { %3509 = vpow2.f32 %v319_v53  ;;  %v3987_v53 = vpop.f32.mrf.mxu0 }
 0x1b1   :  { %5099 = vst [vmem:[#allocation19_spill] sm:$0xff] %v3987_v53 }
 0x1b3   :  { %v308_v62 = vpop.xlane.xlu2 %307 }
 0x1b4   :  { %v316_v2 = vsub.f32 %v300_v32, %v308_v62  ;;  %v323_v32 = vmul.f32 1.442695, %v317_v31  ;;  %v3995_v57 = vpop.f32.mrf.mxu3  ;;  %v4011_v62 = vld [vmem:[%s3767_s21 + $0x70] sm:$0xff]  ;;  %v4063_v31 = vld [vmem:[%s3767_s21 + $0x20] sm:$0xff] }
 0x1b5   :  { %5100 = vst [vmem:[#allocation20_spill] sm:$0xff] %v3995_v57 }
 0x1b6   :  { %v321_v13 = vmul.f32 1.442695, %v316_v2  ;;  %v3889_v19 = vpop.eup %3509  ;;  %v4023_v2 = vld [vmem:[%s3767_s21 + $0x30] sm:$0xff] }
 0x1b7   :  { %3190 = vmatmul.msk.f32.vlgmr.msra.gmra.mxu2 %vm226_vm2, %v3889_v19  ;;  %3226 = vmatmul.msk.f32.vlgmr.msra.gmra.mxu3 %vm226_vm2, %v3889_v19 }
 0x1b8   :  { %3511 = vpow2.f32 %v321_v13  ;;  %3230 = vmatmul.msk.f32.vlgmr.msrb.gmra.mxu1 %vm226_vm2, %v3889_v19  ;;  %3234 = vmatmul.msk.f32.vlgmr.msra.gmra.mxu0 %vm226_vm2, %v3889_v19  ;;  %v4048_v13 = vld [vmem:[%s3767_s21 + $0x58] sm:$0xff] }
 0x1b9   :  { %3513 = vpow2.f32 %v323_v32  ;;  %1053 = vmatpush.msrb.mxu1 %v3990_v54  ;;  %1082 = vmatpush.msra.mxu0 %v3993_v56 }
 0x1ba   :  { %3515 = vpow2.f32 %v325_v36  ;;  %699 = vmatpush.msra.mxu2 %v4026_v6  ;;  %1024 = vmatpush.msra.mxu3 %v4030_v7 }
 0x1bb   :  { %1054 = vmatpush.msrb.mxu1 %v4000_v59  ;;  %1083 = vmatpush.msra.mxu0 %v4003_v60 }
 0x1bc   :  { %700 = vmatpush.msra.mxu2 %v4036_v8  ;;  %1025 = vmatpush.msra.mxu3 %v4039_v10 }
 0x1bd   :  { %1055 = vmatpush.msrb.mxu1 %v4008_v61  ;;  %1084 = vmatpush.msra.mxu0 %v4011_v62 }
 0x1be   :  { %v3904_v33 = vpop.eup %3511  ;;  %701 = vmatpush.msra.mxu2 %v4048_v13  ;;  %1026 = vmatpush.msra.mxu3 %v4051_v24 }
 0x1bf   :  { %3191 = vmatmul.msk.f32.gmra.mxu2 %vm226_vm2, %v3904_v33  ;;  %3227 = vmatmul.msk.f32.gmra.mxu3 %vm226_vm2, %v3904_v33  ;;  %v3915_v37 = vpop.eup %3513 }
 0x1c0   :  { %3231 = vmatmul.msk.f32.gmra.mxu1 %vm226_vm2, %v3904_v33  ;;  %3235 = vmatmul.msk.f32.gmra.mxu0 %vm226_vm2, %v3904_v33  ;;  %v3925_v11 = vpop.eup %3515 }
 0x1c1   :  { %1056 = vmatpush.msrb.mxu1 %v4020_v1  ;;  %1085 = vmatpush.msra.mxu0 %v4023_v2 }
 0x1c2   :  { %702 = vmatpush.msra.mxu2 %v4060_v30  ;;  %1027 = vmatpush.msra.mxu3 %v4063_v31 }
 0x1c7   :  { %3192 = vmatmul.msk.f32.gmra.mxu2 %vm226_vm2, %v3915_v37  ;;  %3228 = vmatmul.msk.f32.gmra.mxu3 %vm226_vm2, %v3915_v37 }
 0x1c8   :  { %3232 = vmatmul.msk.f32.gmra.mxu1 %vm226_vm2, %v3915_v37  ;;  %3236 = vmatmul.msk.f32.gmra.mxu0 %vm226_vm2, %v3915_v37 }
 0x1cf   :  { %3193 = vmatmul.msk.f32.gmra.mxu2 %vm226_vm2, %v3925_v11  ;;  %3229 = vmatmul.msk.f32.gmra.mxu3 %vm226_vm2, %v3925_v11 }
 0x1d0   :  { %3233 = vmatmul.msk.f32.gmra.mxu1 %vm226_vm2, %v3925_v11  ;;  %3237 = vmatmul.msk.f32.gmra.mxu0 %vm226_vm2, %v3925_v11 }
 0x1d7   :  { %3206 = vmatmul.msk.f32.vlgmr.msrb.gmra.mxu2 %vm226_vm2, %v3700_v14  ;;  %3242 = vmatmul.msk.f32.vlgmr.msrb.gmra.mxu3 %vm226_vm2, %v3700_v14 }
 0x1d8   :  { %3246 = vmatmul.msk.f32.vlgmr.msra.gmra.mxu1 %vm226_vm2, %v3700_v14  ;;  %3250 = vmatmul.msk.f32.vlgmr.msrb.gmra.mxu0 %vm226_vm2, %v3700_v14 }
 0x1df   :  { %3207 = vmatmul.msk.f32.gmra.mxu2 %vm226_vm2, %v3705_v15  ;;  %3243 = vmatmul.msk.f32.gmra.mxu3 %vm226_vm2, %v3705_v15 }
 0x1e0   :  { %3247 = vmatmul.msk.f32.gmra.mxu1 %vm226_vm2, %v3705_v15  ;;  %3251 = vmatmul.msk.f32.gmra.mxu0 %vm226_vm2, %v3705_v15 }
 0x1e7   :  { %3208 = vmatmul.msk.f32.gmra.mxu2 %vm226_vm2, %v3712_v16  ;;  %3244 = vmatmul.msk.f32.gmra.mxu3 %vm226_vm2, %v3712_v16 }
 0x1e8   :  { %3248 = vmatmul.msk.f32.gmra.mxu1 %vm226_vm2, %v3712_v16  ;;  %3252 = vmatmul.msk.f32.gmra.mxu0 %vm226_vm2, %v3712_v16 }
 0x1ef   :  { %3209 = vmatmul.msk.f32.gmra.mxu2 %vm226_vm2, %v3719_v17  ;;  %3245 = vmatmul.msk.f32.gmra.mxu3 %vm226_vm2, %v3719_v17 }
 0x1f0   :  { %3249 = vmatmul.msk.f32.gmra.mxu1 %vm226_vm2, %v3719_v17  ;;  %3253 = vmatmul.msk.f32.gmra.mxu0 %vm226_vm2, %v3719_v17 }
 0x1f7   :  { %3222 = vmatmul.msk.f32.vlgmr.msra.gmra.mxu2 %vm226_vm2, %v3795_v35  ;;  %3258 = vmatmul.msk.f32.vlgmr.msra.gmra.mxu3 %vm226_vm2, %v3795_v35 }
 0x1f8   :  { %3262 = vmatmul.msk.f32.vlgmr.msrb.gmra.mxu1 %vm226_vm2, %v3795_v35  ;;  %3266 = vmatmul.msk.f32.vlgmr.msra.gmra.mxu0 %vm226_vm2, %v3795_v35 }
 0x1ff   :  { %3223 = vmatmul.msk.f32.gmra.mxu2 %vm226_vm2, %v3802_v38  ;;  %3259 = vmatmul.msk.f32.gmra.mxu3 %vm226_vm2, %v3802_v38 }
 0x200   :  { %3263 = vmatmul.msk.f32.gmra.mxu1 %vm226_vm2, %v3802_v38  ;;  %3267 = vmatmul.msk.f32.gmra.mxu0 %vm226_vm2, %v3802_v38 }
 0x207   :  { %3224 = vmatmul.msk.f32.gmra.mxu2 %vm226_vm2, %v3810_v43  ;;  %3260 = vmatmul.msk.f32.gmra.mxu3 %vm226_vm2, %v3810_v43 }
 0x208   :  { %3264 = vmatmul.msk.f32.gmra.mxu1 %vm226_vm2, %v3810_v43  ;;  %3268 = vmatmul.msk.f32.gmra.mxu0 %vm226_vm2, %v3810_v43 }
 0x20f   :  { %3225 = vmatmul.msk.f32.gmra.mxu2 %vm226_vm2, %v3836_v58  ;;  %3261 = vmatmul.msk.f32.gmra.mxu3 %vm226_vm2, %v3836_v58 }
 0x210   :  { %3265 = vmatmul.msk.f32.gmra.mxu1 %vm226_vm2, %v3836_v58  ;;  %3269 = vmatmul.msk.f32.gmra.mxu0 %vm226_vm2, %v3836_v58 }
 0x235   :  { %v4015_v63 = vpop.f32.mrf.mxu1  ;;  %v4017_v0 = vpop.f32.mrf.mxu0 }
 0x236   :  { %5101 = vst [vmem:[#allocation21_spill] sm:$0xff] %v4015_v63 }
 0x237   :  { %5102 = vst [vmem:[#allocation22_spill] sm:$0xff] %v4017_v0 }
 0x23a   :  { %v4053_v26 = vpop.f32.mrf.mxu2  ;;  %v4055_v28 = vpop.f32.mrf.mxu3 }
 0x23b   :  { %5103 = vst [vmem:[#allocation23_spill] sm:$0xff] %v4053_v26 }
 0x23c   :  { %5104 = vst [vmem:[#allocation24_spill] sm:$0xff] %v4055_v28 }
 0x23d   :  { %v4065_v32 = vpop.f32.mrf.mxu1  ;;  %v4067_v34 = vpop.f32.mrf.mxu0 }
 0x23e   :  { %5105 = vst [vmem:[#allocation25_spill] sm:$0xff] %v4065_v32 }
 0x23f   :  { %5106 = vst [vmem:[#allocation26_spill] sm:$0xff] %v4067_v34 }
 0x242   :  { %v4079_v12 = vpop.f32.mrf.mxu2  ;;  %v4081_v36 = vpop.f32.mrf.mxu3 }
 0x243   :  { %5107 = vst [vmem:[#allocation27_spill] sm:$0xff] %v4079_v12 }
 0x244   :  { %5108 = vst [vmem:[#allocation28_spill] sm:$0xff] %v4081_v36 }
 0x245   :  { %v4083_v26 = vpop.f32.mrf.mxu1  ;;  %v4085_v0 = vpop.f32.mrf.mxu0 }
 0x246   :  { %5109 = vst [vmem:[#allocation29_spill] sm:$0xff] %v4083_v26 }
 0x247   :  { %5110 = vst [vmem:[#allocation30_spill] sm:$0xff] %v4085_v0 }
 0x24a   :  { %v4095_v40 = vpop.f32.mrf.mxu2  ;;  %v4097_v12 = vpop.f32.mrf.mxu3 }
 0x24b   :  { %5111 = vst [vmem:[#allocation31_spill] sm:$0xff] %v4095_v40 }
 0x24c   :  { %5112 = vst [vmem:[#allocation32_spill] sm:$0xff] %v4097_v12 }
 0x24d   :  { %v4099_v28 = vpop.f32.mrf.mxu1  ;;  %v4101_v41 = vpop.f32.mrf.mxu0 }
 0x24e   :  { %5113 = vst [vmem:[#allocation33_spill] sm:$0xff] %v4099_v28 }
 0x24f   :  { %5114 = vst [vmem:[#allocation34_spill] sm:$0xff] %v4101_v41 }
 0x252   :  { %v4111_v63 = vpop.f32.mrf.mxu2  ;;  %v4113_v40 = vpop.f32.mrf.mxu3 }
 0x253   :  { %5115 = vst [vmem:[#allocation35_spill] sm:$0xff] %v4111_v63 }
 0x254   :  { %5116 = vst [vmem:[#allocation36_spill] sm:$0xff] %v4113_v40 }
 0x255   :  { %v926_v39 = vpop.f32.mrf.mxu1  ;;  %v955_v53 = vpop.f32.mrf.mxu0 }
 0x25a   :  { %v560_v41 = vpop.f32.mrf.mxu2  ;;  %v897_v57 = vpop.f32.mrf.mxu3 }
 0x25d   :  { %v929_v28 = vpop.f32.mrf.mxu1  ;;  %v958_v51 = vpop.f32.mrf.mxu0 }
 0x25e   :  { %v1001_v32 = vmul.f32 %v929_v28, %v4008_v61  ;;  %v1002_v42 = vmul.f32 %v958_v51, %v4011_v62  ;;  %v5119_v61 = vld [vmem:[#allocation8_spill] sm:$0xff] }
 0x262   :  { %v563_v0 = vpop.f32.mrf.mxu2  ;;  %v900_v48 = vpop.f32.mrf.mxu3 }
 0x265   :  { %v932_v12 = vpop.f32.mrf.mxu1  ;;  %v961_v50 = vpop.f32.mrf.mxu0 }
 0x266   :  { %v1005_v36 = vmul.f32 %v932_v12, %v4000_v59  ;;  %v1006_v45 = vmul.f32 %v961_v50, %v4003_v60 }
 0x26a   :  { %v566_v26 = vpop.f32.mrf.mxu2  ;;  %v903_v63 = vpop.f32.mrf.mxu3 }
 0x26b   :  { %v1004_v50 = vmul.f32 %v903_v63, %v4039_v10 }
 0x26d   :  { %v935_v47 = vpop.f32.mrf.mxu1  ;;  %v964_v40 = vpop.f32.mrf.mxu0 }
 0x26e   :  { %v1009_v34 = vmul.f32 %v935_v47, %v3990_v54  ;;  %v1010_v44 = vmul.f32 %v964_v40, %v3993_v56  ;;  %v997_v40 = vmul.f32 %v926_v39, %v4020_v1  ;;  %v998_v54 = vmul.f32 %v955_v53, %v4023_v2 }
 0x26f   :  { %v996_v39 = vmul.f32 %v897_v57, %v4063_v31 }
 0x270   :  { %1169 = vmatpush.msra.mxu1 %v1009_v34  ;;  %1198 = vmatpush.msrb.mxu0 %v1010_v44  ;;  %v583_v44 = vmul.f32 %v566_v26, %v4036_v8 }
 0x272   :  { %1170 = vmatpush.msra.mxu1 %v1005_v36  ;;  %1199 = vmatpush.msrb.mxu0 %v1006_v45  ;;  %v569_v55 = vpop.f32.mrf.mxu2  ;;  %v906_v52 = vpop.f32.mrf.mxu3 }
 0x273   :  { %v587_v49 = vmul.f32 %v569_v55, %v4026_v6  ;;  %v1008_v47 = vmul.f32 %v906_v52, %v4030_v7  ;;  %v579_v52 = vmul.f32 %v563_v0, %v4048_v13  ;;  %v1000_v55 = vmul.f32 %v900_v48, %v4051_v24 }
 0x274   :  { %1171 = vmatpush.msra.mxu1 %v1001_v32  ;;  %1200 = vmatpush.msrb.mxu0 %v1002_v42  ;;  %v879_v42 = vld [vmem:[%s3670_s13 + $0xf8] sm:$0xff] }
 0x275   :  { %815 = vmatpush.msrb.mxu2 %v587_v49  ;;  %1140 = vmatpush.msrb.mxu3 %v1008_v47  ;;  %v575_v49 = vmul.f32 %v560_v41, %v4060_v30  ;;  %v871_v41 = vld [vmem:[%s3670_s13 + $0x78] sm:$0xff] }
 0x276   :  { %1172 = vmatpush.msra.mxu1 %v997_v40  ;;  %1201 = vmatpush.msrb.mxu0 %v998_v54  ;;  %v5120_v47 = vld [vmem:[#allocation12_spill] sm:$0xff]  ;;  %v5121_v40 = vld [vmem:[#allocation25_spill] sm:$0xff] }
 0x277   :  { %3278 = vmatmul.msk.f32.vlgmr.msra.gmra.mxu1 %vm226_vm2, %v3889_v19  ;;  %3282 = vmatmul.msk.f32.vlgmr.msrb.gmra.mxu0 %vm226_vm2, %v3889_v19  ;;  %v766_v54 = vadd.f32 %v5121_v40, %v5120_v47 }
 0x278   :  { %816 = vmatpush.msrb.mxu2 %v583_v44  ;;  %1141 = vmatpush.msrb.mxu3 %v1004_v50  ;;  %v5122_v44 = vld [vmem:[#allocation14_spill] sm:$0xff]  ;;  %v5123_v50 = vld [vmem:[#allocation28_spill] sm:$0xff] }
 0x279   :  { %1581 = vmatpush.msra.mxu0 %v3674_v3  ;;  %v875_v3 = vld [vmem:[%s3670_s13 + $0xb8] sm:$0xff] }
 0x27a   :  { %817 = vmatpush.msrb.mxu2 %v579_v52  ;;  %1142 = vmatpush.msrb.mxu3 %v1000_v55  ;;  %v737_v52 = vadd.f32 %v5123_v50, %v5122_v44  ;;  %v5124_v55 = vld [vmem:[#allocation13_spill] sm:$0xff] }
 0x27b   :  { %1582 = vmatpush.msra.mxu0 %v3677_v4  ;;  %v867_v4 = vld [vmem:[%s3670_s13 + $0x38] sm:$0xff] }
 0x27c   :  { %818 = vmatpush.msrb.mxu2 %v575_v49  ;;  %1143 = vmatpush.msrb.mxu3 %v996_v39  ;;  %v5125_v49 = vld [vmem:[#allocation26_spill] sm:$0xff] }
 0x27d   :  { %3238 = vmatmul.msk.f32.vlgmr.msrb.gmra.mxu2 %vm226_vm2, %v3889_v19  ;;  %3274 = vmatmul.msk.f32.vlgmr.msrb.gmra.mxu3 %vm226_vm2, %v3889_v19  ;;  %v795_v39 = vadd.f32 %v5125_v49, %v5124_v55  ;;  %v5132_v55 = vld [vmem:[#allocation18_spill] sm:$0xff]  ;;  %v5133_v49 = vld [vmem:[#allocation33_spill] sm:$0xff] }
 0x27e   :  { %979 = vmatpush.msra.mxu2 %v879_v42  ;;  %1583 = vmatpush.msra.mxu0 %v3682_v5  ;;  %v4187_v5 = vpop.f32.mrf.mxu2 }
 0x27f   :  { %3279 = vmatmul.msk.f32.gmra.mxu1 %vm226_vm2, %v3904_v33  ;;  %3283 = vmatmul.msk.f32.gmra.mxu0 %vm226_vm2, %v3904_v33 }
 0x280   :  { %980 = vmatpush.msra.mxu2 %v875_v3  ;;  %1584 = vmatpush.msra.mxu0 %v3692_v9  ;;  %v834_v3 = vmax.f32 %v737_v52, %v795_v39  ;;  %v772_v39 = vadd.f32 %v5133_v49, %v5132_v55 }
 0x282   :  { %1725 = vmatpush.msrb.mxu0 %v3770_v23  ;;  %981 = vmatpush.msra.mxu2 %v871_v41 }
 0x284   :  { %1726 = vmatpush.msrb.mxu0 %v3775_v25  ;;  %982 = vmatpush.msra.mxu2 %v867_v4 }
 0x285   :  { %3239 = vmatmul.msk.f32.gmra.mxu2 %vm226_vm2, %v3904_v33  ;;  %3275 = vmatmul.msk.f32.gmra.mxu3 %vm226_vm2, %v3904_v33 }
 0x286   :  { %1727 = vmatpush.msrb.mxu0 %v3780_v27  ;;  %v4189_v9 = vpop.f32.mrf.mxu2  ;;  %v4196_v27 = vld [vmem:[%s3767_s21 + $0xf8] sm:$0xff] }
 0x287   :  { %3280 = vmatmul.msk.f32.gmra.mxu1 %vm226_vm2, %v3915_v37  ;;  %3284 = vmatmul.msk.f32.gmra.mxu0 %vm226_vm2, %v3915_v37 }
 0x288   :  { %1728 = vmatpush.msrb.mxu0 %v3785_v29  ;;  %1111 = vmatpush.msrb.mxu2 %v4196_v27  ;;  %v851_v29 = vld [vmem:[%s3767_s21 + $0x38] sm:$0xff] }
 0x28d   :  { %3240 = vmatmul.msk.f32.gmra.mxu2 %vm226_vm2, %v3915_v37  ;;  %3276 = vmatmul.msk.f32.gmra.mxu3 %vm226_vm2, %v3915_v37 }
 0x28e   :  { %v4191_v23 = vpop.f32.mrf.mxu2 }
 0x28f   :  { %3281 = vmatmul.msk.f32.gmra.mxu1 %vm226_vm2, %v3925_v11  ;;  %3285 = vmatmul.msk.f32.gmra.mxu0 %vm226_vm2, %v3925_v11 }
 0x295   :  { %3241 = vmatmul.msk.f32.gmra.mxu2 %vm226_vm2, %v3925_v11  ;;  %3277 = vmatmul.msk.f32.gmra.mxu3 %vm226_vm2, %v3925_v11 }
 0x296   :  { %v4193_v25 = vpop.f32.mrf.mxu2 }
 0x29d   :  { %3254 = vmatmul.msk.f32.vlgmr.msra.gmra.mxu2 %vm226_vm2, %v3700_v14  ;;  %v859_v14 = vld [vmem:[%s3767_s21 + $0xb8] sm:$0xff] }
 0x29e   :  { %1112 = vmatpush.msrb.mxu2 %v859_v14 }
 0x2a5   :  { %3255 = vmatmul.msk.f32.gmra.mxu2 %vm226_vm2, %v3705_v15  ;;  %v855_v15 = vld [vmem:[%s3767_s21 + $0x78] sm:$0xff] }
 0x2a6   :  { %1113 = vmatpush.msrb.mxu2 %v855_v15 }
 0x2a8   :  { %1114 = vmatpush.msrb.mxu2 %v851_v29 }
 0x2ad   :  { %3256 = vmatmul.msk.f32.gmra.mxu2 %vm226_vm2, %v3712_v16 }
 0x2b5   :  { %3257 = vmatmul.msk.f32.gmra.mxu2 %vm226_vm2, %v3719_v17 }
 0x2bd   :  { %3270 = vmatmul.msk.f32.vlgmr.msrb.gmra.mxu2 %vm226_vm2, %v3795_v35 }
 0x2c5   :  { %3271 = vmatmul.msk.f32.gmra.mxu2 %vm226_vm2, %v3802_v38 }
 0x2cd   :  { %3272 = vmatmul.msk.f32.gmra.mxu2 %vm226_vm2, %v3810_v43  ;;  %v5117_v43 = vld [vmem:[#allocation6_spill] sm:$0xff] }
 0x2d5   :  { %3273 = vmatmul.msk.f32.gmra.mxu2 %vm226_vm2, %v3836_v58  ;;  %v5118_v58 = vld [vmem:[#allocation7_spill] sm:$0xff] }
 0x300   :  { %v4202_v16 = vpop.f32.mrf.mxu2 }
 0x308   :  { %v823_v17 = vpop.f32.mrf.mxu2 }
 0x309   :  { %v824_v34 = vadd.f32 %v823_v17, %v4189_v9 }
 0x30b   :  { %v835_v42 = vmax.f32 %v766_v54, %v824_v34 }
 0x310   :  { %v826_v45 = vpop.f32.mrf.mxu2 }
 0x311   :  { %v827_v9 = vadd.f32 %v826_v45, %v4191_v23  ;;  %v5130_v23 = vld [vmem:[#allocation16_spill] sm:$0xff]  ;;  %v5131_v45 = vld [vmem:[#allocation30_spill] sm:$0xff] }
 0x318   :  { %v4210_v48 = vpop.f32.mrf.mxu2 }
 0x319   :  { %v830_v50 = vadd.f32 %v4210_v48, %v4193_v25 }
 0x31b   :  { %v839_v25 = vmax.f32 %v772_v39, %v830_v50 }
 0x320   :  { %v984_v51 = vpop.f32.mrf.mxu2 }
 0x321   :  { %v999_v38 = vmul.f32 %v984_v51, %v851_v29  ;;  %v841_v29 = vmax.f32 %v834_v3, %v835_v42  ;;  %v5134_v42 = vld [vmem:[#allocation35_spill] sm:$0xff]  ;;  %v5136_v3 = vld [vmem:[#allocation36_spill] sm:$0xff] }
 0x322   :  { %3517 = vrcp.f32 %v5134_v42  ;;  %vm415_vm8 = vweird.f32 %v5134_v42 }
 0x328   :  { %v987_v53 = vpop.f32.mrf.mxu2 }
 0x329   :  { %v1003_v60 = vmul.f32 %v987_v53, %v855_v15  ;;  %v5081_v53 = vmov 0  }
 0x32a   :  { %3498 = vset.pattern.permute.xlu2 %v5081_v53  ;;  %3500 = vset.pattern.permute.xlu1 %v5081_v53 }
 0x32b   :  { %3499 = vset.pattern.permute.xlu0 %v5081_v53 }
 0x330   :  { %v990_v56 = vpop.f32.mrf.mxu2 }
 0x331   :  { %v1007_v35 = vmul.f32 %v990_v56, %v859_v14  ;;  %v5126_v56 = vld [vmem:[#allocation15_spill] sm:$0xff] }
 0x338   :  { %v993_v57 = vpop.f32.mrf.mxu2 }
 0x339   :  { %v1011_v59 = vmul.f32 %v993_v57, %v4196_v27  ;;  %v5127_v57 = vld [vmem:[#allocation29_spill] sm:$0xff] }
 0x33b   :  { %1227 = vmatpush.msra.mxu2 %v1011_v59  ;;  %v769_v59 = vadd.f32 %v5127_v57, %v5126_v56 }
 0x33d   :  { %1228 = vmatpush.msra.mxu2 %v1007_v35  ;;  %v5128_v35 = vld [vmem:[#allocation17_spill] sm:$0xff] }
 0x33f   :  { %1229 = vmatpush.msra.mxu2 %v1003_v60  ;;  %v5129_v60 = vld [vmem:[#allocation32_spill] sm:$0xff] }
 0x341   :  { %1230 = vmatpush.msra.mxu2 %v999_v38  ;;  %v740_v38 = vadd.f32 %v5129_v60, %v5128_v35  ;;  %v3518_v60 = vpop.eup %3517 }
 0x342   :  { %3286 = vmatmul.msk.f32.vlgmr.msra.gmra.mxu2 %vm226_vm2, %v3889_v19  ;;  %vm416_vm7 = vweird.f32 %v3518_v60 }
 0x343   :  { %1610 = vmatpush.msrb.mxu2 %v3738_v18  ;;  %v4231_v18 = vpop.f32.mrf.mxu3  ;;  %vm417_vm9 = vmor %vm415_vm8, %vm416_vm7  ;;  %vm1382_vm8 = vcmask 1041408  }
 0x345   :  { %1611 = vmatpush.msrb.mxu2 %v3744_v20  ;;  %v4233_v20 = vpop.f32.mrf.mxu1 }
 0x347   :  { %1612 = vmatpush.msrb.mxu2 %v3748_v21  ;;  %v4235_v21 = vpop.f32.mrf.mxu0 }
 0x349   :  { %1613 = vmatpush.msrb.mxu2 %v3752_v22 }
 0x34a   :  { %3287 = vmatmul.msk.f32.gmra.mxu2 %vm226_vm2, %v3904_v33 }
 0x34b   :  { %1754 = vmatpush.msra.mxu2 %v3813_v46  ;;  %v1032_v22 = vpop.f32.mrf.mxu3  ;;  %v4237_v46 = vpop.f32.mrf.mxu2 }
 0x34d   :  { %1755 = vmatpush.msra.mxu2 %v5117_v43  ;;  %v1061_v19 = vpop.f32.mrf.mxu1 }
 0x34f   :  { %1756 = vmatpush.msra.mxu2 %v5118_v58  ;;  %v1090_v33 = vpop.f32.mrf.mxu0 }
 0x351   :  { %1757 = vmatpush.msra.mxu2 %v5119_v61 }
 0x352   :  { %3288 = vmatmul.msk.f32.gmra.mxu2 %vm226_vm2, %v3915_v37 }
 0x353   :  { %v1035_v62 = vpop.f32.mrf.mxu3  ;;  %v1119_v63 = vpop.f32.mrf.mxu2 }
 0x355   :  { %v1064_v0 = vpop.f32.mrf.mxu1 }
 0x357   :  { %v1093_v1 = vpop.f32.mrf.mxu0 }
 0x35a   :  { %3289 = vmatmul.msk.f32.gmra.mxu2 %vm226_vm2, %v3925_v11 }
 0x35b   :  { %v4239_v2 = vpop.f32.mrf.mxu3  ;;  %v1122_v37 = vpop.f32.mrf.mxu2 }
 0x35d   :  { %v4241_v7 = vpop.f32.mrf.mxu1 }
 0x35f   :  { %v4243_v11 = vpop.f32.mrf.mxu0 }
 0x363   :  { %v4245_v10 = vpop.f32.mrf.mxu3  ;;  %v4247_v24 = vpop.f32.mrf.mxu2 }
 0x365   :  { %v4249_v26 = vpop.f32.mrf.mxu1 }
 0x367   :  { %v4251_v28 = vpop.f32.mrf.mxu0 }
 0x368   :  { %v1204_v50 = vadd.f32 %v4251_v28, %v4235_v21  ;;  %v419_v21 = vand.u32 2147483647, %v5134_v42 }
 0x36a   :  { %vm420_vm10 = vcmp.eq.f32.partialorder %v419_v21, 8.507059e+37 }
 0x36b   :  { %v1148_v31 = vpop.f32.mrf.mxu3 }
 0x36c   :  { %v1149_v41 = vadd.f32 %v1148_v31, %v1032_v22  ;;  %v845_v31 = vmax.f32 %v841_v29, -1e+30 }
 0x36d   :  { %v1177_v12 = vpop.f32.mrf.mxu1 }
 0x36e   :  { %v1178_v4 = vadd.f32 %v1177_v12, %v1061_v19  ;;  %v798_v19 = vadd.f32 %v5131_v45, %v5130_v23  ;;  %v5140_v23 = vld [vmem:[#allocation21_spill] sm:$0xff]  ;;  %v5141_v45 = vld [vmem:[#allocation11_spill] sm:$0xff] }
 0x36f   :  { %v1206_v36 = vpop.f32.mrf.mxu0 }
 0x370   :  { %v1207_v14 = vadd.f32 %v1206_v36, %v1090_v33  ;;  %v837_v33 = vmax.f32 %v769_v59, %v827_v9  ;;  %v836_v34 = vmax.f32 %v740_v38, %v798_v19  ;;  %v821_v59 = vadd.f32 %v4202_v16, %v4187_v5  ;;  %v5142_v19 = vld [vmem:[#allocation24_spill] sm:$0xff] }
 0x372   :  { %v1246_v43 = vmax.f32 %v1149_v41, %v1207_v14  ;;  %v842_v44 = vmax.f32 %v836_v34, %v837_v33  ;;  %v5137_v14 = vld [vmem:[#allocation19_spill] sm:$0xff]  ;;  %v734_v33 = vadd.f32 %v5142_v19, %v5141_v45  ;;  %v411_v34 = vmul.f32 %v3518_v60, %v5134_v42 }
 0x373   :  { %v1151_v51 = vpop.f32.mrf.mxu3 }
 0x374   :  { %v1152_v12 = vadd.f32 %v1151_v51, %v1035_v62  ;;  %v5135_v62 = vld [vmem:[#allocation20_spill] sm:$0xff] }
 0x375   :  { %v1180_v61 = vpop.f32.mrf.mxu1  ;;  %v743_v41 = vadd.f32 %v5136_v3, %v5135_v62 }
 0x376   :  { %v1181_v47 = vadd.f32 %v1180_v61, %v1064_v0 }
 0x377   :  { %v1209_v22 = vpop.f32.mrf.mxu0 }
 0x378   :  { %v1210_v54 = vadd.f32 %v1209_v22, %v1093_v1  ;;  %v5139_v22 = vld [vmem:[#allocation9_spill] sm:$0xff] }
 0x37a   :  { %v1248_v0 = vmax.f32 %v1152_v12, %v1210_v54 }
 0x37b   :  { %v1154_v1 = vpop.f32.mrf.mxu3 }
 0x37c   :  { %v1155_v56 = vadd.f32 %v1154_v1, %v4239_v2  ;;  %v763_v2 = vadd.f32 %v5140_v23, %v5139_v22  ;;  %v5146_v1 = vld [vmem:[#allocation31_spill] sm:$0xff] }
 0x37d   :  { %v1183_v9 = vpop.f32.mrf.mxu1  ;;  %vm401_vm0 = vweird.f32 %v5146_v1 }
 0x37e   :  { %v1184_v38 = vadd.f32 %v1183_v9, %v4241_v7  ;;  %v5143_v7 = vld [vmem:[#allocation10_spill] sm:$0xff]  ;;  %v833_v12 = vmax.f32 %v763_v2, %v821_v59 }
 0x3c5   :  { %v4253_v32 = vpop.f32.mrf.mxu2 }
 0x3c6   :  { %v1233_v5 = vadd.f32 %v4253_v32, %v4237_v46 }
 0x3cd   :  { %v1235_v15 = vpop.f32.mrf.mxu2 }
 0x3ce   :  { %v1236_v17 = vadd.f32 %v1235_v15, %v1119_v63  ;;  %v5138_v15 = vld [vmem:[#allocation34_spill] sm:$0xff] }
 0x3cf   :  { %v801_v29 = vadd.f32 %v5138_v15, %v5137_v14 }
 0x3d0   :  { %v1247_v58 = vmax.f32 %v1178_v4, %v1236_v17  ;;  %v1212_v17 = vpop.f32.mrf.mxu0 }
 0x3d1   :  { %v838_v51 = vmax.f32 %v743_v41, %v801_v29 }
 0x3d2   :  { %v1253_v63 = vmax.f32 %v1246_v43, %v1247_v58  ;;  %v1213_v43 = vadd.f32 %v1212_v17, %v4243_v11 }
 0x3d3   :  { %v843_v58 = vmax.f32 %v838_v51, %v839_v25 }
 0x3d4   :  { %v4272_v36 = vmax.f32 %v845_v31, %v1253_v63  ;;  %v1250_v63 = vmax.f32 %v1155_v56, %v1213_v43  ;;  %v5144_v31 = vld [vmem:[#allocation22_spill] sm:$0xff] }
 0x3d5   :  { %v1238_v40 = vpop.f32.mrf.mxu2  ;;  %v792_v11 = vadd.f32 %v5144_v31, %v5143_v7  ;;  %v847_v54 = vmax.f32 %v843_v58, -1e+30 }
 0x3d6   :  { %v1239_v52 = vadd.f32 %v1238_v40, %v1122_v37  ;;  %1266 = vrot.lane.b32.xlu2 %v4272_v36, %s3620_s30  ;;  %v846_v37 = vmax.f32 %v842_v44, -1e+30 }
 0x3d7   :  { %v832_v44 = vmax.f32 %v734_v33, %v792_v11  ;;  %v407_v33 = vand.u32 2147483648, %v5146_v1 }
 0x3d8   :  { %v1249_v4 = vmax.f32 %v1181_v47, %v1239_v52  ;;  %v1146_v47 = vadd.f32 %v4245_v10, %v4231_v18  ;;  %v412_v52 = vsub.f32 1.0, %v411_v34  ;;  %v421_v10 = vand.u32 2147483648, %v5134_v42  ;;  %v1358_v34 = vld [vmem:[%s3153_s14] sm:$0x3] }
 0x3d9   :  { %v840_v55 = vmax.f32 %v832_v44, %v833_v12  ;;  %v84_v42 = vstv %s3156_s4  ;;  %v408_v31 = vor.u32 1.1754944e-38, %v407_v33  ;;  %s3629_s4 = smov 8  }
 0x3da   :  { %v1254_v48 = vmax.f32 %v1248_v0, %v1249_v4  ;;  %v1244_v49 = vmax.f32 %v1146_v47, %v1204_v50  ;;  %v422_v3 = vor.u32 1.1754944e-38, %v421_v10  ;;  %v5145_v0 = vld [vmem:[#allocation27_spill] sm:$0xff]  ;;  %85 = vst [vmem:[#allocation2] sm:$0x1] %v84_v42  ;;  %s3148_s7 = sld [smem:[%s5073_s0 + %s3629_s4]]  }
 0x3db   :  { %v844_v62 = vmax.f32 %v840_v55, -1e+30  ;;  %3519 = vrcp.f32 %v5145_v0  ;;  %vm387_vm12 = vweird.f32 %v5145_v0  ;;  %s4865_s4 = sld [smem:[%s5073_s0 + %s3635_s1]]   ;;  %s3651_s1 = smov 36  }
 0x3dc   :  { %v4286_v57 = vmax.f32 %v846_v37, %v1254_v48  ;;  %3521 = vrcp.f32 %v5146_v1  ;;  %v5147_v37 = vld [vmem:[#allocation23_spill] sm:$0xff] }
 0x3dd   :  { %v1241_v35 = vpop.f32.mrf.mxu2  ;;  %3523 = vrcp.f32 %v5147_v37  ;;  %v379_v47 = vand.u32 2147483648, %v5147_v37  ;;  %vm373_vm5 = vweird.f32 %v5147_v37 }
 0x3de   :  { %v1242_v61 = vadd.f32 %v1241_v35, %v4247_v24  ;;  %1268 = vrot.lane.b32.xlu2 %v4286_v57, %s3620_s30  ;;  %v1175_v24 = vadd.f32 %v4249_v26, %v4233_v20  ;;  %v413_v20 = vmul.f32 %v3518_v60, %v412_v52 }
 0x3df   :  { %v380_v50 = vor.u32 1.1754944e-38, %v379_v47  ;;  %v3556_v47 = vld [vmem:[%s3670_s13 + $0x98] sm:$0xff] }
 0x3e0   :  { %v1251_v16 = vmax.f32 %v1184_v38, %v1242_v61  ;;  %v1245_v46 = vmax.f32 %v1175_v24, %v1233_v5  ;;  %v414_v18 = vadd.f32 %v3518_v60, %v413_v20  ;;  %v391_v38 = vand.u32 2147483647, %v5145_v0  ;;  %v3502_v20 = vld [vmem:[%s4325_s8] ss:$0 sm:$0xff]  ;;  %s3638_s8 = smov 9  }
 0x3e1   :  { %v3520_v4 = vpop.eup %3519  ;;  %s3149_s11 = sld [smem:[%s5073_s0 + %s3638_s8]]   ;;  %s3654_s8 = smov 38  }
 0x3e2   :  { %v1255_v40 = vmax.f32 %v1250_v63, %v1251_v16  ;;  %v1252_v39 = vmax.f32 %v1244_v49, %v1245_v46  ;;  %v418_v28 = vsel %vm417_vm9, %v3518_v60, %v414_v18  ;;  %v383_v14 = vmul.f32 %v3520_v4, %v5145_v0  ;;  %v3522_v48 = vpop.eup %3521 }
 0x3e3   :  { %v423_v41 = vsel %vm420_vm10, %v422_v3, %v418_v28  ;;  %v397_v9 = vmul.f32 %v3522_v48, %v5146_v1  ;;  %vm388_vm11 = vweird.f32 %v3520_v4  ;;  %v3524_v35 = vpop.eup %3523  ;;  %v393_v60 = vand.u32 2147483648, %v5145_v0 }
 0x3e4   :  { %v1259_v32 = vmax.f32 %v847_v54, %v1255_v40  ;;  %v4311_v26 = vmax.f32 %v844_v62, %v1252_v39  ;;  %v384_v25 = vsub.f32 1.0, %v383_v14  ;;  %vm389_vm13 = vmor %vm387_vm12, %vm388_vm11  ;;  %v369_v43 = vmul.f32 %v3524_v35, %v5147_v37  ;;  %v3501_v54 = vld [vmem:[#allocation2] ss:$0 sm:$0xff] }
 0x3e5   :  { %v398_v59 = vsub.f32 1.0, %v397_v9  ;;  %v394_v22 = vor.u32 1.1754944e-38, %v393_v60  ;;  %vm392_vm14 = vcmp.eq.f32.partialorder %v391_v38, 8.507059e+37  ;;  %vm402_vm15 = vweird.f32 %v3522_v48  ;;  %v4385_v60 = vld [vmem:[%s3767_s21 + $0xd0] sm:$0xff] }
 0x3e6   :  { %1270 = vrot.lane.b32.xlu2 %v1259_v32, %s3620_s30  ;;  %v385_v17 = vmul.f32 %v3520_v4, %v384_v25  ;;  %v370_v45 = vsub.f32 1.0, %v369_v43  ;;  %v405_v63 = vand.u32 2147483647, %v5146_v1  ;;  %vm403_vm1 = vmor %vm401_vm0, %vm402_vm15  ;;  %vm374_vm4 = vweird.f32 %v3524_v35  ;;  %v1334_v25 = vld [vmem:[%s4363_s18] sm:$0x3]  ;;  %v4389_v38 = vld [vmem:[%s3767_s21 + $0x90] sm:$0xff] }
 0x3e7   :  { %v399_v61 = vmul.f32 %v3522_v48, %v398_v59  ;;  %v377_v40 = vand.u32 2147483647, %v5147_v37  ;;  %vm375_vm6 = vmor %vm373_vm5, %vm374_vm4  ;;  %vm1369_vm9 = vcmask 15360   ;;  %v1366_v59 = vld [vmem:[%s4370_s23 + $0x8] sm:$0xff]  ;;  %v1367_v43 = vld [vmem:[%s4370_s23 + $0x10] sm:$0xff] }
 0x3e8   :  { %v371_v16 = vmul.f32 %v3524_v35, %v370_v45  ;;  %vm406_vm3 = vcmp.eq.f32.partialorder %v405_v63, 8.507059e+37 }
 0x3e9   :  { %v400_v19 = vadd.f32 %v3522_v48, %v399_v61  ;;  %vm378_vm7 = vcmp.eq.f32.partialorder %v377_v40, 8.507059e+37  ;;  %v4398_v61 = vld [vmem:[%s3767_s21 + $0x10] sm:$0xff]  ;;  %v3557_v40 = vld [vmem:[%s3670_s13 + $0x58] sm:$0xff] }
 0x3ea   :  { %v372_v12 = vadd.f32 %v3524_v35, %v371_v16 }
 0x3eb   :  { %v404_v5 = vsel %vm403_vm1, %v3522_v48, %v400_v19 }
 0x3ec   :  { %v409_v24 = vsel %vm406_vm3, %v408_v31, %v404_v5  ;;  %v376_v44 = vsel %vm375_vm6, %v3524_v35, %v372_v12  ;;  %v3550_v35 = vld [vmem:[%s3670_s13 + $0x10] sm:$0xff]  ;;  %v3555_v12 = vld [vmem:[%s3670_s13 + $0xd8] sm:$0xff] }
 0x3ed   :  { %v381_v46 = vsel %vm378_vm7, %v380_v50, %v376_v44 }
 0x3ee   :  { %1264 = vrot.lane.b32.xlu2 %v4311_v26, %s3620_s30 }
 0x3f6   :  { %1317 = vperm.xlu2 %3498, %v423_v41  }
 0x430   :  { %v1267_v15 = vpop.permute.xlu2 %1266 }
 0x431   :  { %v4330_v29 = vmax.f32 %v4272_v36, %v1267_v15  ;;  %v386_v36 = vadd.f32 %v3520_v4, %v385_v17  ;;  %v1365_v17 = vld [vmem:[%s4370_s23] sm:$0xff] }
 0x433   :  { %1286 = vrot.lane.b32.xlu2 %v4330_v29, %s3623_s9  ;;  %v390_v58 = vsel %vm389_vm13, %v3520_v4, %v386_v36  ;;  %v3549_v36 = vld [vmem:[%s3670_s13 + $0x50] sm:$0xff] }
 0x434   :  { %v395_v2 = vsel %vm392_vm14, %v394_v22, %v390_v58  ;;  %v4394_v58 = vld [vmem:[%s3767_s21 + $0x50] sm:$0xff] }
 0x438   :  { %v1269_v51 = vpop.permute.xlu2 %1268 }
 0x439   :  { %v4337_v56 = vmax.f32 %v4286_v57, %v1269_v51  ;;  %v3547_v51 = vld [vmem:[%s3670_s13 + $0xd0] sm:$0xff] }
 0x43b   :  { %1288 = vrot.lane.b32.xlu1 %v4337_v56, %s3623_s9 }
 0x440   :  { %v1271_v57 = vpop.permute.xlu2 %1270 }
 0x441   :  { %v1279_v23 = vmax.f32 %v1259_v32, %v1271_v57  ;;  %v1368_v57 = vld [vmem:[%s4370_s23 + $0x18] sm:$0xff] }
 0x443   :  { %1307 = vperm.xlu1 %3500, %v395_v2   ;;  %1290 = vrot.lane.b32.xlu0 %v1279_v23, %s3623_s9 }
 0x448   :  { %v1265_v7 = vpop.permute.xlu2 %1264 }
 0x449   :  { %v1276_v11 = vmax.f32 %v4311_v26, %v1265_v7 }
 0x44b   :  { %1312 = vperm.xlu0 %3499, %v409_v24   ;;  %1284 = vrot.lane.b32.xlu2 %v1276_v11, %s3623_s9 }
 0x44c   :  { %1361 = vperm.xlu1 %3500, %v1358_v34  }
 0x450   :  { %v1318_v32 = vpop.permute.xlu2 %1317 }
 0x453   :  { %1542 = vperm.xlu0 %3499, %v3501_v54   ;;  %1302 = vperm.xlu2 %3498, %v381_v46   ;;  %v3558_v54 = vld [vmem:[%s3670_s13 + $0x18] sm:$0xff] }
 0x48d   :  { %v1287_v52 = vpop.permute.xlu2 %1286 }
 0x48e   :  { %v1297_v21 = vmax.f32 %v4330_v29, %v1287_v52 }
 0x4a5   :  { %v1285_v49 = vpop.permute.xlu2 %1284 }
 0x4a6   :  { %v1296_v0 = vmax.f32 %v1276_v11, %v1285_v49 }
 0x4ad   :  { %v1289_v55 = vpop.permute.xlu1 %1288  ;;  %v1303_v3 = vpop.permute.xlu2 %1302 }
 0x4ae   :  { %v1298_v28 = vmax.f32 %v4337_v56, %v1289_v55  ;;  %v1320_v1 = vmul.f32 %v1303_v3, %v1296_v0  ;;  %v3548_v56 = vld [vmem:[%s3670_s13 + $0x90] sm:$0xff] }
 0x4b0   :  { %v1328_v29 = vadd.f32 %v3502_v20, %v1320_v1 }
 0x4b5   :  { %v1291_v39 = vpop.permute.xlu0 %1290  ;;  %v1308_v10 = vpop.permute.xlu1 %1307 }
 0x4b6   :  { %v1299_v62 = vmax.f32 %v1279_v23, %v1291_v39  ;;  %v1321_v42 = vmul.f32 %v1308_v10, %v1297_v21 }
 0x4b8   :  { %v1323_v26 = vmul.f32 %v1318_v32, %v1299_v62  ;;  %v1329_v15 = vadd.f32 %v3502_v20, %v1321_v42 }
 0x4ba   :  { %v1331_v18 = vadd.f32 %v3502_v20, %v1323_v26  ;;  %v4442_v26 = vld [vmem:[%s4420_s27] ss:$0 sm:$0xff]  ;;  %s3642_s27 = smov 27  }
 0x4bb   :  { %s4977_s2 = sld [smem:[%s5073_s0 + %s3642_s27]]  }
 0x4bc   :  { %1350 = vmatpush.msra.mxu3 %v1331_v18 }
 0x4bd   :  { %v1313_v41 = vpop.permute.xlu0 %1312 }
 0x4be   :  { %v1322_v4 = vmul.f32 %v1313_v41, %v1298_v28  ;;  %v4372_v48 = vpop.permute.xlu1 %1361  ;;  %v4445_v28 = vld [vmem:[%s4425_s3] ss:$0 sm:$0xff]  ;;  %s3643_s3 = smov 28  }
 0x4bf   :  { %5148 = vst [vmem:[#allocation6_spill] sm:$0xff] %v4372_v48 }
 0x4c0   :  { %v1330_v14 = vadd.f32 %v3502_v20, %v1322_v4 }
 0x4c2   :  { %1351 = vmatpush.msra.mxu3 %v1330_v14 }
 0x4c4   :  { %1352 = vmatpush.msra.mxu3 %v1329_v15 }
 0x4c6   :  { %1353 = vmatpush.msra.mxu3 %v1328_v29 }
 0x4c7   :  { %3290 = vmatmul.msk.f32.vlgmr.msra.gmra.mxu3 %vm226_vm2, %v1334_v25 }
 0x54a   :  { %v1355_v37 = vpop.f32.mrf.mxu3 }
 0x54b   :  { %v1364_v9 = vmul.f32 %v4372_v48, %v1355_v37 }
 0x54d   :  { %3291 = vmatpush.msk.msrb.mxu3 %vm1382_vm8, %v1364_v9 }
 0x54e   :  { %3292 = vmatmul.msk.f32.vlgmr.msrb.gmra.mxu3 %vm1369_vm9, %v1365_v17 }
 0x54f   :  { %1639 = vmatpush.msra.mxu3 %v3547_v51 }
 0x551   :  { %1640 = vmatpush.msra.mxu3 %v3548_v56 }
 0x553   :  { %1641 = vmatpush.msra.mxu3 %v3549_v36 }
 0x555   :  { %1642 = vmatpush.msra.mxu3 %v3550_v35 }
 0x556   :  { %3293 = vmatmul.msk.f32.gmra.mxu3 %vm1369_vm9, %v1366_v59 }
 0x557   :  { %1783 = vmatpush.msrb.mxu3 %v4385_v60 }
 0x559   :  { %1784 = vmatpush.msrb.mxu3 %v4389_v38 }
 0x55b   :  { %1785 = vmatpush.msrb.mxu3 %v4394_v58 }
 0x55d   :  { %1786 = vmatpush.msrb.mxu3 %v4398_v61 }
 0x55e   :  { %3294 = vmatmul.msk.f32.gmra.mxu3 %vm1369_vm9, %v1367_v43 }
 0x566   :  { %3295 = vmatmul.msk.f32.gmra.mxu3 %vm1369_vm9, %v1368_v57 }
 0x5d1   :  { %v1403_v22 = vpop.f32.mrf.mxu3 }
 0x5d2   :  { %v1415_v16 = vsub.f32 %v1328_v29, %v1403_v22 }
 0x5d4   :  { %v1419_v11 = vmul.f32 %v1415_v16, %v1415_v16 }
 0x5d9   :  { %v1406_v23 = vpop.f32.mrf.mxu3 }
 0x5da   :  { %v4408_v63 = vsub.f32 %v1329_v15, %v1406_v23  ;;  %v1543_v15 = vpop.permute.xlu0 %1542 }
 0x5dc   :  { %v1420_v31 = vmul.f32 %v4408_v63, %v4408_v63 }
 0x5e1   :  { %v1409_v2 = vpop.f32.mrf.mxu3 }
 0x5e2   :  { %v4404_v19 = vsub.f32 %v1330_v14, %v1409_v2 }
 0x5e4   :  { %v1421_v7 = vmul.f32 %v4404_v19, %v4404_v19 }
 0x5e9   :  { %v1412_v45 = vpop.f32.mrf.mxu3 }
 0x5ea   :  { %v4406_v33 = vsub.f32 %v1331_v18, %v1412_v45 }
 0x5ec   :  { %v1422_v5 = vmul.f32 %v4406_v33, %v4406_v33 }
 0x5ee   :  { %1435 = vmatpush.msrb.mxu1 %v1422_v5 }
 0x5f0   :  { %1436 = vmatpush.msrb.mxu1 %v1421_v7 }
 0x5f2   :  { %1437 = vmatpush.msrb.mxu1 %v1420_v31 }
 0x5f4   :  { %1438 = vmatpush.msrb.mxu1 %v1419_v11 }
 0x5f5   :  { %3296 = vmatmul.msk.f32.vlgmr.msrb.gmra.mxu1 %vm226_vm2, %v1334_v25 }
 0x672   :  { %v1440_v34 = vpop.f32.mrf.mxu1 }
 0x673   :  { %v1443_v24 = vmul.f32 %v1440_v34, %v4372_v48 }
 0x675   :  { %3297 = vmatpush.msk.msra.mxu1 %vm1382_vm8, %v1443_v24 }
 0x676   :  { %3298 = vmatmul.msk.f32.vlgmr.msra.gmra.mxu1 %vm1369_vm9, %v1365_v17 }
 0x677   :  { %1668 = vmatpush.msrb.mxu1 %v3555_v12 }
 0x679   :  { %1669 = vmatpush.msrb.mxu1 %v3556_v47 }
 0x67b   :  { %1670 = vmatpush.msrb.mxu1 %v3557_v40 }
 0x67d   :  { %1671 = vmatpush.msrb.mxu1 %v3558_v54 }
 0x67e   :  { %3299 = vmatmul.msk.f32.gmra.mxu1 %vm1369_vm9, %v1366_v59 }
 0x67f   :  { %1812 = vmatpush.msra.mxu1 %v4026_v6 }
 0x681   :  { %1813 = vmatpush.msra.mxu1 %v4036_v8 }
 0x683   :  { %1814 = vmatpush.msra.mxu1 %v4048_v13 }
 0x685   :  { %1815 = vmatpush.msra.mxu1 %v4060_v30 }
 0x686   :  { %3300 = vmatmul.msk.f32.gmra.mxu1 %vm1369_vm9, %v1367_v43 }
 0x68e   :  { %3301 = vmatmul.msk.f32.gmra.mxu1 %vm1369_vm9, %v1368_v57 }
 0x6f3   :  { %v1464_v44 = vpop.f32.mrf.mxu1 }
 0x6f4   :  { %v1465_v50 = vadd.f32 1e-05, %v1464_v44 }
 0x6f6   :  { %3525 = vrsqrt.f32 %v1465_v50  ;;  %vm1482_vm11 = vweird.f32 %v1465_v50 }
 0x6fb   :  { %v1467_v46 = vpop.f32.mrf.mxu1 }
 0x6fc   :  { %v3526_v32 = vpop.eup %3525  ;;  %v1468_v52 = vadd.f32 1e-05, %v1467_v46 }
 0x6fd   :  { %v1477_v55 = vmul.f32 %v3526_v32, %v1465_v50  ;;  %vm1483_vm10 = vweird.f32 %v3526_v32 }
 0x6fe   :  { %3527 = vrsqrt.f32 %v1468_v52  ;;  %vm1484_vm12 = vmor %vm1482_vm11, %vm1483_vm10  ;;  %vm1492_vm14 = vweird.f32 %v1468_v52 }
 0x6ff   :  { %v1478_v6 = vmul.f32 %v3526_v32, %v1477_v55  ;;  %v4531_v55 = vld [vmem:[%s3148_s7 + $0x18] sm:$0xff] }
 0x701   :  { %v1479_v8 = vmul.f32 0.5, %v1478_v6 }
 0x703   :  { %v1480_v49 = vsub.f32 1.5, %v1479_v8  ;;  %v1470_v13 = vpop.f32.mrf.mxu1 }
 0x704   :  { %v3528_v30 = vpop.eup %3527  ;;  %v1471_v39 = vadd.f32 1e-05, %v1470_v13 }
 0x705   :  { %v1481_v62 = vmul.f32 %v3526_v32, %v1480_v49  ;;  %v1487_v20 = vmul.f32 %v3528_v30, %v1468_v52  ;;  %vm1493_vm13 = vweird.f32 %v3528_v30  ;;  %v4521_v52 = vld [vmem:[%s3148_s7 + $0x10] sm:$0xff] }
 0x706   :  { %3529 = vrsqrt.f32 %v1471_v39  ;;  %vm1494_vm0 = vmor %vm1492_vm14, %vm1493_vm13  ;;  %vm1502_vm3 = vweird.f32 %v1471_v39 }
 0x707   :  { %v1485_v18 = vsel %vm1484_vm12, %v3526_v32, %v1481_v62  ;;  %v1488_v10 = vmul.f32 %v3528_v30, %v1487_v20  ;;  %v4511_v32 = vld [vmem:[%s3148_s7 + $0x8] sm:$0xff] }
 0x708   :  { %v1516_v21 = vmul.f32 %v1485_v18, %v1415_v16 }
 0x709   :  { %v1489_v3 = vmul.f32 0.5, %v1488_v10 }
 0x70a   :  { %v1523_v41 = vmul.f32 %v4442_v26, %v1516_v21 }
 0x70b   :  { %v1490_v0 = vsub.f32 1.5, %v1489_v3  ;;  %v1473_v42 = vpop.f32.mrf.mxu1  ;;  %v3559_v3 = vld [vmem:[%s3767_s21 + $0xc0] sm:$0xff] }
 0x70c   :  { %v3530_v4 = vpop.eup %3529  ;;  %v1530_v1 = vadd.f32 %v4445_v28, %v1523_v41  ;;  %v1474_v14 = vadd.f32 1e-05, %v1473_v42  ;;  %v3560_v42 = vld [vmem:[%s3767_s21 + $0xd8] sm:$0xff] }
 0x70d   :  { %v1491_v29 = vmul.f32 %v3528_v30, %v1490_v0  ;;  %v1497_v25 = vmul.f32 %v3530_v4, %v1471_v39  ;;  %vm1503_vm1 = vweird.f32 %v3530_v4 }
 0x70e   :  { %vm1535_vm15 = vcmp.gt.f32.partialorder %v1530_v1, 0.0  ;;  %v1545_v37 = vmul.f32 %v1543_v15, %v1530_v1  ;;  %3531 = vrsqrt.f32 %v1474_v14  ;;  %vm1504_vm5 = vmor %vm1502_vm3, %vm1503_vm1  ;;  %vm1512_vm7 = vweird.f32 %v1474_v14 }
 0x70f   :  { %v1495_v9 = vsel %vm1494_vm0, %v3528_v30, %v1491_v29  ;;  %v1498_v17 = vmul.f32 %v3530_v4, %v1497_v25  ;;  %v3563_v25 = vld [vmem:[%s3767_s21 + $0x40] sm:$0xff] }
 0x710   :  { %v4449_v51 = vsel %vm1535_vm15, %v1530_v1, %v1545_v37  ;;  %v1517_v56 = vmul.f32 %v1495_v9, %v4408_v63  ;;  %v3561_v1 = vld [vmem:[%s3767_s21 + $0x80] sm:$0xff]  ;;  %v3564_v9 = vld [vmem:[%s3767_s21 + $0x58] sm:$0xff] }
 0x711   :  { %v1499_v59 = vmul.f32 0.5, %v1498_v17  ;;  %3302 = vmatmul.msk.f32.vlgmr.msra.gmra.mxu0 %vm226_vm2, %v4449_v51  ;;  %3306 = vmatmul.msk.f32.vlgmr.msrb.gmra.mxu2 %vm226_vm2, %v4449_v51 }
 0x712   :  { %v1524_v36 = vmul.f32 %v4442_v26, %v1517_v56  ;;  %3310 = vmatmul.msk.f32.vlgmr.msra.gmra.mxu3 %vm226_vm2, %v4449_v51  ;;  %3314 = vmatmul.msk.f32.vlgmr.msrb.gmra.mxu1 %vm226_vm2, %v4449_v51 }
 0x713   :  { %v1500_v35 = vsub.f32 1.5, %v1499_v59  ;;  %v3565_v59 = vld [vmem:[%s3767_s21] sm:$0xff] }
 0x714   :  { %v3532_v43 = vpop.eup %3531  ;;  %v1531_v57 = vadd.f32 %v4445_v28, %v1524_v36 }
 0x715   :  { %v1501_v22 = vmul.f32 %v3530_v4, %v1500_v35  ;;  %v1507_v23 = vmul.f32 %v3532_v43, %v1474_v14  ;;  %vm1513_vm6 = vweird.f32 %v3532_v43  ;;  %v3566_v35 = vld [vmem:[%s3767_s21 + $0xc8] sm:$0xff] }
 0x716   :  { %vm1536_vm4 = vcmp.gt.f32.partialorder %v1531_v57, 0.0  ;;  %v1546_v2 = vmul.f32 %v1543_v15, %v1531_v57  ;;  %vm1514_vm11 = vmor %vm1512_vm7, %vm1513_vm6 }
 0x717   :  { %v1505_v45 = vsel %vm1504_vm5, %v3530_v4, %v1501_v22  ;;  %v1508_v63 = vmul.f32 %v3532_v43, %v1507_v23  ;;  %v3567_v22 = vld [vmem:[%s3767_s21 + $0x18] sm:$0xff] }
 0x718   :  { %v4462_v5 = vsel %vm1536_vm4, %v1531_v57, %v1546_v2  ;;  %v1518_v16 = vmul.f32 %v1505_v45, %v4404_v19  ;;  %v3568_v45 = vld [vmem:[%s3767_s21 + $0x88] sm:$0xff] }
 0x719   :  { %v1509_v7 = vmul.f32 0.5, %v1508_v63  ;;  %3303 = vmatmul.msk.f32.gmra.mxu0 %vm226_vm2, %v4462_v5  ;;  %3307 = vmatmul.msk.f32.gmra.mxu2 %vm226_vm2, %v4462_v5 }
 0x71a   :  { %v1525_v31 = vmul.f32 %v4442_v26, %v1518_v16  ;;  %3311 = vmatmul.msk.f32.gmra.mxu3 %vm226_vm2, %v4462_v5  ;;  %3315 = vmatmul.msk.f32.gmra.mxu1 %vm226_vm2, %v4462_v5 }
 0x71b   :  { %v1510_v11 = vsub.f32 1.5, %v1509_v7  ;;  %v4554_v7 = vld [vmem:[%s3871_s29] sm:$0xff] }
 0x71c   :  { %v1532_v34 = vadd.f32 %v4445_v28, %v1525_v31 }
 0x71d   :  { %v1511_v19 = vmul.f32 %v3532_v43, %v1510_v11 }
 0x71e   :  { %vm1537_vm10 = vcmp.gt.f32.partialorder %v1532_v34, 0.0  ;;  %v1547_v24 = vmul.f32 %v1543_v15, %v1532_v34 }
 0x71f   :  { %v1515_v12 = vsel %vm1514_vm11, %v3532_v43, %v1511_v19  ;;  %v3573_v19 = vld [vmem:[%s3767_s21 + $0x8] sm:$0xff] }
 0x720   :  { %v4475_v47 = vsel %vm1537_vm10, %v1532_v34, %v1547_v24  ;;  %v1519_v40 = vmul.f32 %v1515_v12, %v4406_v33  ;;  %v4501_v33 = vld [vmem:[%s3148_s7] sm:$0xff] }
 0x721   :  { %3304 = vmatmul.msk.f32.gmra.mxu0 %vm226_vm2, %v4475_v47  ;;  %3308 = vmatmul.msk.f32.gmra.mxu2 %vm226_vm2, %v4475_v47  ;;  %v3571_v34 = vld [vmem:[%s3670_s13 + $0xe0] sm:$0xff] }
 0x722   :  { %v1526_v54 = vmul.f32 %v4442_v26, %v1519_v40  ;;  %3312 = vmatmul.msk.f32.gmra.mxu3 %vm226_vm2, %v4475_v47  ;;  %3316 = vmatmul.msk.f32.gmra.mxu1 %vm226_vm2, %v4475_v47  ;;  %v3574_v40 = vld [vmem:[%s3670_s13 + $0xa0] sm:$0xff] }
 0x724   :  { %v1533_v44 = vadd.f32 %v4445_v28, %v1526_v54  ;;  %v3577_v54 = vld [vmem:[%s3670_s13 + $0x78] sm:$0xff] }
 0x726   :  { %vm1538_vm12 = vcmp.gt.f32.partialorder %v1533_v44, 0.0  ;;  %v1548_v50 = vmul.f32 %v1543_v15, %v1533_v44  ;;  %v3562_v15 = vld [vmem:[%s3767_s21 + $0x98] sm:$0xff] }
 0x728   :  { %v4488_v46 = vsel %vm1538_vm12, %v1533_v44, %v1548_v50  ;;  %v4575_v44 = vld [vmem:[%s3871_s29 + $0x8] sm:$0xff]  ;;  %v3579_v50 = vld [vmem:[%s3670_s13 + $0x20] sm:$0xff] }
 0x729   :  { %3305 = vmatmul.msk.f32.gmra.mxu0 %vm226_vm2, %v4488_v46  ;;  %3309 = vmatmul.msk.f32.gmra.mxu2 %vm226_vm2, %v4488_v46 }
 0x72a   :  { %3313 = vmatmul.msk.f32.gmra.mxu3 %vm226_vm2, %v4488_v46  ;;  %3317 = vmatmul.msk.f32.gmra.mxu1 %vm226_vm2, %v4488_v46 }
 0x731   :  { %3318 = vmatmul.msk.f32.vlgmr.msrb.gmra.mxu0 %vm226_vm2, %v4501_v33  ;;  %3322 = vmatmul.msk.f32.vlgmr.msra.gmra.mxu2 %vm226_vm2, %v4501_v33 }
 0x732   :  { %3330 = vmatmul.msk.f32.vlgmr.msra.gmra.mxu1 %vm226_vm2, %v4501_v33  ;;  %3326 = vmatmul.msk.f32.vlgmr.msrb.gmra.mxu3 %vm226_vm2, %v4501_v33 }
 0x739   :  { %3319 = vmatmul.msk.f32.gmra.mxu0 %vm226_vm2, %v4511_v32  ;;  %3323 = vmatmul.msk.f32.gmra.mxu2 %vm226_vm2, %v4511_v32 }
 0x73a   :  { %3331 = vmatmul.msk.f32.gmra.mxu1 %vm226_vm2, %v4511_v32  ;;  %3327 = vmatmul.msk.f32.gmra.mxu3 %vm226_vm2, %v4511_v32 }
 0x741   :  { %3320 = vmatmul.msk.f32.gmra.mxu0 %vm226_vm2, %v4521_v52  ;;  %3324 = vmatmul.msk.f32.gmra.mxu2 %vm226_vm2, %v4521_v52 }
 0x742   :  { %3332 = vmatmul.msk.f32.gmra.mxu1 %vm226_vm2, %v4521_v52  ;;  %3328 = vmatmul.msk.f32.gmra.mxu3 %vm226_vm2, %v4521_v52 }
 0x749   :  { %3321 = vmatmul.msk.f32.gmra.mxu0 %vm226_vm2, %v4531_v55  ;;  %3325 = vmatmul.msk.f32.gmra.mxu2 %vm226_vm2, %v4531_v55 }
 0x74a   :  { %3333 = vmatmul.msk.f32.gmra.mxu1 %vm226_vm2, %v4531_v55  ;;  %3329 = vmatmul.msk.f32.gmra.mxu3 %vm226_vm2, %v4531_v55 }
 0x78e   :  { %v1586_v6 = vpop.f32.mrf.mxu0 }
 0x78f   :  { %v1673_v8 = vpop.f32.mrf.mxu1  ;;  %v1685_v36 = vmul.f32 %v3565_v59, %v1586_v6  ;;  %v3580_v6 = vld [vmem:[%s3670_s13 + $0xe8] sm:$0xff] }
 0x790   :  { %v1688_v23 = vmul.f32 %v3567_v22, %v1673_v8  ;;  %v3581_v8 = vld [vmem:[%s3670_s13 + $0xf0] sm:$0xff] }
 0x794   :  { %v1615_v49 = vpop.f32.mrf.mxu2 }
 0x795   :  { %v1644_v13 = vpop.f32.mrf.mxu3  ;;  %v1686_v24 = vmul.f32 %v3573_v19, %v1615_v49  ;;  %v3582_v49 = vld [vmem:[%s3670_s13 + $0x38] sm:$0xff] }
 0x796   :  { %v1589_v30 = vpop.f32.mrf.mxu0  ;;  %v1687_v12 = vmul.f32 %v4398_v61, %v1644_v13  ;;  %v3576_v61 = vld [vmem:[%s3670_s13 + $0x60] sm:$0xff]  ;;  %v3583_v13 = vld [vmem:[%s3670_s13 + $0xa8] sm:$0xff] }
 0x797   :  { %v1676_v39 = vpop.f32.mrf.mxu1  ;;  %v1689_v37 = vmul.f32 %v3563_v25, %v1589_v30  ;;  %v4587_v30 = vld [vmem:[%s3767_s21 + $0xe0] sm:$0xff]  ;;  %v4660_v25 = vld [vmem:[%s3871_s29 + $0x18] sm:$0xff] }
 0x798   :  { %v1692_v17 = vmul.f32 %v3564_v9, %v1676_v39  ;;  %v3585_v39 = vld [vmem:[%s3670_s13 + $0xb0] sm:$0xff] }
 0x799   :  { %v4671_v9 = vld [vmem:[%s3767_s21 + $0x30] sm:$0xff] }
 0x79c   :  { %v1618_v62 = vpop.f32.mrf.mxu2 }
 0x79d   :  { %v1647_v20 = vpop.f32.mrf.mxu3 }
 0x79e   :  { %v1592_v26 = vpop.f32.mrf.mxu0  ;;  %v1691_v11 = vmul.f32 %v4394_v58, %v1647_v20  ;;  %v3575_v58 = vld [vmem:[%s3670_s13 + $0xb8] sm:$0xff]  ;;  %v4594_v20 = vld [vmem:[%s3767_s21 + $0xa0] sm:$0xff] }
 0x79f   :  { %v1679_v18 = vpop.f32.mrf.mxu1  ;;  %v1693_v14 = vmul.f32 %v3561_v1, %v1592_v26  ;;  %v3588_v26 = vld [vmem:[%s3670_s13 + $0x70] sm:$0xff]  ;;  %v4640_v1 = vld [vmem:[%s3767_s21 + $0x38] sm:$0xff] }
 0x7a0   :  { %v1696_v29 = vmul.f32 %v3562_v15, %v1679_v18  ;;  %v4604_v18 = vld [vmem:[%s3871_s29 + $0x10] sm:$0xff]  ;;  %v4652_v15 = vld [vmem:[%s3767_s21 + $0x68] sm:$0xff]  ;;  %s4918_s29 = sld [smem:[%s5073_s0 + %s3637_s6]]   ;;  %s3653_s6 = smov 34  }
 0x7a4   :  { %v1621_v10 = vpop.f32.mrf.mxu2 }
 0x7a5   :  { %v1650_v21 = vpop.f32.mrf.mxu3  ;;  %v1694_v63 = vmul.f32 %v3568_v45, %v1621_v10  ;;  %v3591_v10 = vld [vmem:[%s3670_s13 + $0x30] sm:$0xff] }
 0x7a6   :  { %v1595_v28 = vpop.f32.mrf.mxu0  ;;  %v1695_v16 = vmul.f32 %v4389_v38, %v1650_v21  ;;  %v3572_v38 = vld [vmem:[%s3670_s13 + $0xf8] sm:$0xff] }
 0x7a7   :  { %v1697_v41 = vmul.f32 %v3559_v3, %v1595_v28  ;;  %v1682_v0 = vpop.f32.mrf.mxu1  ;;  %v4612_v21 = vld [vmem:[%s3767_s21 + $0xb8] sm:$0xff]  ;;  %v4616_v28 = vld [vmem:[%s3767_s21 + $0x60] sm:$0xff]  ;;  %v4620_v3 = vld [vmem:[%s3767_s21 + $0xe8] sm:$0xff] }
 0x7a8   :  { %v1700_v4 = vmul.f32 %v3560_v42, %v1682_v0  ;;  %v4628_v0 = vld [vmem:[%s3767_s21 + $0xf0] sm:$0xff]  ;;  %v4632_v42 = vld [vmem:[%s3767_s21 + $0x20] sm:$0xff] }
 0x7a9   :  { %1853 = vmatpush.msra.mxu0 %v1697_v41  ;;  %v4624_v41 = vld [vmem:[%s3767_s21 + $0x78] sm:$0xff] }
 0x7aa   :  { %1940 = vmatpush.msrb.mxu1 %v1700_v4  ;;  %v4636_v4 = vld [vmem:[%s3767_s21 + $0xa8] sm:$0xff] }
 0x7ab   :  { %1854 = vmatpush.msra.mxu0 %v1693_v14  ;;  %v4644_v14 = vld [vmem:[%s3767_s21 + $0xb0] sm:$0xff] }
 0x7ac   :  { %1941 = vmatpush.msrb.mxu1 %v1696_v29  ;;  %v1624_v56 = vpop.f32.mrf.mxu2  ;;  %v4656_v29 = vld [vmem:[%s3767_s21 + $0x70] sm:$0xff] }
 0x7ad   :  { %v1698_v43 = vmul.f32 %v3566_v35, %v1624_v56  ;;  %v1653_v57 = vpop.f32.mrf.mxu3  ;;  %1855 = vmatpush.msra.mxu0 %v1689_v37  ;;  %v4667_v37 = vld [vmem:[%s3767_s21 + $0x28] sm:$0xff] }
 0x7ae   :  { %v1699_v2 = vmul.f32 %v4385_v60, %v1653_v57  ;;  %1942 = vmatpush.msrb.mxu1 %v1692_v17  ;;  %v3570_v60 = vld [vmem:[%s3767_s21 + $0x48] sm:$0xff]  ;;  %v4730_v17 = vpop.f32.mrf.mxu0 }
 0x7af   :  { %1856 = vmatpush.msra.mxu0 %v1685_v36  ;;  %1882 = vmatpush.msrb.mxu2 %v1698_v43  ;;  %v1690_v31 = vmul.f32 %v3570_v60, %v1618_v62  ;;  %v3586_v62 = vld [vmem:[%s3670_s13 + $0x68] sm:$0xff] }
 0x7b0   :  { %1911 = vmatpush.msra.mxu3 %v1699_v2  ;;  %1943 = vmatpush.msrb.mxu1 %v1688_v23 }
 0x7b1   :  { %3334 = vmatmul.msk.f32.vlgmr.msra.gmra.mxu0 %vm226_vm2, %v4554_v7  ;;  %3346 = vmatmul.msk.f32.vlgmr.msrb.gmra.mxu1 %vm226_vm2, %v4554_v7 }
 0x7b2   :  { %1883 = vmatpush.msrb.mxu2 %v1694_v63  ;;  %1912 = vmatpush.msra.mxu3 %v1695_v16 }
 0x7b3   :  { %1985 = vmatpush.msrb.mxu0 %v3571_v34  ;;  %2072 = vmatpush.msra.mxu1 %v3572_v38 }
 0x7b4   :  { %1884 = vmatpush.msrb.mxu2 %v1690_v31  ;;  %1913 = vmatpush.msra.mxu3 %v1691_v11  ;;  %v1759_v59 = vpop.f32.mrf.mxu2 }
 0x7b5   :  { %1986 = vmatpush.msrb.mxu0 %v3574_v40  ;;  %2073 = vmatpush.msra.mxu1 %v3575_v58  ;;  %v4744_v36 = vpop.f32.mrf.mxu3 }
 0x7b6   :  { %1885 = vmatpush.msrb.mxu2 %v1686_v24  ;;  %1914 = vmatpush.msra.mxu3 %v1687_v12 }
 0x7b7   :  { %3338 = vmatmul.msk.f32.vlgmr.msrb.gmra.mxu2 %vm226_vm2, %v4554_v7  ;;  %3342 = vmatmul.msk.f32.vlgmr.msra.gmra.mxu3 %vm226_vm2, %v4554_v7 }
 0x7b8   :  { %1987 = vmatpush.msrb.mxu0 %v3576_v61  ;;  %2074 = vmatpush.msra.mxu1 %v3577_v54 }
 0x7b9   :  { %3335 = vmatmul.msk.f32.gmra.mxu0 %vm226_vm2, %v4575_v44  ;;  %3347 = vmatmul.msk.f32.gmra.mxu1 %vm226_vm2, %v4575_v44 }
 0x7ba   :  { %1988 = vmatpush.msrb.mxu0 %v3579_v50  ;;  %2014 = vmatpush.msra.mxu2 %v3580_v6 }
 0x7bb   :  { %2043 = vmatpush.msrb.mxu3 %v3581_v8  ;;  %2075 = vmatpush.msra.mxu1 %v3582_v49 }
 0x7bc   :  { %2015 = vmatpush.msra.mxu2 %v3583_v13  ;;  %2117 = vmatpush.msra.mxu0 %v4587_v30 }
 0x7bd   :  { %2044 = vmatpush.msrb.mxu3 %v3585_v39  ;;  %2204 = vmatpush.msrb.mxu1 %v4196_v27  ;;  %v3589_v27 = vld [vmem:[%s3670_s13 + $0x28] sm:$0xff]  ;;  %v1791_v57 = vpop.f32.mrf.mxu3  ;;  %s3630_s13 = smov 18  }
 0x7be   :  { %2016 = vmatpush.msra.mxu2 %v3586_v62  ;;  %2118 = vmatpush.msra.mxu0 %v4594_v20  ;;  %s4765_s10 = sld [smem:[%s5073_s0 + %s3630_s13]]   ;;  %s3646_s13 = smov 29  }
 0x7bf   :  { %3339 = vmatmul.msk.f32.gmra.mxu2 %vm226_vm2, %v4575_v44  ;;  %3343 = vmatmul.msk.f32.gmra.mxu3 %vm226_vm2, %v4575_v44 }
 0x7c0   :  { %2045 = vmatpush.msrb.mxu3 %v3588_v26  ;;  %2017 = vmatpush.msra.mxu2 %v3589_v27 }
 0x7c1   :  { %3336 = vmatmul.msk.f32.gmra.mxu0 %vm226_vm2, %v4604_v18  ;;  %3348 = vmatmul.msk.f32.gmra.mxu1 %vm226_vm2, %v4604_v18 }
 0x7c2   :  { %2046 = vmatpush.msrb.mxu3 %v3591_v10  ;;  %2205 = vmatpush.msrb.mxu1 %v4612_v21 }
 0x7c3   :  { %2119 = vmatpush.msra.mxu0 %v4616_v28  ;;  %2146 = vmatpush.msrb.mxu2 %v4620_v3 }
 0x7c4   :  { %2206 = vmatpush.msrb.mxu1 %v4624_v41  ;;  %2175 = vmatpush.msra.mxu3 %v4628_v0 }
 0x7c5   :  { %2120 = vmatpush.msra.mxu0 %v4632_v42  ;;  %2147 = vmatpush.msrb.mxu2 %v4636_v4  ;;  %v1794_v45 = vpop.f32.mrf.mxu3 }
 0x7c6   :  { %2207 = vmatpush.msrb.mxu1 %v4640_v1  ;;  %2176 = vmatpush.msra.mxu3 %v4644_v14 }
 0x7c7   :  { %3340 = vmatmul.msk.f32.gmra.mxu2 %vm226_vm2, %v4604_v18  ;;  %3344 = vmatmul.msk.f32.gmra.mxu3 %vm226_vm2, %v4604_v18 }
 0x7c8   :  { %2148 = vmatpush.msrb.mxu2 %v4652_v15  ;;  %2177 = vmatpush.msra.mxu3 %v4656_v29 }
 0x7c9   :  { %3337 = vmatmul.msk.f32.gmra.mxu0 %vm226_vm2, %v4660_v25  ;;  %3349 = vmatmul.msk.f32.gmra.mxu1 %vm226_vm2, %v4660_v25 }
 0x7ca   :  { %2149 = vmatpush.msrb.mxu2 %v4667_v37  ;;  %2178 = vmatpush.msra.mxu3 %v4671_v9 }
 0x7cd   :  { %v1797_v31 = vpop.f32.mrf.mxu3 }
 0x7cf   :  { %3341 = vmatmul.msk.f32.gmra.mxu2 %vm226_vm2, %v4660_v25  ;;  %3345 = vmatmul.msk.f32.gmra.mxu3 %vm226_vm2, %v4660_v25 }
 0x7d1   :  { %3350 = vmatmul.msk.f32.vlgmr.msrb.gmra.mxu0 %vm226_vm2, %v4449_v51  ;;  %3362 = vmatmul.msk.f32.vlgmr.msra.gmra.mxu1 %vm226_vm2, %v4449_v51 }
 0x7d7   :  { %3354 = vmatmul.msk.f32.vlgmr.msra.gmra.mxu2 %vm226_vm2, %v4449_v51  ;;  %3358 = vmatmul.msk.f32.vlgmr.msrb.gmra.mxu3 %vm226_vm2, %v4449_v51 }
 0x7d9   :  { %3351 = vmatmul.msk.f32.gmra.mxu0 %vm226_vm2, %v4462_v5  ;;  %3363 = vmatmul.msk.f32.gmra.mxu1 %vm226_vm2, %v4462_v5 }
 0x7df   :  { %3355 = vmatmul.msk.f32.gmra.mxu2 %vm226_vm2, %v4462_v5  ;;  %3359 = vmatmul.msk.f32.gmra.mxu3 %vm226_vm2, %v4462_v5 }
 0x7e1   :  { %3352 = vmatmul.msk.f32.gmra.mxu0 %vm226_vm2, %v4475_v47  ;;  %3364 = vmatmul.msk.f32.gmra.mxu1 %vm226_vm2, %v4475_v47 }
 0x7e7   :  { %3356 = vmatmul.msk.f32.gmra.mxu2 %vm226_vm2, %v4475_v47  ;;  %3360 = vmatmul.msk.f32.gmra.mxu3 %vm226_vm2, %v4475_v47 }
 0x7e9   :  { %3353 = vmatmul.msk.f32.gmra.mxu0 %vm226_vm2, %v4488_v46  ;;  %3365 = vmatmul.msk.f32.gmra.mxu1 %vm226_vm2, %v4488_v46 }
 0x7ef   :  { %3357 = vmatmul.msk.f32.gmra.mxu2 %vm226_vm2, %v4488_v46  ;;  %3361 = vmatmul.msk.f32.gmra.mxu3 %vm226_vm2, %v4488_v46 }
 0x7f1   :  { %3366 = vmatmul.msk.f32.vlgmr.msra.gmra.mxu0 %vm226_vm2, %v4501_v33  ;;  %3378 = vmatmul.msk.f32.vlgmr.msrb.gmra.mxu1 %vm226_vm2, %v4501_v33 }
 0x7f7   :  { %3370 = vmatmul.msk.f32.vlgmr.msrb.gmra.mxu2 %vm226_vm2, %v4501_v33  ;;  %3374 = vmatmul.msk.f32.vlgmr.msra.gmra.mxu3 %vm226_vm2, %v4501_v33  ;;  %v1817_v33 = vpop.f32.mrf.mxu1 }
 0x7f9   :  { %3367 = vmatmul.msk.f32.gmra.mxu0 %vm226_vm2, %v4511_v32  ;;  %3379 = vmatmul.msk.f32.gmra.mxu1 %vm226_vm2, %v4511_v32 }
 0x7ff   :  { %3371 = vmatmul.msk.f32.gmra.mxu2 %vm226_vm2, %v4511_v32  ;;  %3375 = vmatmul.msk.f32.gmra.mxu3 %vm226_vm2, %v4511_v32  ;;  %v1733_v32 = vpop.f32.mrf.mxu0  ;;  %v1820_v56 = vpop.f32.mrf.mxu1 }
 0x801   :  { %3368 = vmatmul.msk.f32.gmra.mxu0 %vm226_vm2, %v4521_v52  ;;  %3380 = vmatmul.msk.f32.gmra.mxu1 %vm226_vm2, %v4521_v52 }
 0x807   :  { %3372 = vmatmul.msk.f32.gmra.mxu2 %vm226_vm2, %v4521_v52  ;;  %3376 = vmatmul.msk.f32.gmra.mxu3 %vm226_vm2, %v4521_v52  ;;  %v1736_v35 = vpop.f32.mrf.mxu0  ;;  %v1823_v43 = vpop.f32.mrf.mxu1 }
 0x808   :  { %v1762_v52 = vpop.f32.mrf.mxu2 }
 0x809   :  { %3369 = vmatmul.msk.f32.gmra.mxu0 %vm226_vm2, %v4531_v55  ;;  %3381 = vmatmul.msk.f32.gmra.mxu1 %vm226_vm2, %v4531_v55 }
 0x80f   :  { %3373 = vmatmul.msk.f32.gmra.mxu2 %vm226_vm2, %v4531_v55  ;;  %3377 = vmatmul.msk.f32.gmra.mxu3 %vm226_vm2, %v4531_v55  ;;  %v1739_v22 = vpop.f32.mrf.mxu0  ;;  %v1826_v23 = vpop.f32.mrf.mxu1 }
 0x810   :  { %v1765_v2 = vpop.f32.mrf.mxu2 }
 0x818   :  { %v1768_v60 = vpop.f32.mrf.mxu2 }
 0x82e   :  { %v4746_v63 = vpop.f32.mrf.mxu0  ;;  %v1945_v16 = vpop.f32.mrf.mxu1 }
 0x82f   :  { %v4750_v19 = vadd.f32 %v1945_v16, %v1817_v33 }
 0x831   :  { %5149 = vst [vmem:[#allocation7_spill] sm:$0xff] %v4750_v19 }
 0x836   :  { %v1861_v11 = vpop.f32.mrf.mxu0  ;;  %v1948_v55 = vpop.f32.mrf.mxu1 }
 0x837   :  { %v1862_v6 = vadd.f32 %v1861_v11, %v1733_v32  ;;  %v1949_v8 = vadd.f32 %v1948_v55, %v1820_v56 }
 0x83a   :  { %v1887_v34 = vpop.f32.mrf.mxu2  ;;  %v4748_v38 = vpop.f32.mrf.mxu3 }
 0x83b   :  { %v4752_v24 = vadd.f32 %v1887_v34, %v1759_v59 }
 0x83e   :  { %v1864_v40 = vpop.f32.mrf.mxu0  ;;  %v1951_v58 = vpop.f32.mrf.mxu1 }
 0x83f   :  { %v1952_v61 = vadd.f32 %v1951_v58, %v1823_v43  ;;  %v1865_v34 = vadd.f32 %v1864_v40, %v1736_v35 }
 0x842   :  { %v1890_v54 = vpop.f32.mrf.mxu2  ;;  %v1919_v50 = vpop.f32.mrf.mxu3 }
 0x843   :  { %v1891_v49 = vadd.f32 %v1890_v54, %v1762_v52  ;;  %v1920_v13 = vadd.f32 %v1919_v50, %v1791_v57 }
 0x845   :  { %v1960_v39 = vmax.f32 %v1891_v49, %v1949_v8  ;;  %v1959_v62 = vmax.f32 %v1862_v6, %v1920_v13 }
 0x846   :  { %v1867_v26 = vpop.f32.mrf.mxu0  ;;  %v1954_v27 = vpop.f32.mrf.mxu1 }
 0x847   :  { %v4756_v10 = vmax.f32 %v1959_v62, %v1960_v39  ;;  %v1955_v33 = vadd.f32 %v1954_v27, %v1826_v23  ;;  %v1868_v57 = vadd.f32 %v1867_v26, %v1739_v22 }
 0x84a   :  { %v1893_v59 = vpop.f32.mrf.mxu2  ;;  %v1922_v16 = vpop.f32.mrf.mxu3 }
 0x84b   :  { %v1894_v53 = vadd.f32 %v1893_v59, %v1765_v2  ;;  %v1923_v12 = vadd.f32 %v1922_v16, %v1794_v45 }
 0x84d   :  { %v1962_v48 = vmax.f32 %v1894_v53, %v1952_v61  ;;  %v1961_v43 = vmax.f32 %v1865_v34, %v1923_v12 }
 0x84e   :  { %v1990_v58 = vpop.f32.mrf.mxu0  ;;  %v2077_v19 = vpop.f32.mrf.mxu1 }
 0x84f   :  { %v4758_v32 = vmax.f32 %v1961_v43, %v1962_v48 }
 0x852   :  { %v1896_v56 = vpop.f32.mrf.mxu2  ;;  %v1925_v52 = vpop.f32.mrf.mxu3 }
 0x853   :  { %v1897_v11 = vadd.f32 %v1896_v56, %v1768_v60  ;;  %v1926_v55 = vadd.f32 %v1925_v52, %v1797_v31  ;;  %v3606_v60 = vld [vmem:[%s3767_s21 + $0xf8] sm:$0xff]  ;;  %s3631_s21 = smov 10  }
 0x854   :  { %s4841_s14 = sld [smem:[%s5073_s0 + %s3631_s21]]   ;;  %s3647_s21 = smov 30  }
 0x855   :  { %v1964_v54 = vmax.f32 %v1897_v11, %v1955_v33  ;;  %v1963_v50 = vmax.f32 %v1868_v57, %v1926_v55  ;;  %v2092_v33 = vmul.f32 %v4640_v1, %v2077_v19  ;;  %v2426_v19 = vld [vmem:[%s4765_s10 + $0x8] sm:$0xff] }
 0x856   :  { %v1993_v23 = vpop.f32.mrf.mxu0  ;;  %v2080_v6 = vpop.f32.mrf.mxu1 }
 0x857   :  { %v4760_v8 = vmax.f32 %v1963_v50, %v1964_v54  ;;  %v2093_v26 = vmul.f32 %v4616_v28, %v1993_v23  ;;  %v2096_v27 = vmul.f32 %v4624_v41, %v2080_v6 }
 0x85a   :  { %v2019_v35 = vpop.f32.mrf.mxu2  ;;  %v2048_v2 = vpop.f32.mrf.mxu3 }
 0x85e   :  { %v1996_v53 = vpop.f32.mrf.mxu0  ;;  %v2083_v45 = vpop.f32.mrf.mxu1 }
 0x85f   :  { %v2097_v49 = vmul.f32 %v4594_v20, %v1996_v53  ;;  %v2100_v13 = vmul.f32 %v4612_v21, %v2083_v45  ;;  %v2428_v20 = vld [vmem:[%s4765_s10 + $0x18] sm:$0xff]  ;;  %v2427_v21 = vld [vmem:[%s4765_s10 + $0x10] sm:$0xff] }
 0x860   :  { %v5150_v53 = vld [vmem:[#allocation7_spill] sm:$0xff] }
 0x861   :  { %v5151_v45 = vmax.f32 %v4752_v24, %v5150_v53 }
 0x862   :  { %v2022_v12 = vpop.f32.mrf.mxu2  ;;  %v2051_v40 = vpop.f32.mrf.mxu3 }
 0x863   :  { %v2094_v34 = vmul.f32 %v4652_v15, %v2022_v12  ;;  %v2095_v43 = vmul.f32 %v4656_v29, %v2051_v40 }
 0x866   :  { %v1999_v48 = vpop.f32.mrf.mxu0  ;;  %v2086_v61 = vpop.f32.mrf.mxu1 }
 0x867   :  { %v2101_v22 = vmul.f32 %v4587_v30, %v1999_v48  ;;  %v2104_v31 = vmul.f32 %v3606_v60, %v2086_v61  ;;  %v2089_v30 = vmul.f32 %v4632_v42, %v1990_v58  ;;  %v2425_v58 = vld [vmem:[%s4765_s10] sm:$0xff]  ;;  %s3169_s10 = sld [smem:[%s5073_s0 + %s3646_s13]]  }
 0x869   :  { %2233 = vmatpush.msrb.mxu0 %v2101_v22  ;;  %2320 = vmatpush.msra.mxu1 %v2104_v31 }
 0x86a   :  { %v2025_v39 = vpop.f32.mrf.mxu2  ;;  %v2054_v62 = vpop.f32.mrf.mxu3 }
 0x86b   :  { %2234 = vmatpush.msrb.mxu0 %v2097_v49  ;;  %2321 = vmatpush.msra.mxu1 %v2100_v13  ;;  %v2098_v59 = vmul.f32 %v4636_v4, %v2025_v39  ;;  %v2099_v16 = vmul.f32 %v4644_v14, %v2054_v62 }
 0x86d   :  { %2235 = vmatpush.msrb.mxu0 %v2093_v26  ;;  %2322 = vmatpush.msra.mxu1 %v2096_v27 }
 0x86e   :  { %v2122_v4 = vpop.f32.mrf.mxu0  ;;  %v2209_v14 = vpop.f32.mrf.mxu1 }
 0x86f   :  { %2236 = vmatpush.msrb.mxu0 %v2089_v30  ;;  %2323 = vmatpush.msra.mxu1 %v2092_v33 }
 0x870   :  { %3382 = vmatmul.msk.f32.vlgmr.msrb.gmra.mxu0 %vm226_vm2, %v4554_v7  ;;  %3394 = vmatmul.msk.f32.vlgmr.msra.gmra.mxu1 %vm226_vm2, %v4554_v7 }
 0x871   :  { %2441 = vmatpush.msra.mxu0 %v2428_v20 }
 0x872   :  { %v2028_v28 = vpop.f32.mrf.mxu2  ;;  %v2057_v41 = vpop.f32.mrf.mxu3 }
 0x873   :  { %v2102_v42 = vmul.f32 %v4620_v3, %v2028_v28  ;;  %v2103_v1 = vmul.f32 %v4628_v0, %v2057_v41  ;;  %2442 = vmatpush.msra.mxu0 %v2427_v21  ;;  %v2090_v3 = vmul.f32 %v4667_v37, %v2019_v35  ;;  %v2091_v0 = vmul.f32 %v4671_v9, %v2048_v2 }
 0x874   :  { %v1859_v35 = vadd.f32 %v4746_v63, %v4730_v17 }
 0x875   :  { %2262 = vmatpush.msra.mxu2 %v2102_v42  ;;  %2291 = vmatpush.msrb.mxu3 %v2103_v1  ;;  %v1970_v42 = vmax.f32 %v4756_v10, -1e+30 }
 0x876   :  { %2443 = vmatpush.msra.mxu0 %v2426_v19  ;;  %v2212_v37 = vpop.f32.mrf.mxu1 }
 0x877   :  { %2263 = vmatpush.msra.mxu2 %v2098_v59  ;;  %2292 = vmatpush.msrb.mxu3 %v2099_v16 }
 0x878   :  { %3383 = vmatmul.msk.f32.gmra.mxu0 %vm226_vm2, %v4575_v44  ;;  %3395 = vmatmul.msk.f32.gmra.mxu1 %vm226_vm2, %v4575_v44 }
 0x879   :  { %2264 = vmatpush.msra.mxu2 %v2094_v34  ;;  %2293 = vmatpush.msrb.mxu3 %v2095_v43 }
 0x87a   :  { %2444 = vmatpush.msra.mxu0 %v2425_v58  ;;  %v2151_v15 = vpop.f32.mrf.mxu2  ;;  %v2180_v29 = vpop.f32.mrf.mxu3 }
 0x87b   :  { %2265 = vmatpush.msra.mxu2 %v2090_v3  ;;  %2294 = vmatpush.msrb.mxu3 %v2091_v0 }
 0x87c   :  { %3386 = vmatmul.msk.f32.vlgmr.msra.gmra.mxu2 %vm226_vm2, %v4554_v7  ;;  %3390 = vmatmul.msk.f32.vlgmr.msrb.gmra.mxu3 %vm226_vm2, %v4554_v7 }
 0x87e   :  { %v2215_v57 = vpop.f32.mrf.mxu1 }
 0x880   :  { %3384 = vmatmul.msk.f32.gmra.mxu0 %vm226_vm2, %v4604_v18  ;;  %3396 = vmatmul.msk.f32.gmra.mxu1 %vm226_vm2, %v4604_v18 }
 0x882   :  { %v2154_v9 = vpop.f32.mrf.mxu2  ;;  %v2183_v56 = vpop.f32.mrf.mxu3 }
 0x884   :  { %3387 = vmatmul.msk.f32.gmra.mxu2 %vm226_vm2, %v4575_v44  ;;  %3391 = vmatmul.msk.f32.gmra.mxu3 %vm226_vm2, %v4575_v44 }
 0x888   :  { %3385 = vmatmul.msk.f32.gmra.mxu0 %vm226_vm2, %v4660_v25  ;;  %3397 = vmatmul.msk.f32.gmra.mxu1 %vm226_vm2, %v4660_v25 }
 0x88a   :  { %v2157_v11 = vpop.f32.mrf.mxu2  ;;  %v2186_v55 = vpop.f32.mrf.mxu3 }
 0x88c   :  { %3388 = vmatmul.msk.f32.gmra.mxu2 %vm226_vm2, %v4604_v18  ;;  %3392 = vmatmul.msk.f32.gmra.mxu3 %vm226_vm2, %v4604_v18 }
 0x890   :  { %3398 = vmatmul.msk.f32.vlgmr.msra.gmra.mxu0 %vm226_vm2, %v4449_v51  ;;  %v2125_v51 = vpop.f32.mrf.mxu0 }
 0x892   :  { %v2160_v50 = vpop.f32.mrf.mxu2  ;;  %v2189_v23 = vpop.f32.mrf.mxu3 }
 0x894   :  { %3389 = vmatmul.msk.f32.gmra.mxu2 %vm226_vm2, %v4660_v25  ;;  %3393 = vmatmul.msk.f32.gmra.mxu3 %vm226_vm2, %v4660_v25 }
 0x898   :  { %3399 = vmatmul.msk.f32.gmra.mxu0 %vm226_vm2, %v4462_v5  ;;  %v2128_v52 = vpop.f32.mrf.mxu0  ;;  %v2218_v5 = vpop.f32.mrf.mxu1 }
 0x8a0   :  { %3400 = vmatmul.msk.f32.gmra.mxu0 %vm226_vm2, %v4475_v47  ;;  %v2131_v54 = vpop.f32.mrf.mxu0  ;;  %v1917_v47 = vadd.f32 %v4748_v38, %v4744_v36 }
 0x8a2   :  { %v1957_v2 = vmax.f32 %v1859_v35, %v1917_v47  ;;  %v1972_v47 = vmax.f32 %v4760_v8, -1e+30  ;;  %v2394_v8 = vld [vmem:[%s4841_s14 + $0x8] sm:$0xff] }
 0x8a4   :  { %v1965_v12 = vmax.f32 %v1957_v2, %v5151_v45 }
 0x8a6   :  { %v1969_v62 = vmax.f32 %v1965_v12, -1e+30 }
 0x8a8   :  { %3401 = vmatmul.msk.f32.gmra.mxu0 %vm226_vm2, %v4488_v46 }
 0x8ed   :  { %v2238_v46 = vpop.f32.mrf.mxu0  ;;  %v2325_v6 = vpop.f32.mrf.mxu1 }
 0x8ee   :  { %v2239_v61 = vadd.f32 %v2238_v46, %v2122_v4  ;;  %v2326_v22 = vadd.f32 %v2325_v6, %v2209_v14  ;;  %v1971_v14 = vmax.f32 %v4758_v32, -1e+30  ;;  %v2393_v6 = vld [vmem:[%s4841_s14] sm:$0xff] }
 0x8f5   :  { %v2241_v49 = vpop.f32.mrf.mxu0  ;;  %v2328_v13 = vpop.f32.mrf.mxu1 }
 0x8f6   :  { %v2242_v63 = vadd.f32 %v2241_v49, %v2125_v51  ;;  %v2329_v30 = vadd.f32 %v2328_v13, %v2212_v37  ;;  %v2396_v13 = vld [vmem:[%s4841_s14 + $0x18] sm:$0xff] }
 0x8fd   :  { %v2244_v28 = vpop.f32.mrf.mxu0  ;;  %v2331_v41 = vpop.f32.mrf.mxu1 }
 0x8fe   :  { %v2245_v34 = vadd.f32 %v2244_v28, %v2128_v52  ;;  %v2332_v43 = vadd.f32 %v2331_v41, %v2215_v57 }
 0x8ff   :  { %v2267_v40 = vpop.f32.mrf.mxu2  ;;  %v2296_v48 = vpop.f32.mrf.mxu3 }
 0x900   :  { %v2268_v60 = vadd.f32 %v2267_v40, %v2151_v15  ;;  %v2297_v31 = vadd.f32 %v2296_v48, %v2180_v29 }
 0x902   :  { %v2338_v39 = vmax.f32 %v2268_v60, %v2326_v22  ;;  %v2337_v36 = vmax.f32 %v2239_v61, %v2297_v31  ;;  %v2395_v60 = vld [vmem:[%s4841_s14 + $0x10] sm:$0xff]  ;;  %s3170_s14 = sld [smem:[%s5073_s0 + %s3647_s21]]  }
 0x904   :  { %v2345_v38 = vmax.f32 %v2337_v36, %v2338_v39 }
 0x905   :  { %v2247_v29 = vpop.f32.mrf.mxu0  ;;  %v2334_v51 = vpop.f32.mrf.mxu1 }
 0x906   :  { %v2349_v26 = vmax.f32 %v1969_v62, %v2345_v38  ;;  %v2335_v52 = vadd.f32 %v2334_v51, %v2218_v5 }
 0x907   :  { %v2270_v27 = vpop.f32.mrf.mxu2  ;;  %v2299_v17 = vpop.f32.mrf.mxu3 }
 0x908   :  { %v2271_v33 = vadd.f32 %v2270_v27, %v2154_v9  ;;  %v2300_v24 = vadd.f32 %v2299_v17, %v2183_v56  ;;  %2357 = vrot.lane.b32.xlu2 %v2349_v26, %s3620_s30  ;;  %v2248_v56 = vadd.f32 %v2247_v29, %v2131_v54  ;;  %v88_v54 = vstv %s3165_s19  ;;  %s3171_s19 = sld [smem:[%s5073_s0 + %s3648_s15]]  }
 0x909   :  { %89 = vst [vmem:[#allocation4] sm:$0x1] %v88_v54 }
 0x90a   :  { %v2340_v20 = vmax.f32 %v2271_v33, %v2329_v30  ;;  %v2339_v21 = vmax.f32 %v2242_v63, %v2300_v24 }
 0x90c   :  { %v2346_v1 = vmax.f32 %v2339_v21, %v2340_v20 }
 0x90e   :  { %v2350_v19 = vmax.f32 %v1970_v42, %v2346_v1 }
 0x90f   :  { %v2273_v59 = vpop.f32.mrf.mxu2  ;;  %v2302_v16 = vpop.f32.mrf.mxu3 }
 0x910   :  { %v2274_v58 = vadd.f32 %v2273_v59, %v2157_v11  ;;  %v2303_v3 = vadd.f32 %v2302_v16, %v2186_v55  ;;  %2359 = vrot.lane.b32.xlu1 %v2350_v19, %s3620_s30  ;;  %v2817_v48 = vld [vmem:[#allocation4] sm:$0x1]  ;;  %v2446_v59 = vpop.f32.mrf.mxu0 }
 0x912   :  { %v2342_v0 = vmax.f32 %v2274_v58, %v2332_v43  ;;  %v2341_v4 = vmax.f32 %v2245_v34, %v2303_v3 }
 0x914   :  { %v2347_v15 = vmax.f32 %v2341_v4, %v2342_v0 }
 0x916   :  { %v2351_v10 = vmax.f32 %v1971_v14, %v2347_v15  ;;  %v3506_v14 = vld [vmem:[%s4865_s4] ss:$0 sm:$0xff]  ;;  %s3176_s4 = sld [smem:[%s5073_s0 + %s3651_s1]]  }
 0x917   :  { %v2276_v37 = vpop.f32.mrf.mxu2  ;;  %v2305_v9 = vpop.f32.mrf.mxu3 }
 0x918   :  { %v2277_v57 = vadd.f32 %v2276_v37, %v2160_v50  ;;  %v2306_v11 = vadd.f32 %v2305_v9, %v2189_v23  ;;  %2361 = vrot.lane.b32.xlu0 %v2351_v10, %s3620_s30  ;;  %v86_v23 = vstv %s3162_s25  ;;  %v2449_v34 = vpop.f32.mrf.mxu0  ;;  %s3172_s25 = sld [smem:[%s5073_s0 + %s3649_s20]]  }
 0x919   :  { %87 = vst [vmem:[#allocation3] sm:$0x1] %v86_v23 }
 0x91a   :  { %v2344_v32 = vmax.f32 %v2277_v57, %v2335_v52  ;;  %v2343_v55 = vmax.f32 %v2248_v56, %v2306_v11  ;;  %v3607_v57 = vld [vmem:[%s4363_s18] sm:$0x3]  ;;  %s4982_s18 = sld [smem:[%s5073_s0 + %s3643_s3]]  }
 0x91c   :  { %v2348_v46 = vmax.f32 %v2343_v55, %v2344_v32  ;;  %v5152_v32 = vld [vmem:[#allocation6_spill] sm:$0xff] }
 0x91e   :  { %v2352_v35 = vmax.f32 %v1972_v47, %v2348_v46  ;;  %v3608_v47 = vld [vmem:[%s4370_s23] sm:$0xff]  ;;  %v3609_v46 = vld [vmem:[%s4370_s23 + $0x8] sm:$0xff] }
 0x920   :  { %2399 = vperm.xlu0 %3499, %v2393_v6   ;;  %2363 = vrot.lane.b32.xlu2 %v2352_v35, %s3620_s30  ;;  %s3634_s30 = smov 17   ;;  %v3505_v49 = vld [vmem:[#allocation3] ss:$0 sm:$0xff]  ;;  %v2452_v58 = vpop.f32.mrf.mxu0  ;;  %v3610_v6 = vld [vmem:[%s4370_s23 + $0x10] sm:$0xff] }
 0x921   :  { %s3157_s28 = sld [smem:[%s5073_s0 + %s3634_s30]]   ;;  %s3650_s30 = smov 33  }
 0x927   :  { %v2424_v2 = vld [vmem:[%s3157_s28 + $0x18] sm:$0xff]  ;;  %v2423_v53 = vld [vmem:[%s3157_s28 + $0x10] sm:$0xff]  ;;  %v2422_v39 = vld [vmem:[%s3157_s28 + $0x8] sm:$0xff] }
 0x928   :  { %2482 = vmatpush.msrb.mxu2 %v2424_v2  ;;  %v2421_v36 = vld [vmem:[%s3157_s28] sm:$0xff]  ;;  %v2455_v0 = vpop.f32.mrf.mxu0  ;;  %s3173_s28 = sld [smem:[%s5073_s0 + %s3650_s30]]  }
 0x92a   :  { %2483 = vmatpush.msrb.mxu2 %v2423_v53 }
 0x92c   :  { %2484 = vmatpush.msrb.mxu2 %v2422_v39 }
 0x92e   :  { %2485 = vmatpush.msrb.mxu2 %v2421_v36 }
 0x962   :  { %v2358_v5 = vpop.permute.xlu2 %2357 }
 0x963   :  { %v2369_v50 = vmax.f32 %v2349_v26, %v2358_v5 }
 0x965   :  { %2377 = vrot.lane.b32.xlu1 %v2369_v50, %s3623_s9 }
 0x96d   :  { %2404 = vperm.xlu1 %3500, %v2394_v8  }
 0x97a   :  { %v2364_v45 = vpop.permute.xlu2 %2363 }
 0x97b   :  { %v2372_v12 = vmax.f32 %v2352_v35, %v2364_v45  ;;  %v3611_v35 = vld [vmem:[%s4370_s23 + $0x18] sm:$0xff]  ;;  %s3645_s23 = smov 35  }
 0x97c   :  { %s3175_s7 = sld [smem:[%s5073_s0 + %s3645_s23]]  }
 0x97d   :  { %2383 = vrot.lane.b32.xlu1 %v2372_v12, %s3623_s9 }
 0x982   :  { %v2360_v40 = vpop.permute.xlu1 %2359 }
 0x983   :  { %v2370_v61 = vmax.f32 %v2350_v19, %v2360_v40 }
 0x985   :  { %2379 = vrot.lane.b32.xlu2 %v2370_v61, %s3623_s9  ;;  %2820 = vperm.xlu1 %3500, %v2817_v48  }
 0x98a   :  { %v2362_v22 = vpop.permute.xlu0 %2361 }
 0x98b   :  { %v2371_v31 = vmax.f32 %v2351_v10, %v2362_v22 }
 0x98d   :  { %2381 = vrot.lane.b32.xlu0 %v2371_v31, %s3623_s9  ;;  %2409 = vperm.xlu2 %3498, %v2395_v60   ;;  %s3636_s9 = smov 20  }
 0x98e   :  { %s4913_s5 = sld [smem:[%s5073_s0 + %s3636_s9]]   ;;  %s3652_s9 = smov 37  }
 0x992   :  { %v2400_v26 = vpop.permute.xlu0 %2399 }
 0x995   :  { %2414 = vperm.xlu0 %3499, %v2396_v13   ;;  %2689 = vperm.xlu2 %3498, %v3505_v49  }
 0x9d7   :  { %v2378_v38 = vpop.permute.xlu1 %2377 }
 0x9d8   :  { %v2389_v62 = vmax.f32 %v2369_v50, %v2378_v38 }
 0x9da   :  { %v2417_v27 = vmul.f32 %v2400_v26, %v2389_v62 }
 0x9dc   :  { %3402 = vmatmul.msk.f32.vlgmr.msrb.gmra.mxu2 %vm226_vm2, %v2417_v27 }
 0x9df   :  { %v2380_v17 = vpop.permute.xlu2 %2379  ;;  %v2405_v30 = vpop.permute.xlu1 %2404 }
 0x9e0   :  { %v2390_v63 = vmax.f32 %v2370_v61, %v2380_v17 }
 0x9e2   :  { %v2418_v33 = vmul.f32 %v2405_v30, %v2390_v63 }
 0x9e4   :  { %3403 = vmatmul.msk.f32.gmra.mxu2 %vm226_vm2, %v2418_v33 }
 0x9e7   :  { %v2410_v21 = vpop.permute.xlu2 %2409 }
 0x9ef   :  { %v2384_v41 = vpop.permute.xlu1 %2383 }
 0x9f0   :  { %v2392_v1 = vmax.f32 %v2372_v12, %v2384_v41 }
 0x9ff   :  { %v2382_v24 = vpop.permute.xlu0 %2381 }
 0xa00   :  { %v2391_v20 = vmax.f32 %v2371_v31, %v2382_v24 }
 0xa02   :  { %v2419_v28 = vmul.f32 %v2410_v21, %v2391_v20 }
 0xa04   :  { %3404 = vmatmul.msk.f32.gmra.mxu2 %vm226_vm2, %v2419_v28 }
 0xa07   :  { %v2415_v42 = vpop.permute.xlu0 %2414 }
 0xa08   :  { %v2420_v19 = vmul.f32 %v2415_v42, %v2392_v1 }
 0xa0c   :  { %3405 = vmatmul.msk.f32.gmra.mxu2 %vm226_vm2, %v2420_v19 }
 0xa5f   :  { %v2487_v16 = vpop.f32.mrf.mxu2 }
 0xa60   :  { %v2488_v37 = vadd.f32 %v2487_v16, %v2446_v59 }
 0xa62   :  { %v2503_v52 = vadd.f32 %v3506_v14, %v2488_v37 }
 0xa67   :  { %v2490_v43 = vpop.f32.mrf.mxu2 }
 0xa68   :  { %v2491_v51 = vadd.f32 %v2490_v43, %v2449_v34 }
 0xa6a   :  { %v2504_v56 = vadd.f32 %v3506_v14, %v2491_v51  ;;  %v3507_v51 = vld [vmem:[%s4913_s5] ss:$0 sm:$0xff]  ;;  %s3177_s5 = sld [smem:[%s5073_s0 + %s3652_s9]]  }
 0xa87   :  { %v2493_v3 = vpop.f32.mrf.mxu2 }
 0xa88   :  { %v2494_v15 = vadd.f32 %v2493_v3, %v2452_v58 }
 0xa8a   :  { %v2505_v9 = vadd.f32 %v3506_v14, %v2494_v15 }
 0xa8f   :  { %v2496_v4 = vpop.f32.mrf.mxu2 }
 0xa90   :  { %v2497_v29 = vadd.f32 %v2496_v4, %v2455_v0 }
 0xa92   :  { %v2506_v10 = vadd.f32 %v3506_v14, %v2497_v29 }
 0xa94   :  { %2521 = vmatpush.msra.mxu3 %v2506_v10 }
 0xa96   :  { %2522 = vmatpush.msra.mxu3 %v2505_v9 }
 0xa98   :  { %2523 = vmatpush.msra.mxu3 %v2504_v56 }
 0xa9a   :  { %2524 = vmatpush.msra.mxu3 %v2503_v52 }
 0xa9b   :  { %3406 = vmatmul.msk.f32.vlgmr.msra.gmra.mxu3 %vm226_vm2, %v3607_v57 }
 0xb1e   :  { %v2526_v11 = vpop.f32.mrf.mxu3 }
 0xb1f   :  { %v2529_v55 = vmul.f32 %v2526_v11, %v5152_v32 }
 0xb21   :  { %3407 = vmatpush.msk.msrb.mxu3 %vm1382_vm8, %v2529_v55 }
 0xb22   :  { %3408 = vmatmul.msk.f32.vlgmr.msrb.gmra.mxu3 %vm1369_vm9, %v3608_v47 }
 0xb23   :  { %2915 = vmatpush.msra.mxu3 %v4660_v25 }
 0xb25   :  { %2916 = vmatpush.msra.mxu3 %v4604_v18 }
 0xb27   :  { %2917 = vmatpush.msra.mxu3 %v4575_v44 }
 0xb29   :  { %2918 = vmatpush.msra.mxu3 %v4554_v7 }
 0xb2a   :  { %3409 = vmatmul.msk.f32.gmra.mxu3 %vm1369_vm9, %v3609_v46 }
 0xb32   :  { %3410 = vmatmul.msk.f32.gmra.mxu3 %vm1369_vm9, %v3610_v6 }
 0xb3a   :  { %3411 = vmatmul.msk.f32.gmra.mxu3 %vm1369_vm9, %v3611_v35 }
 0xba5   :  { %v2550_v54 = vpop.f32.mrf.mxu3 }
 0xba6   :  { %v4897_v23 = vsub.f32 %v2503_v52, %v2550_v54 }
 0xba8   :  { %v2566_v45 = vmul.f32 %v4897_v23, %v4897_v23 }
 0xbad   :  { %v2553_v5 = vpop.f32.mrf.mxu3 }
 0xbae   :  { %v4893_v44 = vsub.f32 %v2504_v56, %v2553_v5 }
 0xbb0   :  { %v2567_v53 = vmul.f32 %v4893_v44, %v4893_v44 }
 0xbb5   :  { %v2556_v50 = vpop.f32.mrf.mxu3 }
 0xbb6   :  { %v4889_v25 = vsub.f32 %v2505_v9, %v2556_v50 }
 0xbb8   :  { %v2568_v2 = vmul.f32 %v4889_v25, %v4889_v25 }
 0xbbd   :  { %v2559_v8 = vpop.f32.mrf.mxu3 }
 0xbbe   :  { %v4891_v18 = vsub.f32 %v2506_v10, %v2559_v8 }
 0xbc0   :  { %v2569_v7 = vmul.f32 %v4891_v18, %v4891_v18 }
 0xbc2   :  { %2582 = vmatpush.msrb.mxu1 %v2569_v7 }
 0xbc4   :  { %2583 = vmatpush.msrb.mxu1 %v2568_v2 }
 0xbc6   :  { %2584 = vmatpush.msrb.mxu1 %v2567_v53  ;;  %v2701_v53 = vld [vmem:[%s3149_s11 + $0x8] sm:$0xff] }
 0xbc8   :  { %2585 = vmatpush.msrb.mxu1 %v2566_v45  ;;  %v2702_v45 = vld [vmem:[%s3149_s11 + $0x10] sm:$0xff] }
 0xbc9   :  { %3412 = vmatmul.msk.f32.vlgmr.msrb.gmra.mxu1 %vm226_vm2, %v3607_v57  ;;  %v3508_v57 = vld [vmem:[%s4918_s29] ss:$0 sm:$0xff]  ;;  %s3174_s29 = sld [smem:[%s5073_s0 + %s3653_s6]]  }
 0xc46   :  { %v2587_v12 = vpop.f32.mrf.mxu1 }
 0xc47   :  { %v2590_v40 = vmul.f32 %v2587_v12, %v5152_v32  ;;  %v2703_v12 = vld [vmem:[%s3149_s11 + $0x18] sm:$0xff] }
 0xc49   :  { %3413 = vmatpush.msk.msrb.mxu0 %vm1382_vm8, %v2590_v40  ;;  %v2746_v40 = vld [vmem:[%s3164_s16] sm:$0x1]  ;;  %s3179_s16 = sld [smem:[%s5073_s0 + %s3655_s12]]  }
 0xc4a   :  { %3414 = vmatmul.msk.f32.vlgmr.msrb.gmra.mxu0 %vm1369_vm9, %v3608_v47 }
 0xc52   :  { %3415 = vmatmul.msk.f32.gmra.mxu0 %vm1369_vm9, %v3609_v46 }
 0xc5a   :  { %3416 = vmatmul.msk.f32.gmra.mxu0 %vm1369_vm9, %v3610_v6 }
 0xc62   :  { %3417 = vmatmul.msk.f32.gmra.mxu0 %vm1369_vm9, %v3611_v35  ;;  %v2690_v35 = vpop.permute.xlu2 %2689 }
 0xcc7   :  { %v2611_v48 = vpop.f32.mrf.mxu0 }
 0xcc8   :  { %v2612_v61 = vadd.f32 1e-05, %v2611_v48 }
 0xcca   :  { %3533 = vrsqrt.f32 %v2612_v61  ;;  %vm2629_vm3 = vweird.f32 %v2612_v61 }
 0xccf   :  { %v2614_v22 = vpop.f32.mrf.mxu0 }
 0xcd0   :  { %v2615_v60 = vadd.f32 1e-05, %v2614_v22  ;;  %v3534_v31 = vpop.eup %3533 }
 0xcd1   :  { %v2624_v38 = vmul.f32 %v3534_v31, %v2612_v61  ;;  %vm2630_vm14 = vweird.f32 %v3534_v31 }
 0xcd2   :  { %3535 = vrsqrt.f32 %v2615_v60  ;;  %vm2639_vm0 = vweird.f32 %v2615_v60  ;;  %vm2631_vm4 = vmor %vm2629_vm3, %vm2630_vm14 }
 0xcd3   :  { %v2625_v26 = vmul.f32 %v3534_v31, %v2624_v38 }
 0xcd5   :  { %v2626_v24 = vmul.f32 0.5, %v2625_v26 }
 0xcd7   :  { %v2617_v49 = vpop.f32.mrf.mxu0  ;;  %v2627_v41 = vsub.f32 1.5, %v2626_v24 }
 0xcd8   :  { %v3536_v13 = vpop.eup %3535  ;;  %v2618_v39 = vadd.f32 1e-05, %v2617_v49 }
 0xcd9   :  { %v2634_v36 = vmul.f32 %v3536_v13, %v2615_v60  ;;  %vm2640_vm9 = vweird.f32 %v3536_v13  ;;  %v2628_v34 = vmul.f32 %v3534_v31, %v2627_v41 }
 0xcda   :  { %3537 = vrsqrt.f32 %v2618_v39  ;;  %vm2649_vm13 = vweird.f32 %v2618_v39  ;;  %vm2641_vm1 = vmor %vm2639_vm0, %vm2640_vm9 }
 0xcdb   :  { %v2635_v62 = vmul.f32 %v3536_v13, %v2634_v36  ;;  %v2632_v14 = vsel %vm2631_vm4, %v3534_v31, %v2628_v34  ;;  %v2745_v31 = vld [vmem:[%s3163_s22] sm:$0x1] }
 0xcdc   :  { %v2663_v37 = vmul.f32 %v2632_v14, %v4897_v23  ;;  %v2700_v23 = vld [vmem:[%s3149_s11] sm:$0xff]  ;;  %s3178_s11 = sld [smem:[%s5073_s0 + %s3654_s8]]  }
 0xcdd   :  { %v2636_v30 = vmul.f32 0.5, %v2635_v62  ;;  %v2871_v34 = vld [vmem:[%s4977_s2] sm:$0xff] }
 0xcde   :  { %v2670_v47 = vmul.f32 %v3507_v51, %v2663_v37  ;;  %v2883_v14 = vld [vmem:[%s4982_s18] sm:$0xff] }
 0xcdf   :  { %v2620_v27 = vpop.f32.mrf.mxu0  ;;  %v2637_v21 = vsub.f32 1.5, %v2636_v30 }
 0xce0   :  { %v3538_v17 = vpop.eup %3537  ;;  %v2621_v63 = vadd.f32 1e-05, %v2620_v27  ;;  %v2677_v50 = vadd.f32 %v3508_v57, %v2670_v47  ;;  %v2828_v27 = vld [vmem:[%s3166_s26 + $0x10] sm:$0xff] }
 0xce1   :  { %v2644_v33 = vmul.f32 %v3538_v17, %v2618_v39  ;;  %vm2650_vm8 = vweird.f32 %v3538_v17  ;;  %v2638_v19 = vmul.f32 %v3536_v13, %v2637_v21 }
 0xce2   :  { %3539 = vrsqrt.f32 %v2621_v63  ;;  %vm2651_vm15 = vmor %vm2649_vm13, %vm2650_vm8  ;;  %vm2659_vm6 = vweird.f32 %v2621_v63  ;;  %vm2682_vm8 = vcmp.gt.f32.partialorder %v2677_v50, 0.0 }
 0xce3   :  { %v2645_v20 = vmul.f32 %v3538_v17, %v2644_v33  ;;  %v2642_v3 = vsel %vm2641_vm1, %v3536_v13, %v2638_v19  ;;  %v2821_v13 = vpop.permute.xlu1 %2820 }
 0xce4   :  { %v2664_v29 = vmul.f32 %v2642_v3, %v4893_v44  ;;  %v2692_v44 = vmul.f32 %v2690_v35, %v2677_v50  ;;  %v2823_v36 = vperm.slane %v2821_v13, 0  ;;  %v2934_v13 = vld [vmem:[%s3169_s10 + $0x10] sm:$0xff] }
 0xce5   :  { %v2646_v28 = vmul.f32 0.5, %v2645_v20 }
 0xce6   :  { %v2671_v11 = vmul.f32 %v3507_v51, %v2664_v29  ;;  %v4944_v2 = vsel %vm2682_vm8, %v2677_v50, %v2692_v44 }
 0xce7   :  { %v2647_v42 = vsub.f32 1.5, %v2646_v28 }
 0xce8   :  { %v3540_v1 = vpop.eup %3539  ;;  %v2678_v6 = vadd.f32 %v3508_v57, %v2671_v11  ;;  %v2884_v11 = vld [vmem:[%s4982_s18 + $0x8] sm:$0xff] }
 0xce9   :  { %v2648_v59 = vmul.f32 %v3538_v17, %v2647_v42  ;;  %v2654_v16 = vmul.f32 %v3540_v1, %v2621_v63  ;;  %vm2660_vm5 = vweird.f32 %v3540_v1  ;;  %v2826_v63 = vld [vmem:[%s3166_s26] sm:$0xff]  ;;  %v2829_v42 = vld [vmem:[%s3166_s26 + $0x18] sm:$0xff] }
 0xcea   :  { %vm2661_vm7 = vmor %vm2659_vm6, %vm2660_vm5  ;;  %vm2683_vm12 = vcmp.gt.f32.partialorder %v2678_v6, 0.0 }
 0xceb   :  { %v2652_v43 = vsel %vm2651_vm15, %v3538_v17, %v2648_v59  ;;  %v2655_v58 = vmul.f32 %v3540_v1, %v2654_v16  ;;  %v2827_v17 = vld [vmem:[%s3166_s26 + $0x8] sm:$0xff] }
 0xcec   :  { %v2665_v4 = vmul.f32 %v2652_v43, %v4889_v25  ;;  %v2693_v25 = vmul.f32 %v2690_v35, %v2678_v6  ;;  %v3644_v43 = vmov 0.0  }
 0xced   :  { %v2656_v0 = vmul.f32 0.5, %v2655_v58 }
 0xcee   :  { %v2672_v9 = vmul.f32 %v3507_v51, %v2665_v4  ;;  %v4939_v7 = vsel %vm2683_vm12, %v2678_v6, %v2693_v25 }
 0xcef   :  { %v2657_v15 = vsub.f32 1.5, %v2656_v0  ;;  %v2872_v0 = vld [vmem:[%s4977_s2 + $0x8] sm:$0xff] }
 0xcf0   :  { %v2679_v55 = vadd.f32 %v3508_v57, %v2672_v9 }
 0xcf1   :  { %v2658_v10 = vmul.f32 %v3540_v1, %v2657_v15 }
 0xcf2   :  { %v2694_v5 = vmul.f32 %v2690_v35, %v2679_v55  ;;  %vm2684_vm11 = vcmp.gt.f32.partialorder %v2679_v55, 0.0 }
 0xcf3   :  { %v2662_v56 = vsel %vm2661_vm7, %v3540_v1, %v2658_v10 }
 0xcf4   :  { %v2666_v52 = vmul.f32 %v2662_v56, %v4891_v18  ;;  %v4936_v18 = vsel %vm2684_vm11, %v2679_v55, %v2694_v5  ;;  %v2885_v5 = vld [vmem:[%s4982_s18 + $0x10] sm:$0xff] }
 0xcf6   :  { %v2673_v32 = vmul.f32 %v3507_v51, %v2666_v52  ;;  %v2873_v52 = vld [vmem:[%s4977_s2 + $0x10] sm:$0xff] }
 0xcf8   :  { %v2680_v46 = vadd.f32 %v3508_v57, %v2673_v32 }
 0xcfa   :  { %vm2685_vm10 = vcmp.gt.f32.partialorder %v2680_v46, 0.0  ;;  %v2695_v54 = vmul.f32 %v2690_v35, %v2680_v46  ;;  %v2874_v35 = vld [vmem:[%s4977_s2 + $0x18] sm:$0xff] }
 0xcfc   :  { %v4931_v8 = vsel %vm2685_vm10, %v2680_v46, %v2695_v54  ;;  %vm2938_vm10 = vcmp.gt.f32.partialorder %v2934_v13, 0.0 }
 0xcfd   :  { %2728 = vmatpush.msra.mxu1 %v4931_v8  ;;  %3422 = vmatpush.xpose.msk.msra.mxu2 %vm226_vm2, %v4931_v8 }
 0xcff   :  { %2729 = vmatpush.msra.mxu1 %v4936_v18 }
 0xd01   :  { %2730 = vmatpush.msra.mxu1 %v4939_v7  ;;  %3423 = vmatpush.xpose.msk.msra.mxu2 %vm226_vm2, %v4936_v18 }
 0xd03   :  { %2731 = vmatpush.msra.mxu1 %v4944_v2 }
 0xd04   :  { %3418 = vmatmul.msk.f32.vlgmr.msra.gmra.mxu1 %vm226_vm2, %v2700_v23 }
 0xd05   :  { %3424 = vmatpush.xpose.msk.msra.mxu2 %vm226_vm2, %v4939_v7 }
 0xd09   :  { %3425 = vmatpush.xpose.msk.msra.mxu2 %vm226_vm2, %v4944_v2 }
 0xd0c   :  { %3419 = vmatmul.msk.f32.gmra.mxu1 %vm226_vm2, %v2701_v53  ;;  %3426 = vmatmul.msk.f32.vlgmr.msra.gmra.mxu2 %vm226_vm2, %v2746_v40  ;;  %v2886_v53 = vld [vmem:[%s4982_s18 + $0x18] sm:$0xff]  ;;  %v2932_v40 = vld [vmem:[%s3169_s10] sm:$0xff] }
 0xd0d   :  { %vm2936_vm5 = vcmp.gt.f32.partialorder %v2932_v40, 0.0 }
 0xd14   :  { %3420 = vmatmul.msk.f32.gmra.mxu1 %vm226_vm2, %v2702_v45 }
 0xd1c   :  { %3421 = vmatmul.msk.f32.gmra.mxu1 %vm226_vm2, %v2703_v12  ;;  %v90_v12 = vstv %s3175_s7 }
 0xd1d   :  { %91 = vst [vmem:[#allocation5] sm:$0x1] %v90_v12 }
 0xd81   :  { %v2733_v48 = vpop.f32.mrf.mxu1 }
 0xd89   :  { %v2736_v61 = vpop.f32.mrf.mxu1 }
 0xd8f   :  { %v2779_v49 = vpop.f32.mrf.mxu2 }
 0xd91   :  { %v2739_v22 = vpop.f32.mrf.mxu1 }
 0xd99   :  { %v2742_v60 = vpop.f32.mrf.mxu1 }
 0xd9a   :  { %3427 = vmatpush.xpose.msk.msrb.mxu2 %vm226_vm2, %v2742_v60 }
 0xd9e   :  { %3428 = vmatpush.xpose.msk.msrb.mxu2 %vm226_vm2, %v2739_v22  ;;  %v5153_v22 = vmov 0  }
 0xda2   :  { %3429 = vmatpush.xpose.msk.msrb.mxu2 %vm226_vm2, %v2736_v61 }
 0xda6   :  { %3430 = vmatpush.xpose.msk.msrb.mxu2 %vm226_vm2, %v2733_v48  ;;  %v2940_v48 = vld [vmem:[%s3170_s14] sm:$0xff] }
 0xda9   :  { %3431 = vmatmul.msk.f32.vlgmr.msrb.gmra.mxu2 %vm226_vm2, %v2745_v31 }
 0xe2c   :  { %v2814_v39 = vpop.f32.mrf.mxu2 }
 0xe2d   :  { %v2815_v38 = vadd.f32 %v2814_v39, %v2779_v49  ;;  %v3081_v49 = vld [vmem:[#allocation5] sm:$0x1]  ;;  %v2942_v39 = vld [vmem:[%s3170_s14 + $0x10] sm:$0xff] }
 0xe2f   :  { %v2824_v62 = vadd.f32 %v2823_v36, %v2815_v38  ;;  %v2933_v38 = vld [vmem:[%s3169_s10 + $0x8] sm:$0xff] }
 0xe30   :  { %vm2937_vm8 = vcmp.gt.f32.partialorder %v2933_v38, 0.0  ;;  %v3095_v38 = vld [vmem:[%s3178_s11] sm:$0x1] }
 0xe31   :  { %3541 = vtanh.f32 %v2824_v62  ;;  %v2941_v62 = vld [vmem:[%s3170_s14 + $0x8] sm:$0xff] }
 0xe37   :  { %v3542_v26 = vpop.eup %3541 }
 0xe38   :  { %v2830_v30 = vperm.slane %v3542_v26, 0 }
 0xe3a   :  { %v2833_v33 = vmul.f32 %v2830_v30, %v2828_v27  ;;  %v2832_v24 = vmul.f32 %v2830_v30, %v2827_v17  ;;  %v2831_v20 = vmul.f32 %v2830_v30, %v2826_v63  ;;  %v2834_v1 = vmul.f32 %v2830_v30, %v2829_v42  ;;  %v2935_v27 = vld [vmem:[%s3169_s10 + $0x18] sm:$0xff] }
 0xe3b   :  { %v2943_v17 = vld [vmem:[%s3170_s14 + $0x18] sm:$0xff] }
 0xe3c   :  { %v2841_v21 = vsel %vm226_vm2, %v2833_v33, 0.0  ;;  %v2838_v28 = vsel %vm226_vm2, %v2832_v24, 0.0  ;;  %v2835_v41 = vsel %vm226_vm2, %v2831_v20, 0.0  ;;  %v2844_v19 = vsel %vm226_vm2, %v2834_v1, 0.0  ;;  %v3001_v24 = vld [vmem:[%s3171_s19 + $0x18] sm:$0xff]  ;;  %v3000_v20 = vld [vmem:[%s3171_s19 + $0x10] sm:$0xff] }
 0xe3d   :  { %2842 = vadd.xlane.f32.xlu1 %v2841_v21  ;;  %2839 = vadd.xlane.f32.xlu2 %v2838_v28  ;;  %v2999_v21 = vld [vmem:[%s3171_s19 + $0x8] sm:$0xff]  ;;  %v2998_v28 = vld [vmem:[%s3171_s19] sm:$0xff] }
 0xe3e   :  { %2836 = vadd.xlane.f32.xlu0 %v2835_v41  ;;  %3044 = vmatpush.msra.mxu0 %v3001_v24 }
 0xe40   :  { %3045 = vmatpush.msra.mxu0 %v3000_v20 }
 0xe42   :  { %3046 = vmatpush.msra.mxu0 %v2999_v21 }
 0xe44   :  { %3047 = vmatpush.msra.mxu0 %v2998_v28 }
 0xe46   :  { %2845 = vadd.xlane.f32.xlu0 %v2844_v19 }
 0xeb0   :  { %v4984_v59 = vpop.xlane.xlu2 %2839  ;;  %v4997_v51 = vpop.xlane.xlu1 %2842 }
 0xeb1   :  { %v4986_v16 = vpop.xlane.xlu0 %2836  ;;  %vm2860_vm9 = vcmp.eq.f32.partialorder %v2830_v30, %v4984_v59  ;;  %vm2848_vm15 = vcmp.gt.f32.partialorder %v2830_v30, %v4984_v59  ;;  %vm2861_vm0 = vcmp.eq.f32.partialorder %v2830_v30, %v4997_v51  ;;  %vm2849_vm1 = vcmp.gt.f32.partialorder %v2830_v30, %v4997_v51 }
 0xeb2   :  { %vm2847_vm13 = vcmp.gt.f32.partialorder %v2830_v30, %v4986_v16  ;;  %vm2859_vm14 = vcmp.eq.f32.partialorder %v2830_v30, %v4986_v16  ;;  %v3437_v4 = vsel %vm2860_vm9, 1.0, %v3644_v43  ;;  %v3433_v9 = vsel %vm2848_vm15, 1.0, %v3644_v43 }
 0xeb3   :  { %v3436_v58 = vsel %vm2859_vm14, 1.0, %v3644_v43  ;;  %v3432_v15 = vsel %vm2847_vm13, 1.0, %v3644_v43  ;;  %v2876_v10 = vmul.f32 %v3437_v4, %v2872_v0  ;;  %v3438_v57 = vsel %vm2861_vm0, 1.0, %v3644_v43  ;;  %v3004_v4 = vld [vmem:[%s3172_s25 + $0x10] sm:$0xff] }
 0xeb4   :  { %v2875_v3 = vmul.f32 %v3436_v58, %v2871_v34  ;;  %v2877_v55 = vmul.f32 %v3438_v57, %v2873_v52  ;;  %v3434_v46 = vsel %vm2849_vm1, 1.0, %v3644_v43  ;;  %vm2939_vm13 = vcmp.gt.f32.partialorder %v2935_v27, 0.0 }
 0xeb5   :  { %v2880_v56 = vadd.f32 %v3433_v9, %v2876_v10  ;;  %v2953_v42 = vmul.f32 %v4984_v59, %v4939_v7  ;;  %v2952_v19 = vmul.f32 %v4986_v16, %v4944_v2  ;;  %v3005_v16 = vld [vmem:[%s3172_s25 + $0x18] sm:$0xff]  ;;  %v3052_v9 = vld [vmem:[%s3176_s4] sm:$0x1] }
 0xeb6   :  { %v2879_v29 = vadd.f32 %v3432_v15, %v2875_v3  ;;  %v2881_v6 = vadd.f32 %v3434_v46, %v2877_v55  ;;  %3021 = vmatpush.msra.mxu2 %v3005_v16  ;;  %v3003_v15 = vld [vmem:[%s3172_s25 + $0x8] sm:$0xff] }
 0xeb7   :  { %v2888_v47 = vmul.f32 %v2884_v11, %v2880_v56  ;;  %v2954_v11 = vmul.f32 %v4997_v51, %v4936_v18  ;;  %v3093_v18 = vld [vmem:[%s3177_s5 + $0x10] sm:$0xff]  ;;  %v3092_v51 = vld [vmem:[%s3177_s5 + $0x8] sm:$0xff] }
 0xeb8   :  { %v2887_v37 = vmul.f32 %v2883_v14, %v2879_v29  ;;  %v2889_v25 = vmul.f32 %v2885_v5, %v2881_v6  ;;  %3022 = vmatpush.msra.mxu2 %v3004_v4  ;;  %v3002_v29 = vld [vmem:[%s3172_s25] sm:$0xff] }
 0xeb9   :  { %v5006_v32 = vpop.xlane.xlu0 %2845 }
 0xeba   :  { %3440 = vmatmul.msk.f32.vlgmr.msra.gmra.mxu3 %vm226_vm2, %v2887_v37  ;;  %vm2862_vm3 = vcmp.eq.f32.partialorder %v2830_v30, %v5006_v32  ;;  %vm2850_vm4 = vcmp.gt.f32.partialorder %v2830_v30, %v5006_v32  ;;  %3023 = vmatpush.msra.mxu2 %v3003_v15  ;;  %v3053_v37 = vld [vmem:[%s3173_s28] sm:$0xff] }
 0xebb   :  { %v3439_v54 = vsel %vm2862_vm3, 1.0, %v3644_v43  ;;  %v3435_v44 = vsel %vm2850_vm4, 1.0, %v3644_v43  ;;  %vm3054_vm4 = vcmask 64512   ;;  %3073 = vmatpush.msrb.mxu1 %v3053_v37 }
 0xebc   :  { %v2878_v50 = vmul.f32 %v3439_v54, %v2874_v35  ;;  %3024 = vmatpush.msra.mxu2 %v3002_v29  ;;  %3446 = vmatmul.msk.f32.vlgmr.msrb.gmra.mxu1 %vm3054_vm4, %v3052_v9 }
 0xebe   :  { %v2882_v23 = vadd.f32 %v3435_v44, %v2878_v50 }
 0xec0   :  { %v2890_v45 = vmul.f32 %v2886_v53, %v2882_v23 }
 0xec2   :  { %3441 = vmatmul.msk.f32.gmra.mxu3 %vm226_vm2, %v2888_v47  ;;  %v2955_v47 = vmul.f32 %v5006_v32, %v4931_v8  ;;  %v3094_v8 = vld [vmem:[%s3177_s5 + $0x18] sm:$0xff]  ;;  %v3091_v32 = vld [vmem:[%s3177_s5] sm:$0xff] }
 0xec3   :  { %3111 = vmatpush.msrb.mxu2 %v3094_v8 }
 0xec5   :  { %3112 = vmatpush.msrb.mxu2 %v3093_v18 }
 0xec7   :  { %3113 = vmatpush.msrb.mxu2 %v3092_v51 }
 0xec9   :  { %3114 = vmatpush.msrb.mxu2 %v3091_v32 }
 0xeca   :  { %3442 = vmatmul.msk.f32.gmra.mxu3 %vm226_vm2, %v2889_v25 }
 0xed2   :  { %3443 = vmatmul.msk.f32.gmra.mxu3 %vm226_vm2, %v2890_v45 }
 0xf39   :  { %v3075_v12 = vpop.f32.mrf.mxu1 }
 0xf3d   :  { %v2920_v61 = vpop.f32.mrf.mxu3 }
 0xf3e   :  { %vm2944_vm6 = vcmp.lt.f32.partialorder %v2920_v61, %v2940_v48 }
 0xf3f   :  { %vm2948_vm7 = vmand %vm2936_vm5, %vm2944_vm6 }
 0xf40   :  { %v2956_v60 = vsel %vm2948_vm7, 1, %v5153_v22 }
 0xf41   :  { %2961 = vperm.xlu0 %3499, %v2956_v60   ;;  %v3079_v60 = vld [vmem:[%s3174_s29] sm:$0x1] }
 0xf45   :  { %v2923_v31 = vpop.f32.mrf.mxu3 }
 0xf46   :  { %vm2945_vm9 = vcmp.lt.f32.partialorder %v2923_v31, %v2941_v62 }
 0xf47   :  { %vm2949_vm14 = vmand %vm2937_vm8, %vm2945_vm9 }
 0xf48   :  { %v2957_v30 = vsel %vm2949_vm14, 1, %v5153_v22 }
 0xf49   :  { %3085 = vperm.xlu0 %3499, %v3081_v49  }
 0xf4d   :  { %v2926_v36 = vpop.f32.mrf.mxu3 }
 0xf4e   :  { %vm2946_vm11 = vcmp.lt.f32.partialorder %v2926_v36, %v2942_v39 }
 0xf4f   :  { %vm2950_vm12 = vmand %vm2938_vm10, %vm2946_vm11  ;;  %vm3135_vm11 = vcmask 24576  }
 0xf50   :  { %v2958_v26 = vsel %vm2950_vm12, 1, %v5153_v22 }
 0xf51   :  { %2967 = vperm.xlu2 %3498, %v2958_v26  }
 0xf55   :  { %v2929_v63 = vpop.f32.mrf.mxu3 }
 0xf56   :  { %vm2947_vm15 = vcmp.lt.f32.partialorder %v2929_v63, %v2943_v17 }
 0xf57   :  { %vm2951_vm0 = vmand %vm2939_vm13, %vm2947_vm15 }
 0xf58   :  { %v2959_v33 = vsel %vm2951_vm0, 1, %v5153_v22 }
 0xf59   :  { %2964 = vperm.xlu2 %3498, %v2957_v30   ;;  %2970 = vperm.xlu1 %3500, %v2959_v33   ;;  %v3128_v33 = vlaneseq }
 0xf5b   :  { %v3129_v20 = vand.u32 127, %v3128_v33 }
 0xf5d   :  { %vm3131_vm10 = vcmp.eq.s32.totalorder %v3129_v20, 2 }
 0xfab   :  { %v2968_v41 = vpop.permute.xlu2 %2967 }
 0xfac   :  { %vm2974_vm5 = vcmp.eq.s32.totalorder %v2968_v41, 1 }
 0xfad   :  { %v2978_v55 = vsel %vm2974_vm5, %v2954_v11, -1e+30 }
 0xfae   :  { %v2989_v35 = vsel %vm226_vm2, %v2978_v55, -inf }
 0xfb3   :  { %v2965_v1 = vpop.permute.xlu2 %2964  ;;  %v2962_v34 = vpop.permute.xlu0 %2961 }
 0xfb4   :  { %vm2973_vm1 = vcmp.eq.s32.totalorder %v2965_v1, 1  ;;  %vm2972_vm3 = vcmp.eq.s32.totalorder %v2962_v34, 1 }
 0xfb5   :  { %v2977_v58 = vsel %vm2973_vm1, %v2953_v42, -1e+30  ;;  %v2976_v3 = vsel %vm2972_vm3, %v2952_v19, -1e+30  ;;  %v3132_v42 = vsel %vm3131_vm10, 1.0, %v3644_v43 }
 0xfb6   :  { %v2981_v7 = vsel %vm226_vm2, %v2977_v58, -inf  ;;  %v2980_v59 = vsel %vm226_vm2, %v2976_v3, -inf }
 0xfb7   :  { %v2982_v2 = vmax.f32 %v2980_v59, %v2981_v7 }
 0xfb9   :  { %v2983_v0 = vrot.slane %v2982_v2, 4 }
 0xfbb   :  { %v2984_v14 = vmax.f32 %v2982_v2, %v2983_v0  ;;  %v3086_v22 = vpop.permute.xlu0 %3085 }
 0xfbc   :  { %v3088_v49 = vperm.slane %v3086_v22, 0 }
 0xfbd   :  { %v2985_v10 = vrot.slane %v2984_v14, 2 }
 0xfbf   :  { %v2986_v56 = vmax.f32 %v2984_v14, %v2985_v10 }
 0xfc1   :  { %v2987_v52 = vrot.slane %v2986_v56, 1 }
 0xfc3   :  { %v2988_v57 = vmax.f32 %v2986_v56, %v2987_v52 }
 0xfc5   :  { %3445 = vmatmul.msk.f32.vlgmr.msra.gmra.mxu0 %vm226_vm2, %v2988_v57 }
 0xfcb   :  { %v2971_v46 = vpop.permute.xlu1 %2970 }
 0xfcc   :  { %vm2975_vm6 = vcmp.eq.s32.totalorder %v2971_v46, 1 }
 0xfcd   :  { %v2979_v6 = vsel %vm2975_vm6, %v2955_v47, -1e+30 }
 0xfce   :  { %v2990_v54 = vsel %vm226_vm2, %v2979_v6, -inf }
 0xfcf   :  { %v2991_v5 = vmax.f32 %v2989_v35, %v2990_v54 }
 0xfd1   :  { %v2992_v50 = vrot.slane %v2991_v5, 4 }
 0xfd3   :  { %v2993_v25 = vmax.f32 %v2991_v5, %v2992_v50 }
 0xfd5   :  { %v2994_v44 = vrot.slane %v2993_v25, 2 }
 0xfd7   :  { %v2995_v23 = vmax.f32 %v2993_v25, %v2994_v44 }
 0xfd9   :  { %v2996_v53 = vrot.slane %v2995_v23, 1 }
 0xfdb   :  { %v2997_v45 = vmax.f32 %v2995_v23, %v2996_v53 }
 0xfdd   :  { %3444 = vmatmul.msk.f32.vlgmr.msra.gmra.mxu2 %vm226_vm2, %v2997_v45 }
0x1042   :  { %v3049_v40 = vpop.f32.mrf.mxu0 }
0x1060   :  { %v3026_v48 = vpop.f32.mrf.mxu2 }
0x1061   :  { %v3050_v61 = vadd.f32 %v3049_v40, %v3026_v48 }
0x1063   :  { %v3078_v31 = vadd.f32 %v3075_v12, %v3050_v61 }
0x1065   :  { %v3080_v13 = vadd.f32 %v3079_v60, %v3078_v31 }
0x1067   :  { %vm3082_vm7 = vcmp.gt.f32.partialorder %v3080_v13, 0.0  ;;  %v3089_v39 = vmul.f32 %v3088_v49, %v3080_v13 }
0x1069   :  { %v3090_v36 = vsel %vm3082_vm7, %v3080_v13, %v3089_v39 }
0x106a   :  { %3447 = vmatmul.msk.f32.vlgmr.msrb.gmra.mxu2 %vm226_vm2, %v3090_v36  ;;  %vm3130_vm2 = vcmp.eq.s32.totalorder %v3129_v20, 0 }
0x10ed   :  { %v3116_v62 = vpop.f32.mrf.mxu2 }
0x10ee   :  { %v3117_v26 = vadd.f32 %v3116_v62, %v3095_v38 }
0x10f0   :  { %v3120_v27 = vand.u32 2147483647, %v3117_v26  ;;  %v3119_v28 = vmax.f32 %v3117_v26, 0.0 }
0x10f2   :  { %v3121_v17 = vsub.f32 0.0, %v3120_v27 }
0x10f4   :  { %v3122_v63 = vmul.f32 1.442695, %v3121_v17 }
0x10f6   :  { %3543 = vpow2.f32 %v3122_v63 }
0x10fc   :  { %v3544_v30 = vpop.eup %3543 }
0x10fd   :  { %v3124_v24 = vadd.f32 1.0, %v3544_v30 }
0x10ff   :  { %3545 = vlog2.f32 %v3124_v24 }
0x1105   :  { %v3546_v21 = vpop.eup %3545 }
0x1106   :  { %v3126_v41 = vmul.f32 0.6931472, %v3546_v21 }
0x1108   :  { %v3127_v1 = vadd.f32 %v3126_v41, %v3119_v28 }
0x110a   :  { %v3133_v19 = vadd.f32 %v3132_v42, %v3127_v1 }
0x110c   :  { %v3134_v34 = vsel %vm3130_vm2, %v3117_v26, %v3133_v19 }
0x110d   :  { %3136 = vst.msk [vmem:[%s3179_s16] sm:$0x1] %vm3135_vm11, %v3134_v34 }

</bundles_post_ra>
